<compile_context>
chip_gen: v7x
topology: tpu7x:2x2x1
jax: 0.10.0
libtpu: 0.0.40
codegen_flags: <defaults>
</compile_context>

<pallas_src>
import functools

import numpy as np
import jax
import jax.numpy as jnp
from jax.experimental import pallas as pl
from jax.experimental.pallas import tpu as pltpu

KERNEL_SIZE = 100
POOL = 10
C_OUT = 32
BN_EPS = 1e-5


def cnn_kernel(*refs, apply_bn, tb, t_pool):
    if apply_bn:
        (x_ref, convw_ref, convb_ref, scale_ref, shift_ref,
         w1_ref, b1_ref, w2_ref, b2_ref, w3_ref, b3_ref, w4_ref, b4_ref,
         out_ref, patch_ref) = refs
    else:
        (x_ref, convw_ref, convb_ref,
         w1_ref, b1_ref, w2_ref, b2_ref, w3_ref, b3_ref, w4_ref, b4_ref,
         out_ref, patch_ref) = refs
        scale_ref = shift_ref = None

    # ---- in-kernel im2col from the raw (tb, L) rows: row order is (pool-phase p, tp, b).
    #      Static lane-window slices; scratch row blocks are sublane-aligned when tb % 8 == 0.
    # TODO(synk): for very long inputs (large Tp*POOL) switch this unrolled loop to a
    #             fori_loop with dynamic slice starts to bound kernel IR size.
    for p in range(POOL):
        for tp in range(t_pool):
            t = tp * POOL + p
            r0 = (p * t_pool + tp) * tb
            patch_ref[pl.ds(r0, tb), :] = x_ref[:, pl.ds(t, KERNEL_SIZE)]

    # ---- Conv1d(1 -> 32, K=100): one MXU matmul over the bf16 slab (f32 accumulation) ----
    patches = patch_ref[...].astype(jnp.bfloat16)                      # (POOL*Tp*tb, K)
    conv = jnp.dot(patches, convw_ref[...], preferred_element_type=jnp.float32)
    conv = jnp.maximum(conv + convb_ref[...], 0.0)                     # bias + ReLU
    if apply_bn:                                                       # fallback: BN not folded
        conv = conv * scale_ref[...] + shift_ref[...]

    # ---- MaxPool1d(10): leading-axis max over POOL sublane-aligned (Tp*tb, 32) slabs ----
    pooled = jnp.max(conv.reshape(POOL, t_pool * tb, C_OUT), axis=0)   # (Tp*tb, 32)

    # ---- fc1 as an unrolled sum of per-tp (tb,32)@(32,128) matmuls (weights resident,
    #      no lane-crossing flatten), bf16 operands / f32 accumulation ----
    h = jnp.zeros((tb, 128), jnp.float32)
    for tp in range(t_pool):
        blk = pooled[tp * tb:(tp + 1) * tb, :].astype(jnp.bfloat16)
        h = h + jnp.dot(blk, w1_ref[tp], preferred_element_type=jnp.float32)
    h = jnp.maximum(h + b1_ref[...], 0.0)

    # ---- fc2/fc3 tiny f32 matmuls; fc4 (N=1) as multiply + lane reduction ----
    h = jnp.maximum(jnp.dot(h, w2_ref[...], preferred_element_type=jnp.float32)
                    + b2_ref[...], 0.0)
    h = jnp.maximum(jnp.dot(h, w3_ref[...], preferred_element_type=jnp.float32)
                    + b3_ref[...], 0.0)
    out_ref[...] = jnp.sum(h * w4_ref[...], axis=-1, keepdims=True) + b4_ref[...]


def _vmem_budget():
    try:
        cap = int(pltpu.get_tpu_info().vmem_capacity_bytes)
    except Exception:
        cap = 64 * 1024 * 1024
    # Stay under physical VMEM (v7x: 64 MiB per TC, v5e/v6e: 128 MiB).
    return min(int(cap * 3 // 4), 96 * 1024 * 1024)


def _choose_batch_tile(batch, t_pool, length, vmem_limit):
    """Largest sublane-aligned batch tile whose working set fits the VMEM budget."""
    n_t = POOL * t_pool
    # f32 patch slab + transient bf16 copy + f32 conv slab + double-buffered raw rows + slack.
    per_sample = n_t * KERNEL_SIZE * 6 + n_t * C_OUT * 4 + 2 * length * 4 + 4096
    cap = max(8, (vmem_limit // 2) // per_sample)
    if batch >= 16:
        cap = min(cap, batch // 2)     # >= 2 grid steps: feeds both v7x TCs, pipelines the DMA
    cap = min(cap, batch)
    for tb in range(cap, 0, -1):
        if batch % tb == 0 and (tb % 8 == 0 or tb == batch):
            return tb
    return batch


def cnn_forward(x, params, *, batch_tile=None, fold_bn=None):
    """x: (B, 1, L) float32 (PyTorch NCL).  Returns (B, 1) float32.

    Inference-mode BatchNorm (running stats).  `fold_bn` is a static configuration flag:
    pass it explicitly when params are traced; fold_bn=True requires every per-channel
    BN scale (gamma / sqrt(var + eps)) to be >= 0.
    """
    B, _, L = x.shape
    T = L - KERNEL_SIZE + 1
    Tp = T // POOL
    assert Tp >= 1, "input_length must satisfy (L - kernel_size + 1) >= pooling_size"

    xw = x[:, 0, :].astype(jnp.float32)                               # (B, L) raw rows only

    # BatchNorm1d (inference): y = scale * x + shift with running stats folded.
    scale = params["bn_gamma"] / jnp.sqrt(params["bn_var"] + BN_EPS)  # (C,)
    shift = params["bn_beta"] - params["bn_mean"] * scale             # (C,)

    if fold_bn is None:
        try:   # auto-detect only from concrete params; under jit pass fold_bn explicitly
            fold_bn = bool(np.all(np.asarray(jax.device_get(scale)) >= 0.0))
        except Exception:
            fold_bn = False            # always-correct in-kernel BN path

    convw = params["conv_w"][:, 0, :].T.astype(jnp.float32)           # (K, C)
    convb = params["conv_b"].reshape(1, C_OUT).astype(jnp.float32)

    # torch fc1.weight: (128, C*Tp) with feature index c*Tp + tp -> per-tp (C, 128) slices.
    w1 = params["fc1_w"].reshape(128, C_OUT, Tp).transpose(2, 1, 0).astype(jnp.float32)
    b1 = params["fc1_b"].reshape(1, 128).astype(jnp.float32)

    if fold_bn:
        # BN after ReLU with scale >= 0:  max(s*relu(z) + t)  ==  max(relu(s-folded conv)) ,
        # with the per-channel shift t absorbed into the fc1 bias.
        convw = convw * scale[None, :]
        convb = convb * scale[None, :]
        b1 = b1 + shift.reshape(1, C_OUT).astype(jnp.float32) @ w1.sum(axis=0)
    convw = convw.astype(jnp.bfloat16)
    w1 = w1.astype(jnp.bfloat16)

    w2 = params["fc2_w"].T.astype(jnp.float32)
    b2 = params["fc2_b"].reshape(1, 64).astype(jnp.float32)
    w3 = params["fc3_w"].T.astype(jnp.float32)
    b3 = params["fc3_b"].reshape(1, 32).astype(jnp.float32)
    w4 = params["fc4_w"].reshape(1, 32).astype(jnp.float32)           # row vector for fc4
    b4 = params["fc4_b"].reshape(1, 1).astype(jnp.float32)

    # ---- batch-parallel grid over raw rows ----
    vmem_limit = _vmem_budget()
    tb = batch_tile if batch_tile is not None else _choose_batch_tile(B, Tp, L, vmem_limit)
    assert B % tb == 0, (B, tb)
    n_steps = B // tb

    def const_spec(op):
        return pl.BlockSpec(op.shape, lambda i, nd=op.ndim: (0,) * nd)  # VMEM-resident weights

    weight_operands = [convw, convb]
    if not fold_bn:
        weight_operands += [scale.reshape(1, C_OUT).astype(jnp.float32),
                            shift.reshape(1, C_OUT).astype(jnp.float32)]
    weight_operands += [w1, b1, w2, b2, w3, b3, w4, b4]

    kernel = functools.partial(cnn_kernel, apply_bn=not fold_bn, tb=tb, t_pool=Tp)
    return pl.pallas_call(
        kernel,
        out_shape=jax.ShapeDtypeStruct((B, 1), jnp.float32),
        grid=(n_steps,),
        in_specs=[pl.BlockSpec((tb, L), lambda i: (i, 0))]
                 + [const_spec(op) for op in weight_operands],
        out_specs=pl.BlockSpec((tb, 1), lambda i: (i, 0)),
        scratch_shapes=[pltpu.VMEM((POOL * Tp * tb, KERNEL_SIZE), jnp.float32)],
        compiler_params=pltpu.CompilerParams(
            dimension_semantics=("parallel",),
            vmem_limit_bytes=vmem_limit),
    )(xw, *weight_operands)


def cnn_reference(x, params):
    """Pure-JAX reference with PyTorch semantics (NCL, channel-major flatten, pool floor)."""
    B, _, L = x.shape
    T = L - KERNEL_SIZE + 1
    Tp = T // POOL
    xw = x[:, 0, :]
    idx = jnp.arange(T)[:, None] + jnp.arange(KERNEL_SIZE)[None, :]
    patches = xw[:, idx]                                              # (B, T, K)
    conv = jnp.einsum('btk,ck->bct', patches, params["conv_w"][:, 0, :],
                      preferred_element_type=jnp.float32)
    conv = conv + params["conv_b"][None, :, None]
    conv = jnp.maximum(conv, 0.0)
    inv = params["bn_gamma"] / jnp.sqrt(params["bn_var"] + BN_EPS)
    conv = (conv - params["bn_mean"][None, :, None]) * inv[None, :, None] \
           + params["bn_beta"][None, :, None]
    conv = conv[:, :, :Tp * POOL]                                     # MaxPool1d floors
    pooled = conv.reshape(B, C_OUT, Tp, POOL).max(axis=-1)            # (B, C, Tp)
    flat = pooled.reshape(B, C_OUT * Tp)
    h = jnp.maximum(flat @ params["fc1_w"].T + params["fc1_b"], 0.0)
    h = jnp.maximum(h @ params["fc2_w"].T + params["fc2_b"], 0.0)
    h = jnp.maximum(h @ params["fc3_w"].T + params["fc3_b"], 0.0)
    return h @ params["fc4_w"].T + params["fc4_b"]


def init_params(key, input_length):
    T = input_length - KERNEL_SIZE + 1
    feat = C_OUT * (T // POOL)
    ks = jax.random.split(key, 14)
    n = lambda k, s, sc=0.05: (jax.random.normal(k, s) * sc).astype(jnp.float32)
    return {
        "conv_w": n(ks[0], (C_OUT, 1, KERNEL_SIZE)),
        "conv_b": n(ks[1], (C_OUT,)),
        "bn_gamma": (1.0 + 0.1 * jax.random.normal(ks[2], (C_OUT,))).astype(jnp.float32),
        "bn_beta": n(ks[3], (C_OUT,), 0.1),
        "bn_mean": n(ks[4], (C_OUT,), 0.1),
        "bn_var": (0.9 + 0.2 * jax.random.uniform(ks[5], (C_OUT,))).astype(jnp.float32),
        "fc1_w": n(ks[6], (128, feat)),
        "fc1_b": n(ks[7], (128,)),
        "fc2_w": n(ks[8], (64, 128)),
        "fc2_b": n(ks[9], (64,)),
        "fc3_w": n(ks[10], (32, 64)),
        "fc3_b": n(ks[11], (32,)),
        "fc4_w": n(ks[12], (1, 32)),
        "fc4_b": n(ks[13], (1,)),
    }


if __name__ == "__main__":
    # kernel_size=100 forces L >= 109; L=199 -> conv T=100, pooled Tp=10, features = 320.
    # B=16 with the auto-chosen tile (tb=8) exercises a 2-step "parallel" grid.
    B, L = 16, 199
    key = jax.random.PRNGKey(0)
    kx, kp = jax.random.split(key)
    x = jax.random.normal(kx, (B, 1, L), dtype=jnp.float32)
    params = init_params(kp, L)

    out = jax.block_until_ready(cnn_forward(x, params))
    ref = jax.block_until_ready(cnn_reference(x, params))

    assert out.shape == (B, 1), out.shape
    assert jnp.allclose(out, ref, rtol=2e-2, atol=2e-2), (out, ref)
    print("KERNEL_OK")
</pallas_src>

<mosaic_0001>
module attributes {stable_mosaic.version = 11 : i64} {
  func.func @cnn_kernel(%arg0: i32, %arg1: memref<8x199xf32, #tpu.memory_space<vmem>>, %arg2: memref<100x32xbf16, #tpu.memory_space<vmem>>, %arg3: memref<1x32xf32, #tpu.memory_space<vmem>>, %arg4: memref<10x32x128xbf16, #tpu.memory_space<vmem>>, %arg5: memref<1x128xf32, #tpu.memory_space<vmem>>, %arg6: memref<128x64xf32, #tpu.memory_space<vmem>>, %arg7: memref<1x64xf32, #tpu.memory_space<vmem>>, %arg8: memref<64x32xf32, #tpu.memory_space<vmem>>, %arg9: memref<1x32xf32, #tpu.memory_space<vmem>>, %arg10: memref<1x32xf32, #tpu.memory_space<vmem>>, %arg11: memref<1x1xf32, #tpu.memory_space<vmem>>, %arg12: memref<8x1xf32, #tpu.memory_space<vmem>>, %arg13: memref<800x100xf32, #tpu.memory_space<vmem>>) attributes {dimension_semantics = [#tpu.dimension_semantics<parallel>], iteration_bounds = array<i64: 2>, scalar_prefetch = 0 : i64, scratch_operands = 1 : i64, tpu.core_type = #tpu.core_type<tc>, window_params = [{transform_indices = @transform_0, window_bounds = array<i64: 8, 199>}, {pipeline_mode = #tpu.pipeline_mode<synchronous>, transform_indices = @transform_1, window_bounds = array<i64: 100, 32>}, {pipeline_mode = #tpu.pipeline_mode<synchronous>, transform_indices = @transform_2, window_bounds = array<i64: 1, 32>}, {pipeline_mode = #tpu.pipeline_mode<synchronous>, transform_indices = @transform_3, window_bounds = array<i64: 10, 32, 128>}, {pipeline_mode = #tpu.pipeline_mode<synchronous>, transform_indices = @transform_4, window_bounds = array<i64: 1, 128>}, {pipeline_mode = #tpu.pipeline_mode<synchronous>, transform_indices = @transform_5, window_bounds = array<i64: 128, 64>}, {pipeline_mode = #tpu.pipeline_mode<synchronous>, transform_indices = @transform_6, window_bounds = array<i64: 1, 64>}, {pipeline_mode = #tpu.pipeline_mode<synchronous>, transform_indices = @transform_7, window_bounds = array<i64: 64, 32>}, {pipeline_mode = #tpu.pipeline_mode<synchronous>, transform_indices = @transform_8, window_bounds = array<i64: 1, 32>}, {pipeline_mode = #tpu.pipeline_mode<synchronous>, transform_indices = @transform_9, window_bounds = array<i64: 1, 32>}, {pipeline_mode = #tpu.pipeline_mode<synchronous>, transform_indices = @transform_10, window_bounds = array<i64: 1, 1>}, {transform_indices = @transform_11, window_bounds = array<i64: 8, 1>}]} {
    %c0 = arith.constant 0 : index
    %c0_0 = arith.constant 0 : index
    %0 = vector.load %arg1[%c0, %c0_0] : memref<8x199xf32, #tpu.memory_space<vmem>>, vector<8x100xf32>
    %c0_1 = arith.constant 0 : index
    %c0_2 = arith.constant 0 : index
    %1 = vector.load %arg13[%c0_1, %c0_2] : memref<800x100xf32, #tpu.memory_space<vmem>>, vector<8x100xf32>
    tpu.vector_store %arg13[%c0_1, %c0_2], %0 {strides = array<i32>} : memref<800x100xf32, #tpu.memory_space<vmem>>, vector<8x100xf32>,
    %c0_3 = arith.constant 0 : index
    %c10 = arith.constant 10 : index
    %2 = vector.load %arg1[%c0_3, %c10] : memref<8x199xf32, #tpu.memory_space<vmem>>, vector<8x100xf32>
    %c8 = arith.constant 8 : index
    %c0_4 = arith.constant 0 : index
    %3 = vector.load %arg13[%c8, %c0_4] : memref<800x100xf32, #tpu.memory_space<vmem>>, vector<8x100xf32>
    tpu.vector_store %arg13[%c8, %c0_4], %2 {strides = array<i32>} : memref<800x100xf32, #tpu.memory_space<vmem>>, vector<8x100xf32>,
    %c0_5 = arith.constant 0 : index
    %c20 = arith.constant 20 : index
    %4 = vector.load %arg1[%c0_5, %c20] : memref<8x199xf32, #tpu.memory_space<vmem>>, vector<8x100xf32>
    %c16 = arith.constant 16 : index
    %c0_6 = arith.constant 0 : index
    %5 = vector.load %arg13[%c16, %c0_6] : memref<800x100xf32, #tpu.memory_space<vmem>>, vector<8x100xf32>
    tpu.vector_store %arg13[%c16, %c0_6], %4 {strides = array<i32>} : memref<800x100xf32, #tpu.memory_space<vmem>>, vector<8x100xf32>,
    %c0_7 = arith.constant 0 : index
    %c30 = arith.constant 30 : index
    %6 = vector.load %arg1[%c0_7, %c30] : memref<8x199xf32, #tpu.memory_space<vmem>>, vector<8x100xf32>
    %c24 = arith.constant 24 : index
    %c0_8 = arith.constant 0 : index
    %7 = vector.load %arg13[%c24, %c0_8] : memref<800x100xf32, #tpu.memory_space<vmem>>, vector<8x100xf32>
    tpu.vector_store %arg13[%c24, %c0_8], %6 {strides = array<i32>} : memref<800x100xf32, #tpu.memory_space<vmem>>, vector<8x100xf32>,
    %c0_9 = arith.constant 0 : index
    %c40 = arith.constant 40 : index
    %8 = vector.load %arg1[%c0_9, %c40] : memref<8x199xf32, #tpu.memory_space<vmem>>, vector<8x100xf32>
    %c32 = arith.constant 32 : index
    %c0_10 = arith.constant 0 : index
    %9 = vector.load %arg13[%c32, %c0_10] : memref<800x100xf32, #tpu.memory_space<vmem>>, vector<8x100xf32>
    tpu.vector_store %arg13[%c32, %c0_10], %8 {strides = array<i32>} : memref<800x100xf32, #tpu.memory_space<vmem>>, vector<8x100xf32>,
    %c0_11 = arith.constant 0 : index
    %c50 = arith.constant 50 : index
    %10 = vector.load %arg1[%c0_11, %c50] : memref<8x199xf32, #tpu.memory_space<vmem>>, vector<8x100xf32>
    %c40_12 = arith.constant 40 : index
    %c0_13 = arith.constant 0 : index
    %11 = vector.load %arg13[%c40_12, %c0_13] : memref<800x100xf32, #tpu.memory_space<vmem>>, vector<8x100xf32>
    tpu.vector_store %arg13[%c40_12, %c0_13], %10 {strides = array<i32>} : memref<800x100xf32, #tpu.memory_space<vmem>>, vector<8x100xf32>,
    %c0_14 = arith.constant 0 : index
    %c60 = arith.constant 60 : index
    %12 = vector.load %arg1[%c0_14, %c60] : memref<8x199xf32, #tpu.memory_space<vmem>>, vector<8x100xf32>
    %c48 = arith.constant 48 : index
    %c0_15 = arith.constant 0 : index
    %13 = vector.load %arg13[%c48, %c0_15] : memref<800x100xf32, #tpu.memory_space<vmem>>, vector<8x100xf32>
    tpu.vector_store %arg13[%c48, %c0_15], %12 {strides = array<i32>} : memref<800x100xf32, #tpu.memory_space<vmem>>, vector<8x100xf32>,
    %c0_16 = arith.constant 0 : index
    %c70 = arith.constant 70 : index
    %14 = vector.load %arg1[%c0_16, %c70] : memref<8x199xf32, #tpu.memory_space<vmem>>, vector<8x100xf32>
    %c56 = arith.constant 56 : index
    %c0_17 = arith.constant 0 : index
    %15 = vector.load %arg13[%c56, %c0_17] : memref<800x100xf32, #tpu.memory_space<vmem>>, vector<8x100xf32>
    tpu.vector_store %arg13[%c56, %c0_17], %14 {strides = array<i32>} : memref<800x100xf32, #tpu.memory_space<vmem>>, vector<8x100xf32>,
    %c0_18 = arith.constant 0 : index
    %c80 = arith.constant 80 : index
    %16 = vector.load %arg1[%c0_18, %c80] : memref<8x199xf32, #tpu.memory_space<vmem>>, vector<8x100xf32>
    %c64 = arith.constant 64 : index
    %c0_19 = arith.constant 0 : index
    %17 = vector.load %arg13[%c64, %c0_19] : memref<800x100xf32, #tpu.memory_space<vmem>>, vector<8x100xf32>
    tpu.vector_store %arg13[%c64, %c0_19], %16 {strides = array<i32>} : memref<800x100xf32, #tpu.memory_space<vmem>>, vector<8x100xf32>,
    %c0_20 = arith.constant 0 : index
    %c90 = arith.constant 90 : index
    %18 = vector.load %arg1[%c0_20, %c90] : memref<8x199xf32, #tpu.memory_space<vmem>>, vector<8x100xf32>
    %c72 = arith.constant 72 : index
    %c0_21 = arith.constant 0 : index
    %19 = vector.load %arg13[%c72, %c0_21] : memref<800x100xf32, #tpu.memory_space<vmem>>, vector<8x100xf32>
    tpu.vector_store %arg13[%c72, %c0_21], %18 {strides = array<i32>} : memref<800x100xf32, #tpu.memory_space<vmem>>, vector<8x100xf32>,
    %c0_22 = arith.constant 0 : index
    %c1 = arith.constant 1 : index
    %20 = vector.load %arg1[%c0_22, %c1] : memref<8x199xf32, #tpu.memory_space<vmem>>, vector<8x100xf32>
    %c80_23 = arith.constant 80 : index
    %c0_24 = arith.constant 0 : index
    %21 = vector.load %arg13[%c80_23, %c0_24] : memref<800x100xf32, #tpu.memory_space<vmem>>, vector<8x100xf32>
    tpu.vector_store %arg13[%c80_23, %c0_24], %20 {strides = array<i32>} : memref<800x100xf32, #tpu.memory_space<vmem>>, vector<8x100xf32>,
    %c0_25 = arith.constant 0 : index
    %c11 = arith.constant 11 : index
    %22 = vector.load %arg1[%c0_25, %c11] : memref<8x199xf32, #tpu.memory_space<vmem>>, vector<8x100xf32>
    %c88 = arith.constant 88 : index
    %c0_26 = arith.constant 0 : index
    %23 = vector.load %arg13[%c88, %c0_26] : memref<800x100xf32, #tpu.memory_space<vmem>>, vector<8x100xf32>
    tpu.vector_store %arg13[%c88, %c0_26], %22 {strides = array<i32>} : memref<800x100xf32, #tpu.memory_space<vmem>>, vector<8x100xf32>,
    %c0_27 = arith.constant 0 : index
    %c21 = arith.constant 21 : index
    %24 = vector.load %arg1[%c0_27, %c21] : memref<8x199xf32, #tpu.memory_space<vmem>>, vector<8x100xf32>
    %c96 = arith.constant 96 : index
    %c0_28 = arith.constant 0 : index
    %25 = vector.load %arg13[%c96, %c0_28] : memref<800x100xf32, #tpu.memory_space<vmem>>, vector<8x100xf32>
    tpu.vector_store %arg13[%c96, %c0_28], %24 {strides = array<i32>} : memref<800x100xf32, #tpu.memory_space<vmem>>, vector<8x100xf32>,
    %c0_29 = arith.constant 0 : index
    %c31 = arith.constant 31 : index
    %26 = vector.load %arg1[%c0_29, %c31] : memref<8x199xf32, #tpu.memory_space<vmem>>, vector<8x100xf32>
    %c104 = arith.constant 104 : index
    %c0_30 = arith.constant 0 : index
    %27 = vector.load %arg13[%c104, %c0_30] : memref<800x100xf32, #tpu.memory_space<vmem>>, vector<8x100xf32>
    tpu.vector_store %arg13[%c104, %c0_30], %26 {strides = array<i32>} : memref<800x100xf32, #tpu.memory_space<vmem>>, vector<8x100xf32>,
    %c0_31 = arith.constant 0 : index
    %c41 = arith.constant 41 : index
    %28 = vector.load %arg1[%c0_31, %c41] : memref<8x199xf32, #tpu.memory_space<vmem>>, vector<8x100xf32>
    %c112 = arith.constant 112 : index
    %c0_32 = arith.constant 0 : index
    %29 = vector.load %arg13[%c112, %c0_32] : memref<800x100xf32, #tpu.memory_space<vmem>>, vector<8x100xf32>
    tpu.vector_store %arg13[%c112, %c0_32], %28 {strides = array<i32>} : memref<800x100xf32, #tpu.memory_space<vmem>>, vector<8x100xf32>,
    %c0_33 = arith.constant 0 : index
    %c51 = arith.constant 51 : index
    %30 = vector.load %arg1[%c0_33, %c51] : memref<8x199xf32, #tpu.memory_space<vmem>>, vector<8x100xf32>
    %c120 = arith.constant 120 : index
    %c0_34 = arith.constant 0 : index
    %31 = vector.load %arg13[%c120, %c0_34] : memref<800x100xf32, #tpu.memory_space<vmem>>, vector<8x100xf32>
    tpu.vector_store %arg13[%c120, %c0_34], %30 {strides = array<i32>} : memref<800x100xf32, #tpu.memory_space<vmem>>, vector<8x100xf32>,
    %c0_35 = arith.constant 0 : index
    %c61 = arith.constant 61 : index
    %32 = vector.load %arg1[%c0_35, %c61] : memref<8x199xf32, #tpu.memory_space<vmem>>, vector<8x100xf32>
    %c128 = arith.constant 128 : index
    %c0_36 = arith.constant 0 : index
    %33 = vector.load %arg13[%c128, %c0_36] : memref<800x100xf32, #tpu.memory_space<vmem>>, vector<8x100xf32>
    tpu.vector_store %arg13[%c128, %c0_36], %32 {strides = array<i32>} : memref<800x100xf32, #tpu.memory_space<vmem>>, vector<8x100xf32>,
    %c0_37 = arith.constant 0 : index
    %c71 = arith.constant 71 : index
    %34 = vector.load %arg1[%c0_37, %c71] : memref<8x199xf32, #tpu.memory_space<vmem>>, vector<8x100xf32>
    %c136 = arith.constant 136 : index
    %c0_38 = arith.constant 0 : index
    %35 = vector.load %arg13[%c136, %c0_38] : memref<800x100xf32, #tpu.memory_space<vmem>>, vector<8x100xf32>
    tpu.vector_store %arg13[%c136, %c0_38], %34 {strides = array<i32>} : memref<800x100xf32, #tpu.memory_space<vmem>>, vector<8x100xf32>,
    %c0_39 = arith.constant 0 : index
    %c81 = arith.constant 81 : index
    %36 = vector.load %arg1[%c0_39, %c81] : memref<8x199xf32, #tpu.memory_space<vmem>>, vector<8x100xf32>
    %c144 = arith.constant 144 : index
    %c0_40 = arith.constant 0 : index
    %37 = vector.load %arg13[%c144, %c0_40] : memref<800x100xf32, #tpu.memory_space<vmem>>, vector<8x100xf32>
    tpu.vector_store %arg13[%c144, %c0_40], %36 {strides = array<i32>} : memref<800x100xf32, #tpu.memory_space<vmem>>, vector<8x100xf32>,
    %c0_41 = arith.constant 0 : index
    %c91 = arith.constant 91 : index
    %38 = vector.load %arg1[%c0_41, %c91] : memref<8x199xf32, #tpu.memory_space<vmem>>, vector<8x100xf32>
    %c152 = arith.constant 152 : index
    %c0_42 = arith.constant 0 : index
    %39 = vector.load %arg13[%c152, %c0_42] : memref<800x100xf32, #tpu.memory_space<vmem>>, vector<8x100xf32>
    tpu.vector_store %arg13[%c152, %c0_42], %38 {strides = array<i32>} : memref<800x100xf32, #tpu.memory_space<vmem>>, vector<8x100xf32>,
    %c0_43 = arith.constant 0 : index
    %c2 = arith.constant 2 : index
    %40 = vector.load %arg1[%c0_43, %c2] : memref<8x199xf32, #tpu.memory_space<vmem>>, vector<8x100xf32>
    %c160 = arith.constant 160 : index
    %c0_44 = arith.constant 0 : index
    %41 = vector.load %arg13[%c160, %c0_44] : memref<800x100xf32, #tpu.memory_space<vmem>>, vector<8x100xf32>
    tpu.vector_store %arg13[%c160, %c0_44], %40 {strides = array<i32>} : memref<800x100xf32, #tpu.memory_space<vmem>>, vector<8x100xf32>,
    %c0_45 = arith.constant 0 : index
    %c12 = arith.constant 12 : index
    %42 = vector.load %arg1[%c0_45, %c12] : memref<8x199xf32, #tpu.memory_space<vmem>>, vector<8x100xf32>
    %c168 = arith.constant 168 : index
    %c0_46 = arith.constant 0 : index
    %43 = vector.load %arg13[%c168, %c0_46] : memref<800x100xf32, #tpu.memory_space<vmem>>, vector<8x100xf32>
    tpu.vector_store %arg13[%c168, %c0_46], %42 {strides = array<i32>} : memref<800x100xf32, #tpu.memory_space<vmem>>, vector<8x100xf32>,
    %c0_47 = arith.constant 0 : index
    %c22 = arith.constant 22 : index
    %44 = vector.load %arg1[%c0_47, %c22] : memref<8x199xf32, #tpu.memory_space<vmem>>, vector<8x100xf32>
    %c176 = arith.constant 176 : index
    %c0_48 = arith.constant 0 : index
    %45 = vector.load %arg13[%c176, %c0_48] : memref<800x100xf32, #tpu.memory_space<vmem>>, vector<8x100xf32>
    tpu.vector_store %arg13[%c176, %c0_48], %44 {strides = array<i32>} : memref<800x100xf32, #tpu.memory_space<vmem>>, vector<8x100xf32>,
    %c0_49 = arith.constant 0 : index
    %c32_50 = arith.constant 32 : index
    %46 = vector.load %arg1[%c0_49, %c32_50] : memref<8x199xf32, #tpu.memory_space<vmem>>, vector<8x100xf32>
    %c184 = arith.constant 184 : index
    %c0_51 = arith.constant 0 : index
    %47 = vector.load %arg13[%c184, %c0_51] : memref<800x100xf32, #tpu.memory_space<vmem>>, vector<8x100xf32>
    tpu.vector_store %arg13[%c184, %c0_51], %46 {strides = array<i32>} : memref<800x100xf32, #tpu.memory_space<vmem>>, vector<8x100xf32>,
    %c0_52 = arith.constant 0 : index
    %c42 = arith.constant 42 : index
    %48 = vector.load %arg1[%c0_52, %c42] : memref<8x199xf32, #tpu.memory_space<vmem>>, vector<8x100xf32>
    %c192 = arith.constant 192 : index
    %c0_53 = arith.constant 0 : index
    %49 = vector.load %arg13[%c192, %c0_53] : memref<800x100xf32, #tpu.memory_space<vmem>>, vector<8x100xf32>
    tpu.vector_store %arg13[%c192, %c0_53], %48 {strides = array<i32>} : memref<800x100xf32, #tpu.memory_space<vmem>>, vector<8x100xf32>,
    %c0_54 = arith.constant 0 : index
    %c52 = arith.constant 52 : index
    %50 = vector.load %arg1[%c0_54, %c52] : memref<8x199xf32, #tpu.memory_space<vmem>>, vector<8x100xf32>
    %c200 = arith.constant 200 : index
    %c0_55 = arith.constant 0 : index
    %51 = vector.load %arg13[%c200, %c0_55] : memref<800x100xf32, #tpu.memory_space<vmem>>, vector<8x100xf32>
    tpu.vector_store %arg13[%c200, %c0_55], %50 {strides = array<i32>} : memref<800x100xf32, #tpu.memory_space<vmem>>, vector<8x100xf32>,
    %c0_56 = arith.constant 0 : index
    %c62 = arith.constant 62 : index
    %52 = vector.load %arg1[%c0_56, %c62] : memref<8x199xf32, #tpu.memory_space<vmem>>, vector<8x100xf32>
    %c208 = arith.constant 208 : index
    %c0_57 = arith.constant 0 : index
    %53 = vector.load %arg13[%c208, %c0_57] : memref<800x100xf32, #tpu.memory_space<vmem>>, vector<8x100xf32>
    tpu.vector_store %arg13[%c208, %c0_57], %52 {strides = array<i32>} : memref<800x100xf32, #tpu.memory_space<vmem>>, vector<8x100xf32>,
    %c0_58 = arith.constant 0 : index
    %c72_59 = arith.constant 72 : index
    %54 = vector.load %arg1[%c0_58, %c72_59] : memref<8x199xf32, #tpu.memory_space<vmem>>, vector<8x100xf32>
    %c216 = arith.constant 216 : index
    %c0_60 = arith.constant 0 : index
    %55 = vector.load %arg13[%c216, %c0_60] : memref<800x100xf32, #tpu.memory_space<vmem>>, vector<8x100xf32>
    tpu.vector_store %arg13[%c216, %c0_60], %54 {strides = array<i32>} : memref<800x100xf32, #tpu.memory_space<vmem>>, vector<8x100xf32>,
    %c0_61 = arith.constant 0 : index
    %c82 = arith.constant 82 : index
    %56 = vector.load %arg1[%c0_61, %c82] : memref<8x199xf32, #tpu.memory_space<vmem>>, vector<8x100xf32>
    %c224 = arith.constant 224 : index
    %c0_62 = arith.constant 0 : index
    %57 = vector.load %arg13[%c224, %c0_62] : memref<800x100xf32, #tpu.memory_space<vmem>>, vector<8x100xf32>
    tpu.vector_store %arg13[%c224, %c0_62], %56 {strides = array<i32>} : memref<800x100xf32, #tpu.memory_space<vmem>>, vector<8x100xf32>,
    %c0_63 = arith.constant 0 : index
    %c92 = arith.constant 92 : index
    %58 = vector.load %arg1[%c0_63, %c92] : memref<8x199xf32, #tpu.memory_space<vmem>>, vector<8x100xf32>
    %c232 = arith.constant 232 : index
    %c0_64 = arith.constant 0 : index
    %59 = vector.load %arg13[%c232, %c0_64] : memref<800x100xf32, #tpu.memory_space<vmem>>, vector<8x100xf32>
    tpu.vector_store %arg13[%c232, %c0_64], %58 {strides = array<i32>} : memref<800x100xf32, #tpu.memory_space<vmem>>, vector<8x100xf32>,
    %c0_65 = arith.constant 0 : index
    %c3 = arith.constant 3 : index
    %60 = vector.load %arg1[%c0_65, %c3] : memref<8x199xf32, #tpu.memory_space<vmem>>, vector<8x100xf32>
    %c240 = arith.constant 240 : index
    %c0_66 = arith.constant 0 : index
    %61 = vector.load %arg13[%c240, %c0_66] : memref<800x100xf32, #tpu.memory_space<vmem>>, vector<8x100xf32>
    tpu.vector_store %arg13[%c240, %c0_66], %60 {strides = array<i32>} : memref<800x100xf32, #tpu.memory_space<vmem>>, vector<8x100xf32>,
    %c0_67 = arith.constant 0 : index
    %c13 = arith.constant 13 : index
    %62 = vector.load %arg1[%c0_67, %c13] : memref<8x199xf32, #tpu.memory_space<vmem>>, vector<8x100xf32>
    %c248 = arith.constant 248 : index
    %c0_68 = arith.constant 0 : index
    %63 = vector.load %arg13[%c248, %c0_68] : memref<800x100xf32, #tpu.memory_space<vmem>>, vector<8x100xf32>
    tpu.vector_store %arg13[%c248, %c0_68], %62 {strides = array<i32>} : memref<800x100xf32, #tpu.memory_space<vmem>>, vector<8x100xf32>,
    %c0_69 = arith.constant 0 : index
    %c23 = arith.constant 23 : index
    %64 = vector.load %arg1[%c0_69, %c23] : memref<8x199xf32, #tpu.memory_space<vmem>>, vector<8x100xf32>
    %c256 = arith.constant 256 : index
    %c0_70 = arith.constant 0 : index
    %65 = vector.load %arg13[%c256, %c0_70] : memref<800x100xf32, #tpu.memory_space<vmem>>, vector<8x100xf32>
    tpu.vector_store %arg13[%c256, %c0_70], %64 {strides = array<i32>} : memref<800x100xf32, #tpu.memory_space<vmem>>, vector<8x100xf32>,
    %c0_71 = arith.constant 0 : index
    %c33 = arith.constant 33 : index
    %66 = vector.load %arg1[%c0_71, %c33] : memref<8x199xf32, #tpu.memory_space<vmem>>, vector<8x100xf32>
    %c264 = arith.constant 264 : index
    %c0_72 = arith.constant 0 : index
    %67 = vector.load %arg13[%c264, %c0_72] : memref<800x100xf32, #tpu.memory_space<vmem>>, vector<8x100xf32>
    tpu.vector_store %arg13[%c264, %c0_72], %66 {strides = array<i32>} : memref<800x100xf32, #tpu.memory_space<vmem>>, vector<8x100xf32>,
    %c0_73 = arith.constant 0 : index
    %c43 = arith.constant 43 : index
    %68 = vector.load %arg1[%c0_73, %c43] : memref<8x199xf32, #tpu.memory_space<vmem>>, vector<8x100xf32>
    %c272 = arith.constant 272 : index
    %c0_74 = arith.constant 0 : index
    %69 = vector.load %arg13[%c272, %c0_74] : memref<800x100xf32, #tpu.memory_space<vmem>>, vector<8x100xf32>
    tpu.vector_store %arg13[%c272, %c0_74], %68 {strides = array<i32>} : memref<800x100xf32, #tpu.memory_space<vmem>>, vector<8x100xf32>,
    %c0_75 = arith.constant 0 : index
    %c53 = arith.constant 53 : index
    %70 = vector.load %arg1[%c0_75, %c53] : memref<8x199xf32, #tpu.memory_space<vmem>>, vector<8x100xf32>
    %c280 = arith.constant 280 : index
    %c0_76 = arith.constant 0 : index
    %71 = vector.load %arg13[%c280, %c0_76] : memref<800x100xf32, #tpu.memory_space<vmem>>, vector<8x100xf32>
    tpu.vector_store %arg13[%c280, %c0_76], %70 {strides = array<i32>} : memref<800x100xf32, #tpu.memory_space<vmem>>, vector<8x100xf32>,
    %c0_77 = arith.constant 0 : index
    %c63 = arith.constant 63 : index
    %72 = vector.load %arg1[%c0_77, %c63] : memref<8x199xf32, #tpu.memory_space<vmem>>, vector<8x100xf32>
    %c288 = arith.constant 288 : index
    %c0_78 = arith.constant 0 : index
    %73 = vector.load %arg13[%c288, %c0_78] : memref<800x100xf32, #tpu.memory_space<vmem>>, vector<8x100xf32>
    tpu.vector_store %arg13[%c288, %c0_78], %72 {strides = array<i32>} : memref<800x100xf32, #tpu.memory_space<vmem>>, vector<8x100xf32>,
    %c0_79 = arith.constant 0 : index
    %c73 = arith.constant 73 : index
    %74 = vector.load %arg1[%c0_79, %c73] : memref<8x199xf32, #tpu.memory_space<vmem>>, vector<8x100xf32>
    %c296 = arith.constant 296 : index
    %c0_80 = arith.constant 0 : index
    %75 = vector.load %arg13[%c296, %c0_80] : memref<800x100xf32, #tpu.memory_space<vmem>>, vector<8x100xf32>
    tpu.vector_store %arg13[%c296, %c0_80], %74 {strides = array<i32>} : memref<800x100xf32, #tpu.memory_space<vmem>>, vector<8x100xf32>,
    %c0_81 = arith.constant 0 : index
    %c83 = arith.constant 83 : index
    %76 = vector.load %arg1[%c0_81, %c83] : memref<8x199xf32, #tpu.memory_space<vmem>>, vector<8x100xf32>
    %c304 = arith.constant 304 : index
    %c0_82 = arith.constant 0 : index
    %77 = vector.load %arg13[%c304, %c0_82] : memref<800x100xf32, #tpu.memory_space<vmem>>, vector<8x100xf32>
    tpu.vector_store %arg13[%c304, %c0_82], %76 {strides = array<i32>} : memref<800x100xf32, #tpu.memory_space<vmem>>, vector<8x100xf32>,
    %c0_83 = arith.constant 0 : index
    %c93 = arith.constant 93 : index
    %78 = vector.load %arg1[%c0_83, %c93] : memref<8x199xf32, #tpu.memory_space<vmem>>, vector<8x100xf32>
    %c312 = arith.constant 312 : index
    %c0_84 = arith.constant 0 : index
    %79 = vector.load %arg13[%c312, %c0_84] : memref<800x100xf32, #tpu.memory_space<vmem>>, vector<8x100xf32>
    tpu.vector_store %arg13[%c312, %c0_84], %78 {strides = array<i32>} : memref<800x100xf32, #tpu.memory_space<vmem>>, vector<8x100xf32>,
    %c0_85 = arith.constant 0 : index
    %c4 = arith.constant 4 : index
    %80 = vector.load %arg1[%c0_85, %c4] : memref<8x199xf32, #tpu.memory_space<vmem>>, vector<8x100xf32>
    %c320 = arith.constant 320 : index
    %c0_86 = arith.constant 0 : index
    %81 = vector.load %arg13[%c320, %c0_86] : memref<800x100xf32, #tpu.memory_space<vmem>>, vector<8x100xf32>
    tpu.vector_store %arg13[%c320, %c0_86], %80 {strides = array<i32>} : memref<800x100xf32, #tpu.memory_space<vmem>>, vector<8x100xf32>,
    %c0_87 = arith.constant 0 : index
    %c14 = arith.constant 14 : index
    %82 = vector.load %arg1[%c0_87, %c14] : memref<8x199xf32, #tpu.memory_space<vmem>>, vector<8x100xf32>
    %c328 = arith.constant 328 : index
    %c0_88 = arith.constant 0 : index
    %83 = vector.load %arg13[%c328, %c0_88] : memref<800x100xf32, #tpu.memory_space<vmem>>, vector<8x100xf32>
    tpu.vector_store %arg13[%c328, %c0_88], %82 {strides = array<i32>} : memref<800x100xf32, #tpu.memory_space<vmem>>, vector<8x100xf32>,
    %c0_89 = arith.constant 0 : index
    %c24_90 = arith.constant 24 : index
    %84 = vector.load %arg1[%c0_89, %c24_90] : memref<8x199xf32, #tpu.memory_space<vmem>>, vector<8x100xf32>
    %c336 = arith.constant 336 : index
    %c0_91 = arith.constant 0 : index
    %85 = vector.load %arg13[%c336, %c0_91] : memref<800x100xf32, #tpu.memory_space<vmem>>, vector<8x100xf32>
    tpu.vector_store %arg13[%c336, %c0_91], %84 {strides = array<i32>} : memref<800x100xf32, #tpu.memory_space<vmem>>, vector<8x100xf32>,
    %c0_92 = arith.constant 0 : index
    %c34 = arith.constant 34 : index
    %86 = vector.load %arg1[%c0_92, %c34] : memref<8x199xf32, #tpu.memory_space<vmem>>, vector<8x100xf32>
    %c344 = arith.constant 344 : index
    %c0_93 = arith.constant 0 : index
    %87 = vector.load %arg13[%c344, %c0_93] : memref<800x100xf32, #tpu.memory_space<vmem>>, vector<8x100xf32>
    tpu.vector_store %arg13[%c344, %c0_93], %86 {strides = array<i32>} : memref<800x100xf32, #tpu.memory_space<vmem>>, vector<8x100xf32>,
    %c0_94 = arith.constant 0 : index
    %c44 = arith.constant 44 : index
    %88 = vector.load %arg1[%c0_94, %c44] : memref<8x199xf32, #tpu.memory_space<vmem>>, vector<8x100xf32>
    %c352 = arith.constant 352 : index
    %c0_95 = arith.constant 0 : index
    %89 = vector.load %arg13[%c352, %c0_95] : memref<800x100xf32, #tpu.memory_space<vmem>>, vector<8x100xf32>
    tpu.vector_store %arg13[%c352, %c0_95], %88 {strides = array<i32>} : memref<800x100xf32, #tpu.memory_space<vmem>>, vector<8x100xf32>,
    %c0_96 = arith.constant 0 : index
    %c54 = arith.constant 54 : index
    %90 = vector.load %arg1[%c0_96, %c54] : memref<8x199xf32, #tpu.memory_space<vmem>>, vector<8x100xf32>
    %c360 = arith.constant 360 : index
    %c0_97 = arith.constant 0 : index
    %91 = vector.load %arg13[%c360, %c0_97] : memref<800x100xf32, #tpu.memory_space<vmem>>, vector<8x100xf32>
    tpu.vector_store %arg13[%c360, %c0_97], %90 {strides = array<i32>} : memref<800x100xf32, #tpu.memory_space<vmem>>, vector<8x100xf32>,
    %c0_98 = arith.constant 0 : index
    %c64_99 = arith.constant 64 : index
    %92 = vector.load %arg1[%c0_98, %c64_99] : memref<8x199xf32, #tpu.memory_space<vmem>>, vector<8x100xf32>
    %c368 = arith.constant 368 : index
    %c0_100 = arith.constant 0 : index
    %93 = vector.load %arg13[%c368, %c0_100] : memref<800x100xf32, #tpu.memory_space<vmem>>, vector<8x100xf32>
    tpu.vector_store %arg13[%c368, %c0_100], %92 {strides = array<i32>} : memref<800x100xf32, #tpu.memory_space<vmem>>, vector<8x100xf32>,
    %c0_101 = arith.constant 0 : index
    %c74 = arith.constant 74 : index
    %94 = vector.load %arg1[%c0_101, %c74] : memref<8x199xf32, #tpu.memory_space<vmem>>, vector<8x100xf32>
    %c376 = arith.constant 376 : index
    %c0_102 = arith.constant 0 : index
    %95 = vector.load %arg13[%c376, %c0_102] : memref<800x100xf32, #tpu.memory_space<vmem>>, vector<8x100xf32>
    tpu.vector_store %arg13[%c376, %c0_102], %94 {strides = array<i32>} : memref<800x100xf32, #tpu.memory_space<vmem>>, vector<8x100xf32>,
    %c0_103 = arith.constant 0 : index
    %c84 = arith.constant 84 : index
    %96 = vector.load %arg1[%c0_103, %c84] : memref<8x199xf32, #tpu.memory_space<vmem>>, vector<8x100xf32>
    %c384 = arith.constant 384 : index
    %c0_104 = arith.constant 0 : index
    %97 = vector.load %arg13[%c384, %c0_104] : memref<800x100xf32, #tpu.memory_space<vmem>>, vector<8x100xf32>
    tpu.vector_store %arg13[%c384, %c0_104], %96 {strides = array<i32>} : memref<800x100xf32, #tpu.memory_space<vmem>>, vector<8x100xf32>,
    %c0_105 = arith.constant 0 : index
    %c94 = arith.constant 94 : index
    %98 = vector.load %arg1[%c0_105, %c94] : memref<8x199xf32, #tpu.memory_space<vmem>>, vector<8x100xf32>
    %c392 = arith.constant 392 : index
    %c0_106 = arith.constant 0 : index
    %99 = vector.load %arg13[%c392, %c0_106] : memref<800x100xf32, #tpu.memory_space<vmem>>, vector<8x100xf32>
    tpu.vector_store %arg13[%c392, %c0_106], %98 {strides = array<i32>} : memref<800x100xf32, #tpu.memory_space<vmem>>, vector<8x100xf32>,
    %c0_107 = arith.constant 0 : index
    %c5 = arith.constant 5 : index
    %100 = vector.load %arg1[%c0_107, %c5] : memref<8x199xf32, #tpu.memory_space<vmem>>, vector<8x100xf32>
    %c400 = arith.constant 400 : index
    %c0_108 = arith.constant 0 : index
    %101 = vector.load %arg13[%c400, %c0_108] : memref<800x100xf32, #tpu.memory_space<vmem>>, vector<8x100xf32>
    tpu.vector_store %arg13[%c400, %c0_108], %100 {strides = array<i32>} : memref<800x100xf32, #tpu.memory_space<vmem>>, vector<8x100xf32>,
    %c0_109 = arith.constant 0 : index
    %c15 = arith.constant 15 : index
    %102 = vector.load %arg1[%c0_109, %c15] : memref<8x199xf32, #tpu.memory_space<vmem>>, vector<8x100xf32>
    %c408 = arith.constant 408 : index
    %c0_110 = arith.constant 0 : index
    %103 = vector.load %arg13[%c408, %c0_110] : memref<800x100xf32, #tpu.memory_space<vmem>>, vector<8x100xf32>
    tpu.vector_store %arg13[%c408, %c0_110], %102 {strides = array<i32>} : memref<800x100xf32, #tpu.memory_space<vmem>>, vector<8x100xf32>,
    %c0_111 = arith.constant 0 : index
    %c25 = arith.constant 25 : index
    %104 = vector.load %arg1[%c0_111, %c25] : memref<8x199xf32, #tpu.memory_space<vmem>>, vector<8x100xf32>
    %c416 = arith.constant 416 : index
    %c0_112 = arith.constant 0 : index
    %105 = vector.load %arg13[%c416, %c0_112] : memref<800x100xf32, #tpu.memory_space<vmem>>, vector<8x100xf32>
    tpu.vector_store %arg13[%c416, %c0_112], %104 {strides = array<i32>} : memref<800x100xf32, #tpu.memory_space<vmem>>, vector<8x100xf32>,
    %c0_113 = arith.constant 0 : index
    %c35 = arith.constant 35 : index
    %106 = vector.load %arg1[%c0_113, %c35] : memref<8x199xf32, #tpu.memory_space<vmem>>, vector<8x100xf32>
    %c424 = arith.constant 424 : index
    %c0_114 = arith.constant 0 : index
    %107 = vector.load %arg13[%c424, %c0_114] : memref<800x100xf32, #tpu.memory_space<vmem>>, vector<8x100xf32>
    tpu.vector_store %arg13[%c424, %c0_114], %106 {strides = array<i32>} : memref<800x100xf32, #tpu.memory_space<vmem>>, vector<8x100xf32>,
    %c0_115 = arith.constant 0 : index
    %c45 = arith.constant 45 : index
    %108 = vector.load %arg1[%c0_115, %c45] : memref<8x199xf32, #tpu.memory_space<vmem>>, vector<8x100xf32>
    %c432 = arith.constant 432 : index
    %c0_116 = arith.constant 0 : index
    %109 = vector.load %arg13[%c432, %c0_116] : memref<800x100xf32, #tpu.memory_space<vmem>>, vector<8x100xf32>
    tpu.vector_store %arg13[%c432, %c0_116], %108 {strides = array<i32>} : memref<800x100xf32, #tpu.memory_space<vmem>>, vector<8x100xf32>,
    %c0_117 = arith.constant 0 : index
    %c55 = arith.constant 55 : index
    %110 = vector.load %arg1[%c0_117, %c55] : memref<8x199xf32, #tpu.memory_space<vmem>>, vector<8x100xf32>
    %c440 = arith.constant 440 : index
    %c0_118 = arith.constant 0 : index
    %111 = vector.load %arg13[%c440, %c0_118] : memref<800x100xf32, #tpu.memory_space<vmem>>, vector<8x100xf32>
    tpu.vector_store %arg13[%c440, %c0_118], %110 {strides = array<i32>} : memref<800x100xf32, #tpu.memory_space<vmem>>, vector<8x100xf32>,
    %c0_119 = arith.constant 0 : index
    %c65 = arith.constant 65 : index
    %112 = vector.load %arg1[%c0_119, %c65] : memref<8x199xf32, #tpu.memory_space<vmem>>, vector<8x100xf32>
    %c448 = arith.constant 448 : index
    %c0_120 = arith.constant 0 : index
    %113 = vector.load %arg13[%c448, %c0_120] : memref<800x100xf32, #tpu.memory_space<vmem>>, vector<8x100xf32>
    tpu.vector_store %arg13[%c448, %c0_120], %112 {strides = array<i32>} : memref<800x100xf32, #tpu.memory_space<vmem>>, vector<8x100xf32>,
    %c0_121 = arith.constant 0 : index
    %c75 = arith.constant 75 : index
    %114 = vector.load %arg1[%c0_121, %c75] : memref<8x199xf32, #tpu.memory_space<vmem>>, vector<8x100xf32>
    %c456 = arith.constant 456 : index
    %c0_122 = arith.constant 0 : index
    %115 = vector.load %arg13[%c456, %c0_122] : memref<800x100xf32, #tpu.memory_space<vmem>>, vector<8x100xf32>
    tpu.vector_store %arg13[%c456, %c0_122], %114 {strides = array<i32>} : memref<800x100xf32, #tpu.memory_space<vmem>>, vector<8x100xf32>,
    %c0_123 = arith.constant 0 : index
    %c85 = arith.constant 85 : index
    %116 = vector.load %arg1[%c0_123, %c85] : memref<8x199xf32, #tpu.memory_space<vmem>>, vector<8x100xf32>
    %c464 = arith.constant 464 : index
    %c0_124 = arith.constant 0 : index
    %117 = vector.load %arg13[%c464, %c0_124] : memref<800x100xf32, #tpu.memory_space<vmem>>, vector<8x100xf32>
    tpu.vector_store %arg13[%c464, %c0_124], %116 {strides = array<i32>} : memref<800x100xf32, #tpu.memory_space<vmem>>, vector<8x100xf32>,
    %c0_125 = arith.constant 0 : index
    %c95 = arith.constant 95 : index
    %118 = vector.load %arg1[%c0_125, %c95] : memref<8x199xf32, #tpu.memory_space<vmem>>, vector<8x100xf32>
    %c472 = arith.constant 472 : index
    %c0_126 = arith.constant 0 : index
    %119 = vector.load %arg13[%c472, %c0_126] : memref<800x100xf32, #tpu.memory_space<vmem>>, vector<8x100xf32>
    tpu.vector_store %arg13[%c472, %c0_126], %118 {strides = array<i32>} : memref<800x100xf32, #tpu.memory_space<vmem>>, vector<8x100xf32>,
    %c0_127 = arith.constant 0 : index
    %c6 = arith.constant 6 : index
    %120 = vector.load %arg1[%c0_127, %c6] : memref<8x199xf32, #tpu.memory_space<vmem>>, vector<8x100xf32>
    %c480 = arith.constant 480 : index
    %c0_128 = arith.constant 0 : index
    %121 = vector.load %arg13[%c480, %c0_128] : memref<800x100xf32, #tpu.memory_space<vmem>>, vector<8x100xf32>
    tpu.vector_store %arg13[%c480, %c0_128], %120 {strides = array<i32>} : memref<800x100xf32, #tpu.memory_space<vmem>>, vector<8x100xf32>,
    %c0_129 = arith.constant 0 : index
    %c16_130 = arith.constant 16 : index
    %122 = vector.load %arg1[%c0_129, %c16_130] : memref<8x199xf32, #tpu.memory_space<vmem>>, vector<8x100xf32>
    %c488 = arith.constant 488 : index
    %c0_131 = arith.constant 0 : index
    %123 = vector.load %arg13[%c488, %c0_131] : memref<800x100xf32, #tpu.memory_space<vmem>>, vector<8x100xf32>
    tpu.vector_store %arg13[%c488, %c0_131], %122 {strides = array<i32>} : memref<800x100xf32, #tpu.memory_space<vmem>>, vector<8x100xf32>,
    %c0_132 = arith.constant 0 : index
    %c26 = arith.constant 26 : index
    %124 = vector.load %arg1[%c0_132, %c26] : memref<8x199xf32, #tpu.memory_space<vmem>>, vector<8x100xf32>
    %c496 = arith.constant 496 : index
    %c0_133 = arith.constant 0 : index
    %125 = vector.load %arg13[%c496, %c0_133] : memref<800x100xf32, #tpu.memory_space<vmem>>, vector<8x100xf32>
    tpu.vector_store %arg13[%c496, %c0_133], %124 {strides = array<i32>} : memref<800x100xf32, #tpu.memory_space<vmem>>, vector<8x100xf32>,
    %c0_134 = arith.constant 0 : index
    %c36 = arith.constant 36 : index
    %126 = vector.load %arg1[%c0_134, %c36] : memref<8x199xf32, #tpu.memory_space<vmem>>, vector<8x100xf32>
    %c504 = arith.constant 504 : index
    %c0_135 = arith.constant 0 : index
    %127 = vector.load %arg13[%c504, %c0_135] : memref<800x100xf32, #tpu.memory_space<vmem>>, vector<8x100xf32>
    tpu.vector_store %arg13[%c504, %c0_135], %126 {strides = array<i32>} : memref<800x100xf32, #tpu.memory_space<vmem>>, vector<8x100xf32>,
    %c0_136 = arith.constant 0 : index
    %c46 = arith.constant 46 : index
    %128 = vector.load %arg1[%c0_136, %c46] : memref<8x199xf32, #tpu.memory_space<vmem>>, vector<8x100xf32>
    %c512 = arith.constant 512 : index
    %c0_137 = arith.constant 0 : index
    %129 = vector.load %arg13[%c512, %c0_137] : memref<800x100xf32, #tpu.memory_space<vmem>>, vector<8x100xf32>
    tpu.vector_store %arg13[%c512, %c0_137], %128 {strides = array<i32>} : memref<800x100xf32, #tpu.memory_space<vmem>>, vector<8x100xf32>,
    %c0_138 = arith.constant 0 : index
    %c56_139 = arith.constant 56 : index
    %130 = vector.load %arg1[%c0_138, %c56_139] : memref<8x199xf32, #tpu.memory_space<vmem>>, vector<8x100xf32>
    %c520 = arith.constant 520 : index
    %c0_140 = arith.constant 0 : index
    %131 = vector.load %arg13[%c520, %c0_140] : memref<800x100xf32, #tpu.memory_space<vmem>>, vector<8x100xf32>
    tpu.vector_store %arg13[%c520, %c0_140], %130 {strides = array<i32>} : memref<800x100xf32, #tpu.memory_space<vmem>>, vector<8x100xf32>,
    %c0_141 = arith.constant 0 : index
    %c66 = arith.constant 66 : index
    %132 = vector.load %arg1[%c0_141, %c66] : memref<8x199xf32, #tpu.memory_space<vmem>>, vector<8x100xf32>
    %c528 = arith.constant 528 : index
    %c0_142 = arith.constant 0 : index
    %133 = vector.load %arg13[%c528, %c0_142] : memref<800x100xf32, #tpu.memory_space<vmem>>, vector<8x100xf32>
    tpu.vector_store %arg13[%c528, %c0_142], %132 {strides = array<i32>} : memref<800x100xf32, #tpu.memory_space<vmem>>, vector<8x100xf32>,
    %c0_143 = arith.constant 0 : index
    %c76 = arith.constant 76 : index
    %134 = vector.load %arg1[%c0_143, %c76] : memref<8x199xf32, #tpu.memory_space<vmem>>, vector<8x100xf32>
    %c536 = arith.constant 536 : index
    %c0_144 = arith.constant 0 : index
    %135 = vector.load %arg13[%c536, %c0_144] : memref<800x100xf32, #tpu.memory_space<vmem>>, vector<8x100xf32>
    tpu.vector_store %arg13[%c536, %c0_144], %134 {strides = array<i32>} : memref<800x100xf32, #tpu.memory_space<vmem>>, vector<8x100xf32>,
    %c0_145 = arith.constant 0 : index
    %c86 = arith.constant 86 : index
    %136 = vector.load %arg1[%c0_145, %c86] : memref<8x199xf32, #tpu.memory_space<vmem>>, vector<8x100xf32>
    %c544 = arith.constant 544 : index
    %c0_146 = arith.constant 0 : index
    %137 = vector.load %arg13[%c544, %c0_146] : memref<800x100xf32, #tpu.memory_space<vmem>>, vector<8x100xf32>
    tpu.vector_store %arg13[%c544, %c0_146], %136 {strides = array<i32>} : memref<800x100xf32, #tpu.memory_space<vmem>>, vector<8x100xf32>,
    %c0_147 = arith.constant 0 : index
    %c96_148 = arith.constant 96 : index
    %138 = vector.load %arg1[%c0_147, %c96_148] : memref<8x199xf32, #tpu.memory_space<vmem>>, vector<8x100xf32>
    %c552 = arith.constant 552 : index
    %c0_149 = arith.constant 0 : index
    %139 = vector.load %arg13[%c552, %c0_149] : memref<800x100xf32, #tpu.memory_space<vmem>>, vector<8x100xf32>
    tpu.vector_store %arg13[%c552, %c0_149], %138 {strides = array<i32>} : memref<800x100xf32, #tpu.memory_space<vmem>>, vector<8x100xf32>,
    %c0_150 = arith.constant 0 : index
    %c7 = arith.constant 7 : index
    %140 = vector.load %arg1[%c0_150, %c7] : memref<8x199xf32, #tpu.memory_space<vmem>>, vector<8x100xf32>
    %c560 = arith.constant 560 : index
    %c0_151 = arith.constant 0 : index
    %141 = vector.load %arg13[%c560, %c0_151] : memref<800x100xf32, #tpu.memory_space<vmem>>, vector<8x100xf32>
    tpu.vector_store %arg13[%c560, %c0_151], %140 {strides = array<i32>} : memref<800x100xf32, #tpu.memory_space<vmem>>, vector<8x100xf32>,
    %c0_152 = arith.constant 0 : index
    %c17 = arith.constant 17 : index
    %142 = vector.load %arg1[%c0_152, %c17] : memref<8x199xf32, #tpu.memory_space<vmem>>, vector<8x100xf32>
    %c568 = arith.constant 568 : index
    %c0_153 = arith.constant 0 : index
    %143 = vector.load %arg13[%c568, %c0_153] : memref<800x100xf32, #tpu.memory_space<vmem>>, vector<8x100xf32>
    tpu.vector_store %arg13[%c568, %c0_153], %142 {strides = array<i32>} : memref<800x100xf32, #tpu.memory_space<vmem>>, vector<8x100xf32>,
    %c0_154 = arith.constant 0 : index
    %c27 = arith.constant 27 : index
    %144 = vector.load %arg1[%c0_154, %c27] : memref<8x199xf32, #tpu.memory_space<vmem>>, vector<8x100xf32>
    %c576 = arith.constant 576 : index
    %c0_155 = arith.constant 0 : index
    %145 = vector.load %arg13[%c576, %c0_155] : memref<800x100xf32, #tpu.memory_space<vmem>>, vector<8x100xf32>
    tpu.vector_store %arg13[%c576, %c0_155], %144 {strides = array<i32>} : memref<800x100xf32, #tpu.memory_space<vmem>>, vector<8x100xf32>,
    %c0_156 = arith.constant 0 : index
    %c37 = arith.constant 37 : index
    %146 = vector.load %arg1[%c0_156, %c37] : memref<8x199xf32, #tpu.memory_space<vmem>>, vector<8x100xf32>
    %c584 = arith.constant 584 : index
    %c0_157 = arith.constant 0 : index
    %147 = vector.load %arg13[%c584, %c0_157] : memref<800x100xf32, #tpu.memory_space<vmem>>, vector<8x100xf32>
    tpu.vector_store %arg13[%c584, %c0_157], %146 {strides = array<i32>} : memref<800x100xf32, #tpu.memory_space<vmem>>, vector<8x100xf32>,
    %c0_158 = arith.constant 0 : index
    %c47 = arith.constant 47 : index
    %148 = vector.load %arg1[%c0_158, %c47] : memref<8x199xf32, #tpu.memory_space<vmem>>, vector<8x100xf32>
    %c592 = arith.constant 592 : index
    %c0_159 = arith.constant 0 : index
    %149 = vector.load %arg13[%c592, %c0_159] : memref<800x100xf32, #tpu.memory_space<vmem>>, vector<8x100xf32>
    tpu.vector_store %arg13[%c592, %c0_159], %148 {strides = array<i32>} : memref<800x100xf32, #tpu.memory_space<vmem>>, vector<8x100xf32>,
    %c0_160 = arith.constant 0 : index
    %c57 = arith.constant 57 : index
    %150 = vector.load %arg1[%c0_160, %c57] : memref<8x199xf32, #tpu.memory_space<vmem>>, vector<8x100xf32>
    %c600 = arith.constant 600 : index
    %c0_161 = arith.constant 0 : index
    %151 = vector.load %arg13[%c600, %c0_161] : memref<800x100xf32, #tpu.memory_space<vmem>>, vector<8x100xf32>
    tpu.vector_store %arg13[%c600, %c0_161], %150 {strides = array<i32>} : memref<800x100xf32, #tpu.memory_space<vmem>>, vector<8x100xf32>,
    %c0_162 = arith.constant 0 : index
    %c67 = arith.constant 67 : index
    %152 = vector.load %arg1[%c0_162, %c67] : memref<8x199xf32, #tpu.memory_space<vmem>>, vector<8x100xf32>
    %c608 = arith.constant 608 : index
    %c0_163 = arith.constant 0 : index
    %153 = vector.load %arg13[%c608, %c0_163] : memref<800x100xf32, #tpu.memory_space<vmem>>, vector<8x100xf32>
    tpu.vector_store %arg13[%c608, %c0_163], %152 {strides = array<i32>} : memref<800x100xf32, #tpu.memory_space<vmem>>, vector<8x100xf32>,
    %c0_164 = arith.constant 0 : index
    %c77 = arith.constant 77 : index
    %154 = vector.load %arg1[%c0_164, %c77] : memref<8x199xf32, #tpu.memory_space<vmem>>, vector<8x100xf32>
    %c616 = arith.constant 616 : index
    %c0_165 = arith.constant 0 : index
    %155 = vector.load %arg13[%c616, %c0_165] : memref<800x100xf32, #tpu.memory_space<vmem>>, vector<8x100xf32>
    tpu.vector_store %arg13[%c616, %c0_165], %154 {strides = array<i32>} : memref<800x100xf32, #tpu.memory_space<vmem>>, vector<8x100xf32>,
    %c0_166 = arith.constant 0 : index
    %c87 = arith.constant 87 : index
    %156 = vector.load %arg1[%c0_166, %c87] : memref<8x199xf32, #tpu.memory_space<vmem>>, vector<8x100xf32>
    %c624 = arith.constant 624 : index
    %c0_167 = arith.constant 0 : index
    %157 = vector.load %arg13[%c624, %c0_167] : memref<800x100xf32, #tpu.memory_space<vmem>>, vector<8x100xf32>
    tpu.vector_store %arg13[%c624, %c0_167], %156 {strides = array<i32>} : memref<800x100xf32, #tpu.memory_space<vmem>>, vector<8x100xf32>,
    %c0_168 = arith.constant 0 : index
    %c97 = arith.constant 97 : index
    %158 = vector.load %arg1[%c0_168, %c97] : memref<8x199xf32, #tpu.memory_space<vmem>>, vector<8x100xf32>
    %c632 = arith.constant 632 : index
    %c0_169 = arith.constant 0 : index
    %159 = vector.load %arg13[%c632, %c0_169] : memref<800x100xf32, #tpu.memory_space<vmem>>, vector<8x100xf32>
    tpu.vector_store %arg13[%c632, %c0_169], %158 {strides = array<i32>} : memref<800x100xf32, #tpu.memory_space<vmem>>, vector<8x100xf32>,
    %c0_170 = arith.constant 0 : index
    %c8_171 = arith.constant 8 : index
    %160 = vector.load %arg1[%c0_170, %c8_171] : memref<8x199xf32, #tpu.memory_space<vmem>>, vector<8x100xf32>
    %c640 = arith.constant 640 : index
    %c0_172 = arith.constant 0 : index
    %161 = vector.load %arg13[%c640, %c0_172] : memref<800x100xf32, #tpu.memory_space<vmem>>, vector<8x100xf32>
    tpu.vector_store %arg13[%c640, %c0_172], %160 {strides = array<i32>} : memref<800x100xf32, #tpu.memory_space<vmem>>, vector<8x100xf32>,
    %c0_173 = arith.constant 0 : index
    %c18 = arith.constant 18 : index
    %162 = vector.load %arg1[%c0_173, %c18] : memref<8x199xf32, #tpu.memory_space<vmem>>, vector<8x100xf32>
    %c648 = arith.constant 648 : index
    %c0_174 = arith.constant 0 : index
    %163 = vector.load %arg13[%c648, %c0_174] : memref<800x100xf32, #tpu.memory_space<vmem>>, vector<8x100xf32>
    tpu.vector_store %arg13[%c648, %c0_174], %162 {strides = array<i32>} : memref<800x100xf32, #tpu.memory_space<vmem>>, vector<8x100xf32>,
    %c0_175 = arith.constant 0 : index
    %c28 = arith.constant 28 : index
    %164 = vector.load %arg1[%c0_175, %c28] : memref<8x199xf32, #tpu.memory_space<vmem>>, vector<8x100xf32>
    %c656 = arith.constant 656 : index
    %c0_176 = arith.constant 0 : index
    %165 = vector.load %arg13[%c656, %c0_176] : memref<800x100xf32, #tpu.memory_space<vmem>>, vector<8x100xf32>
    tpu.vector_store %arg13[%c656, %c0_176], %164 {strides = array<i32>} : memref<800x100xf32, #tpu.memory_space<vmem>>, vector<8x100xf32>,
    %c0_177 = arith.constant 0 : index
    %c38 = arith.constant 38 : index
    %166 = vector.load %arg1[%c0_177, %c38] : memref<8x199xf32, #tpu.memory_space<vmem>>, vector<8x100xf32>
    %c664 = arith.constant 664 : index
    %c0_178 = arith.constant 0 : index
    %167 = vector.load %arg13[%c664, %c0_178] : memref<800x100xf32, #tpu.memory_space<vmem>>, vector<8x100xf32>
    tpu.vector_store %arg13[%c664, %c0_178], %166 {strides = array<i32>} : memref<800x100xf32, #tpu.memory_space<vmem>>, vector<8x100xf32>,
    %c0_179 = arith.constant 0 : index
    %c48_180 = arith.constant 48 : index
    %168 = vector.load %arg1[%c0_179, %c48_180] : memref<8x199xf32, #tpu.memory_space<vmem>>, vector<8x100xf32>
    %c672 = arith.constant 672 : index
    %c0_181 = arith.constant 0 : index
    %169 = vector.load %arg13[%c672, %c0_181] : memref<800x100xf32, #tpu.memory_space<vmem>>, vector<8x100xf32>
    tpu.vector_store %arg13[%c672, %c0_181], %168 {strides = array<i32>} : memref<800x100xf32, #tpu.memory_space<vmem>>, vector<8x100xf32>,
    %c0_182 = arith.constant 0 : index
    %c58 = arith.constant 58 : index
    %170 = vector.load %arg1[%c0_182, %c58] : memref<8x199xf32, #tpu.memory_space<vmem>>, vector<8x100xf32>
    %c680 = arith.constant 680 : index
    %c0_183 = arith.constant 0 : index
    %171 = vector.load %arg13[%c680, %c0_183] : memref<800x100xf32, #tpu.memory_space<vmem>>, vector<8x100xf32>
    tpu.vector_store %arg13[%c680, %c0_183], %170 {strides = array<i32>} : memref<800x100xf32, #tpu.memory_space<vmem>>, vector<8x100xf32>,
    %c0_184 = arith.constant 0 : index
    %c68 = arith.constant 68 : index
    %172 = vector.load %arg1[%c0_184, %c68] : memref<8x199xf32, #tpu.memory_space<vmem>>, vector<8x100xf32>
    %c688 = arith.constant 688 : index
    %c0_185 = arith.constant 0 : index
    %173 = vector.load %arg13[%c688, %c0_185] : memref<800x100xf32, #tpu.memory_space<vmem>>, vector<8x100xf32>
    tpu.vector_store %arg13[%c688, %c0_185], %172 {strides = array<i32>} : memref<800x100xf32, #tpu.memory_space<vmem>>, vector<8x100xf32>,
    %c0_186 = arith.constant 0 : index
    %c78 = arith.constant 78 : index
    %174 = vector.load %arg1[%c0_186, %c78] : memref<8x199xf32, #tpu.memory_space<vmem>>, vector<8x100xf32>
    %c696 = arith.constant 696 : index
    %c0_187 = arith.constant 0 : index
    %175 = vector.load %arg13[%c696, %c0_187] : memref<800x100xf32, #tpu.memory_space<vmem>>, vector<8x100xf32>
    tpu.vector_store %arg13[%c696, %c0_187], %174 {strides = array<i32>} : memref<800x100xf32, #tpu.memory_space<vmem>>, vector<8x100xf32>,
    %c0_188 = arith.constant 0 : index
    %c88_189 = arith.constant 88 : index
    %176 = vector.load %arg1[%c0_188, %c88_189] : memref<8x199xf32, #tpu.memory_space<vmem>>, vector<8x100xf32>
    %c704 = arith.constant 704 : index
    %c0_190 = arith.constant 0 : index
    %177 = vector.load %arg13[%c704, %c0_190] : memref<800x100xf32, #tpu.memory_space<vmem>>, vector<8x100xf32>
    tpu.vector_store %arg13[%c704, %c0_190], %176 {strides = array<i32>} : memref<800x100xf32, #tpu.memory_space<vmem>>, vector<8x100xf32>,
    %c0_191 = arith.constant 0 : index
    %c98 = arith.constant 98 : index
    %178 = vector.load %arg1[%c0_191, %c98] : memref<8x199xf32, #tpu.memory_space<vmem>>, vector<8x100xf32>
    %c712 = arith.constant 712 : index
    %c0_192 = arith.constant 0 : index
    %179 = vector.load %arg13[%c712, %c0_192] : memref<800x100xf32, #tpu.memory_space<vmem>>, vector<8x100xf32>
    tpu.vector_store %arg13[%c712, %c0_192], %178 {strides = array<i32>} : memref<800x100xf32, #tpu.memory_space<vmem>>, vector<8x100xf32>,
    %c0_193 = arith.constant 0 : index
    %c9 = arith.constant 9 : index
    %180 = vector.load %arg1[%c0_193, %c9] : memref<8x199xf32, #tpu.memory_space<vmem>>, vector<8x100xf32>
    %c720 = arith.constant 720 : index
    %c0_194 = arith.constant 0 : index
    %181 = vector.load %arg13[%c720, %c0_194] : memref<800x100xf32, #tpu.memory_space<vmem>>, vector<8x100xf32>
    tpu.vector_store %arg13[%c720, %c0_194], %180 {strides = array<i32>} : memref<800x100xf32, #tpu.memory_space<vmem>>, vector<8x100xf32>,
    %c0_195 = arith.constant 0 : index
    %c19 = arith.constant 19 : index
    %182 = vector.load %arg1[%c0_195, %c19] : memref<8x199xf32, #tpu.memory_space<vmem>>, vector<8x100xf32>
    %c728 = arith.constant 728 : index
    %c0_196 = arith.constant 0 : index
    %183 = vector.load %arg13[%c728, %c0_196] : memref<800x100xf32, #tpu.memory_space<vmem>>, vector<8x100xf32>
    tpu.vector_store %arg13[%c728, %c0_196], %182 {strides = array<i32>} : memref<800x100xf32, #tpu.memory_space<vmem>>, vector<8x100xf32>,
    %c0_197 = arith.constant 0 : index
    %c29 = arith.constant 29 : index
    %184 = vector.load %arg1[%c0_197, %c29] : memref<8x199xf32, #tpu.memory_space<vmem>>, vector<8x100xf32>
    %c736 = arith.constant 736 : index
    %c0_198 = arith.constant 0 : index
    %185 = vector.load %arg13[%c736, %c0_198] : memref<800x100xf32, #tpu.memory_space<vmem>>, vector<8x100xf32>
    tpu.vector_store %arg13[%c736, %c0_198], %184 {strides = array<i32>} : memref<800x100xf32, #tpu.memory_space<vmem>>, vector<8x100xf32>,
    %c0_199 = arith.constant 0 : index
    %c39 = arith.constant 39 : index
    %186 = vector.load %arg1[%c0_199, %c39] : memref<8x199xf32, #tpu.memory_space<vmem>>, vector<8x100xf32>
    %c744 = arith.constant 744 : index
    %c0_200 = arith.constant 0 : index
    %187 = vector.load %arg13[%c744, %c0_200] : memref<800x100xf32, #tpu.memory_space<vmem>>, vector<8x100xf32>
    tpu.vector_store %arg13[%c744, %c0_200], %186 {strides = array<i32>} : memref<800x100xf32, #tpu.memory_space<vmem>>, vector<8x100xf32>,
    %c0_201 = arith.constant 0 : index
    %c49 = arith.constant 49 : index
    %188 = vector.load %arg1[%c0_201, %c49] : memref<8x199xf32, #tpu.memory_space<vmem>>, vector<8x100xf32>
    %c752 = arith.constant 752 : index
    %c0_202 = arith.constant 0 : index
    %189 = vector.load %arg13[%c752, %c0_202] : memref<800x100xf32, #tpu.memory_space<vmem>>, vector<8x100xf32>
    tpu.vector_store %arg13[%c752, %c0_202], %188 {strides = array<i32>} : memref<800x100xf32, #tpu.memory_space<vmem>>, vector<8x100xf32>,
    %c0_203 = arith.constant 0 : index
    %c59 = arith.constant 59 : index
    %190 = vector.load %arg1[%c0_203, %c59] : memref<8x199xf32, #tpu.memory_space<vmem>>, vector<8x100xf32>
    %c760 = arith.constant 760 : index
    %c0_204 = arith.constant 0 : index
    %191 = vector.load %arg13[%c760, %c0_204] : memref<800x100xf32, #tpu.memory_space<vmem>>, vector<8x100xf32>
    tpu.vector_store %arg13[%c760, %c0_204], %190 {strides = array<i32>} : memref<800x100xf32, #tpu.memory_space<vmem>>, vector<8x100xf32>,
    %c0_205 = arith.constant 0 : index
    %c69 = arith.constant 69 : index
    %192 = vector.load %arg1[%c0_205, %c69] : memref<8x199xf32, #tpu.memory_space<vmem>>, vector<8x100xf32>
    %c768 = arith.constant 768 : index
    %c0_206 = arith.constant 0 : index
    %193 = vector.load %arg13[%c768, %c0_206] : memref<800x100xf32, #tpu.memory_space<vmem>>, vector<8x100xf32>
    tpu.vector_store %arg13[%c768, %c0_206], %192 {strides = array<i32>} : memref<800x100xf32, #tpu.memory_space<vmem>>, vector<8x100xf32>,
    %c0_207 = arith.constant 0 : index
    %c79 = arith.constant 79 : index
    %194 = vector.load %arg1[%c0_207, %c79] : memref<8x199xf32, #tpu.memory_space<vmem>>, vector<8x100xf32>
    %c776 = arith.constant 776 : index
    %c0_208 = arith.constant 0 : index
    %195 = vector.load %arg13[%c776, %c0_208] : memref<800x100xf32, #tpu.memory_space<vmem>>, vector<8x100xf32>
    tpu.vector_store %arg13[%c776, %c0_208], %194 {strides = array<i32>} : memref<800x100xf32, #tpu.memory_space<vmem>>, vector<8x100xf32>,
    %c0_209 = arith.constant 0 : index
    %c89 = arith.constant 89 : index
    %196 = vector.load %arg1[%c0_209, %c89] : memref<8x199xf32, #tpu.memory_space<vmem>>, vector<8x100xf32>
    %c784 = arith.constant 784 : index
    %c0_210 = arith.constant 0 : index
    %197 = vector.load %arg13[%c784, %c0_210] : memref<800x100xf32, #tpu.memory_space<vmem>>, vector<8x100xf32>
    tpu.vector_store %arg13[%c784, %c0_210], %196 {strides = array<i32>} : memref<800x100xf32, #tpu.memory_space<vmem>>, vector<8x100xf32>,
    %c0_211 = arith.constant 0 : index
    %c99 = arith.constant 99 : index
    %198 = vector.load %arg1[%c0_211, %c99] : memref<8x199xf32, #tpu.memory_space<vmem>>, vector<8x100xf32>
    %c792 = arith.constant 792 : index
    %c0_212 = arith.constant 0 : index
    %199 = vector.load %arg13[%c792, %c0_212] : memref<800x100xf32, #tpu.memory_space<vmem>>, vector<8x100xf32>
    tpu.vector_store %arg13[%c792, %c0_212], %198 {strides = array<i32>} : memref<800x100xf32, #tpu.memory_space<vmem>>, vector<8x100xf32>,
    %c0_213 = arith.constant 0 : index
    %c0_214 = arith.constant 0 : index
    %200 = vector.load %arg13[%c0_213, %c0_214] : memref<800x100xf32, #tpu.memory_space<vmem>>, vector<800x100xf32>
    %201 = arith.truncf %200 : vector<800x100xf32> to vector<800x100xbf16>
    %c0_215 = arith.constant 0 : index
    %c0_216 = arith.constant 0 : index
    %202 = vector.load %arg2[%c0_215, %c0_216] : memref<100x32xbf16, #tpu.memory_space<vmem>>, vector<100x32xbf16>
    %cst = arith.constant dense<0.000000e+00> : vector<800x32xf32>
    %203 = tpu.matmul %201, %202, %cst {dimension_numbers = #tpu.dot_dimension_numbers<[1], [0], [0], [1], [0, 0, 1, 1], [], []>} : vector<800x100xbf16>, vector<100x32xbf16>, vector<800x32xf32> -> vector<800x32xf32>
    %c0_217 = arith.constant 0 : index
    %c0_218 = arith.constant 0 : index
    %204 = vector.load %arg3[%c0_217, %c0_218] : memref<1x32xf32, #tpu.memory_space<vmem>>, vector<1x32xf32>
    %205 = vector.broadcast %204 : vector<1x32xf32> to vector<800x32xf32>
    %206 = arith.addf %203, %205 : vector<800x32xf32>
    %cst_219 = arith.constant 0.000000e+00 : f32
    %207 = vector.broadcast %cst_219 : f32 to vector<800x32xf32>
    %208 = arith.maximumf %206, %207 : vector<800x32xf32>
    %209 = vector.shape_cast %208 : vector<800x32xf32> to vector<10x80x32xf32>
    %cst_220 = arith.constant dense<0xFF800000> : vector<80x32xf32>
    %210 = vector.multi_reduction <maximumf>, %209, %cst_220 [0] : vector<10x80x32xf32> to vector<80x32xf32>
    %cst_221 = arith.constant 0.000000e+00 : f32
    %211 = vector.broadcast %cst_221 : f32 to vector<8x128xf32>
    %212 = vector.extract_strided_slice %210 {offsets = [0, 0], sizes = [8, 32], strides = [1, 1]} : vector<80x32xf32> to vector<8x32xf32>
    %213 = arith.truncf %212 : vector<8x32xf32> to vector<8x32xbf16>
    %c0_222 = arith.constant 0 : index
    %c0_223 = arith.constant 0 : index
    %c0_224 = arith.constant 0 : index
    %214 = vector.load %arg4[%c0_222, %c0_223, %c0_224] : memref<10x32x128xbf16, #tpu.memory_space<vmem>>, vector<1x32x128xbf16>
    %215 = vector.shape_cast %214 : vector<1x32x128xbf16> to vector<32x128xbf16>
    %cst_225 = arith.constant dense<0.000000e+00> : vector<8x128xf32>
    %216 = tpu.matmul %213, %215, %cst_225 {dimension_numbers = #tpu.dot_dimension_numbers<[1], [0], [0], [1], [0, 0, 1, 1], [], []>} : vector<8x32xbf16>, vector<32x128xbf16>, vector<8x128xf32> -> vector<8x128xf32>
    %217 = arith.addf %211, %216 : vector<8x128xf32>
    %218 = vector.extract_strided_slice %210 {offsets = [8, 0], sizes = [8, 32], strides = [1, 1]} : vector<80x32xf32> to vector<8x32xf32>
    %219 = arith.truncf %218 : vector<8x32xf32> to vector<8x32xbf16>
    %c1_226 = arith.constant 1 : index
    %c0_227 = arith.constant 0 : index
    %c0_228 = arith.constant 0 : index
    %220 = vector.load %arg4[%c1_226, %c0_227, %c0_228] : memref<10x32x128xbf16, #tpu.memory_space<vmem>>, vector<1x32x128xbf16>
    %221 = vector.shape_cast %220 : vector<1x32x128xbf16> to vector<32x128xbf16>
    %cst_229 = arith.constant dense<0.000000e+00> : vector<8x128xf32>
    %222 = tpu.matmul %219, %221, %cst_229 {dimension_numbers = #tpu.dot_dimension_numbers<[1], [0], [0], [1], [0, 0, 1, 1], [], []>} : vector<8x32xbf16>, vector<32x128xbf16>, vector<8x128xf32> -> vector<8x128xf32>
    %223 = arith.addf %217, %222 : vector<8x128xf32>
    %224 = vector.extract_strided_slice %210 {offsets = [16, 0], sizes = [8, 32], strides = [1, 1]} : vector<80x32xf32> to vector<8x32xf32>
    %225 = arith.truncf %224 : vector<8x32xf32> to vector<8x32xbf16>
    %c2_230 = arith.constant 2 : index
    %c0_231 = arith.constant 0 : index
    %c0_232 = arith.constant 0 : index
    %226 = vector.load %arg4[%c2_230, %c0_231, %c0_232] : memref<10x32x128xbf16, #tpu.memory_space<vmem>>, vector<1x32x128xbf16>
    %227 = vector.shape_cast %226 : vector<1x32x128xbf16> to vector<32x128xbf16>
    %cst_233 = arith.constant dense<0.000000e+00> : vector<8x128xf32>
    %228 = tpu.matmul %225, %227, %cst_233 {dimension_numbers = #tpu.dot_dimension_numbers<[1], [0], [0], [1], [0, 0, 1, 1], [], []>} : vector<8x32xbf16>, vector<32x128xbf16>, vector<8x128xf32> -> vector<8x128xf32>
    %229 = arith.addf %223, %228 : vector<8x128xf32>
    %230 = vector.extract_strided_slice %210 {offsets = [24, 0], sizes = [8, 32], strides = [1, 1]} : vector<80x32xf32> to vector<8x32xf32>
    %231 = arith.truncf %230 : vector<8x32xf32> to vector<8x32xbf16>
    %c3_234 = arith.constant 3 : index
    %c0_235 = arith.constant 0 : index
    %c0_236 = arith.constant 0 : index
    %232 = vector.load %arg4[%c3_234, %c0_235, %c0_236] : memref<10x32x128xbf16, #tpu.memory_space<vmem>>, vector<1x32x128xbf16>
    %233 = vector.shape_cast %232 : vector<1x32x128xbf16> to vector<32x128xbf16>
    %cst_237 = arith.constant dense<0.000000e+00> : vector<8x128xf32>
    %234 = tpu.matmul %231, %233, %cst_237 {dimension_numbers = #tpu.dot_dimension_numbers<[1], [0], [0], [1], [0, 0, 1, 1], [], []>} : vector<8x32xbf16>, vector<32x128xbf16>, vector<8x128xf32> -> vector<8x128xf32>
    %235 = arith.addf %229, %234 : vector<8x128xf32>
    %236 = vector.extract_strided_slice %210 {offsets = [32, 0], sizes = [8, 32], strides = [1, 1]} : vector<80x32xf32> to vector<8x32xf32>
    %237 = arith.truncf %236 : vector<8x32xf32> to vector<8x32xbf16>
    %c4_238 = arith.constant 4 : index
    %c0_239 = arith.constant 0 : index
    %c0_240 = arith.constant 0 : index
    %238 = vector.load %arg4[%c4_238, %c0_239, %c0_240] : memref<10x32x128xbf16, #tpu.memory_space<vmem>>, vector<1x32x128xbf16>
    %239 = vector.shape_cast %238 : vector<1x32x128xbf16> to vector<32x128xbf16>
    %cst_241 = arith.constant dense<0.000000e+00> : vector<8x128xf32>
    %240 = tpu.matmul %237, %239, %cst_241 {dimension_numbers = #tpu.dot_dimension_numbers<[1], [0], [0], [1], [0, 0, 1, 1], [], []>} : vector<8x32xbf16>, vector<32x128xbf16>, vector<8x128xf32> -> vector<8x128xf32>
    %241 = arith.addf %235, %240 : vector<8x128xf32>
    %242 = vector.extract_strided_slice %210 {offsets = [40, 0], sizes = [8, 32], strides = [1, 1]} : vector<80x32xf32> to vector<8x32xf32>
    %243 = arith.truncf %242 : vector<8x32xf32> to vector<8x32xbf16>
    %c5_242 = arith.constant 5 : index
    %c0_243 = arith.constant 0 : index
    %c0_244 = arith.constant 0 : index
    %244 = vector.load %arg4[%c5_242, %c0_243, %c0_244] : memref<10x32x128xbf16, #tpu.memory_space<vmem>>, vector<1x32x128xbf16>
    %245 = vector.shape_cast %244 : vector<1x32x128xbf16> to vector<32x128xbf16>
    %cst_245 = arith.constant dense<0.000000e+00> : vector<8x128xf32>
    %246 = tpu.matmul %243, %245, %cst_245 {dimension_numbers = #tpu.dot_dimension_numbers<[1], [0], [0], [1], [0, 0, 1, 1], [], []>} : vector<8x32xbf16>, vector<32x128xbf16>, vector<8x128xf32> -> vector<8x128xf32>
    %247 = arith.addf %241, %246 : vector<8x128xf32>
    %248 = vector.extract_strided_slice %210 {offsets = [48, 0], sizes = [8, 32], strides = [1, 1]} : vector<80x32xf32> to vector<8x32xf32>
    %249 = arith.truncf %248 : vector<8x32xf32> to vector<8x32xbf16>
    %c6_246 = arith.constant 6 : index
    %c0_247 = arith.constant 0 : index
    %c0_248 = arith.constant 0 : index
    %250 = vector.load %arg4[%c6_246, %c0_247, %c0_248] : memref<10x32x128xbf16, #tpu.memory_space<vmem>>, vector<1x32x128xbf16>
    %251 = vector.shape_cast %250 : vector<1x32x128xbf16> to vector<32x128xbf16>
    %cst_249 = arith.constant dense<0.000000e+00> : vector<8x128xf32>
    %252 = tpu.matmul %249, %251, %cst_249 {dimension_numbers = #tpu.dot_dimension_numbers<[1], [0], [0], [1], [0, 0, 1, 1], [], []>} : vector<8x32xbf16>, vector<32x128xbf16>, vector<8x128xf32> -> vector<8x128xf32>
    %253 = arith.addf %247, %252 : vector<8x128xf32>
    %254 = vector.extract_strided_slice %210 {offsets = [56, 0], sizes = [8, 32], strides = [1, 1]} : vector<80x32xf32> to vector<8x32xf32>
    %255 = arith.truncf %254 : vector<8x32xf32> to vector<8x32xbf16>
    %c7_250 = arith.constant 7 : index
    %c0_251 = arith.constant 0 : index
    %c0_252 = arith.constant 0 : index
    %256 = vector.load %arg4[%c7_250, %c0_251, %c0_252] : memref<10x32x128xbf16, #tpu.memory_space<vmem>>, vector<1x32x128xbf16>
    %257 = vector.shape_cast %256 : vector<1x32x128xbf16> to vector<32x128xbf16>
    %cst_253 = arith.constant dense<0.000000e+00> : vector<8x128xf32>
    %258 = tpu.matmul %255, %257, %cst_253 {dimension_numbers = #tpu.dot_dimension_numbers<[1], [0], [0], [1], [0, 0, 1, 1], [], []>} : vector<8x32xbf16>, vector<32x128xbf16>, vector<8x128xf32> -> vector<8x128xf32>
    %259 = arith.addf %253, %258 : vector<8x128xf32>
    %260 = vector.extract_strided_slice %210 {offsets = [64, 0], sizes = [8, 32], strides = [1, 1]} : vector<80x32xf32> to vector<8x32xf32>
    %261 = arith.truncf %260 : vector<8x32xf32> to vector<8x32xbf16>
    %c8_254 = arith.constant 8 : index
    %c0_255 = arith.constant 0 : index
    %c0_256 = arith.constant 0 : index
    %262 = vector.load %arg4[%c8_254, %c0_255, %c0_256] : memref<10x32x128xbf16, #tpu.memory_space<vmem>>, vector<1x32x128xbf16>
    %263 = vector.shape_cast %262 : vector<1x32x128xbf16> to vector<32x128xbf16>
    %cst_257 = arith.constant dense<0.000000e+00> : vector<8x128xf32>
    %264 = tpu.matmul %261, %263, %cst_257 {dimension_numbers = #tpu.dot_dimension_numbers<[1], [0], [0], [1], [0, 0, 1, 1], [], []>} : vector<8x32xbf16>, vector<32x128xbf16>, vector<8x128xf32> -> vector<8x128xf32>
    %265 = arith.addf %259, %264 : vector<8x128xf32>
    %266 = vector.extract_strided_slice %210 {offsets = [72, 0], sizes = [8, 32], strides = [1, 1]} : vector<80x32xf32> to vector<8x32xf32>
    %267 = arith.truncf %266 : vector<8x32xf32> to vector<8x32xbf16>
    %c9_258 = arith.constant 9 : index
    %c0_259 = arith.constant 0 : index
    %c0_260 = arith.constant 0 : index
    %268 = vector.load %arg4[%c9_258, %c0_259, %c0_260] : memref<10x32x128xbf16, #tpu.memory_space<vmem>>, vector<1x32x128xbf16>
    %269 = vector.shape_cast %268 : vector<1x32x128xbf16> to vector<32x128xbf16>
    %cst_261 = arith.constant dense<0.000000e+00> : vector<8x128xf32>
    %270 = tpu.matmul %267, %269, %cst_261 {dimension_numbers = #tpu.dot_dimension_numbers<[1], [0], [0], [1], [0, 0, 1, 1], [], []>} : vector<8x32xbf16>, vector<32x128xbf16>, vector<8x128xf32> -> vector<8x128xf32>
    %271 = arith.addf %265, %270 : vector<8x128xf32>
    %c0_262 = arith.constant 0 : index
    %c0_263 = arith.constant 0 : index
    %272 = vector.load %arg5[%c0_262, %c0_263] : memref<1x128xf32, #tpu.memory_space<vmem>>, vector<1x128xf32>
    %273 = vector.broadcast %272 : vector<1x128xf32> to vector<8x128xf32>
    %274 = arith.addf %271, %273 : vector<8x128xf32>
    %cst_264 = arith.constant 0.000000e+00 : f32
    %275 = vector.broadcast %cst_264 : f32 to vector<8x128xf32>
    %276 = arith.maximumf %274, %275 : vector<8x128xf32>
    %c0_265 = arith.constant 0 : index
    %c0_266 = arith.constant 0 : index
    %277 = vector.load %arg6[%c0_265, %c0_266] : memref<128x64xf32, #tpu.memory_space<vmem>>, vector<128x64xf32>
    %cst_267 = arith.constant dense<0.000000e+00> : vector<8x64xf32>
    %278 = tpu.matmul %276, %277, %cst_267 {dimension_numbers = #tpu.dot_dimension_numbers<[1], [0], [0], [1], [0, 0, 1, 1], [], []>} : vector<8x128xf32>, vector<128x64xf32>, vector<8x64xf32> -> vector<8x64xf32>
    %c0_268 = arith.constant 0 : index
    %c0_269 = arith.constant 0 : index
    %279 = vector.load %arg7[%c0_268, %c0_269] : memref<1x64xf32, #tpu.memory_space<vmem>>, vector<1x64xf32>
    %280 = vector.broadcast %279 : vector<1x64xf32> to vector<8x64xf32>
    %281 = arith.addf %278, %280 : vector<8x64xf32>
    %cst_270 = arith.constant 0.000000e+00 : f32
    %282 = vector.broadcast %cst_270 : f32 to vector<8x64xf32>
    %283 = arith.maximumf %281, %282 : vector<8x64xf32>
    %c0_271 = arith.constant 0 : index
    %c0_272 = arith.constant 0 : index
    %284 = vector.load %arg8[%c0_271, %c0_272] : memref<64x32xf32, #tpu.memory_space<vmem>>, vector<64x32xf32>
    %cst_273 = arith.constant dense<0.000000e+00> : vector<8x32xf32>
    %285 = tpu.matmul %283, %284, %cst_273 {dimension_numbers = #tpu.dot_dimension_numbers<[1], [0], [0], [1], [0, 0, 1, 1], [], []>} : vector<8x64xf32>, vector<64x32xf32>, vector<8x32xf32> -> vector<8x32xf32>
    %c0_274 = arith.constant 0 : index
    %c0_275 = arith.constant 0 : index
    %286 = vector.load %arg9[%c0_274, %c0_275] : memref<1x32xf32, #tpu.memory_space<vmem>>, vector<1x32xf32>
    %287 = vector.broadcast %286 : vector<1x32xf32> to vector<8x32xf32>
    %288 = arith.addf %285, %287 : vector<8x32xf32>
    %cst_276 = arith.constant 0.000000e+00 : f32
    %289 = vector.broadcast %cst_276 : f32 to vector<8x32xf32>
    %290 = arith.maximumf %288, %289 : vector<8x32xf32>
    %c0_277 = arith.constant 0 : index
    %c0_278 = arith.constant 0 : index
    %291 = vector.load %arg10[%c0_277, %c0_278] : memref<1x32xf32, #tpu.memory_space<vmem>>, vector<1x32xf32>
    %292 = vector.broadcast %291 : vector<1x32xf32> to vector<8x32xf32>
    %293 = arith.mulf %290, %292 : vector<8x32xf32>
    %cst_279 = arith.constant dense<0.000000e+00> : vector<8xf32>
    %294 = vector.multi_reduction <add>, %293, %cst_279 [1] : vector<8x32xf32> to vector<8xf32>
    %295 = vector.shape_cast %294 : vector<8xf32> to vector<8x1xf32>
    %c0_280 = arith.constant 0 : index
    %c0_281 = arith.constant 0 : index
    %296 = vector.load %arg11[%c0_280, %c0_281] : memref<1x1xf32, #tpu.memory_space<vmem>>, vector<1x1xf32>
    %297 = vector.broadcast %296 : vector<1x1xf32> to vector<8x1xf32>
    %298 = arith.addf %295, %297 : vector<8x1xf32>
    %c0_282 = arith.constant 0 : index
    %c0_283 = arith.constant 0 : index
    %299 = vector.load %arg12[%c0_282, %c0_283] : memref<8x1xf32, #tpu.memory_space<vmem>>, vector<8x1xf32>
    tpu.vector_store %arg12[%c0_282, %c0_283], %298 {strides = array<i32>} : memref<8x1xf32, #tpu.memory_space<vmem>>, vector<8x1xf32>,
    return
  }
  func.func @transform_0(%arg0: i32) -> (i32, i32) {
    %c0_i32 = arith.constant 0 : i32
    %c0_i32_0 = arith.constant 0 : i32
    return %arg0, %c0_i32 : i32, i32
  }
  func.func @transform_1(%arg0: i32) -> (i32, i32) {
    %c0_i32 = arith.constant 0 : i32
    %c0_i32_0 = arith.constant 0 : i32
    %c0_i32_1 = arith.constant 0 : i32
    return %c0_i32, %c0_i32_0 : i32, i32
  }
  func.func @transform_2(%arg0: i32) -> (i32, i32) {
    %c0_i32 = arith.constant 0 : i32
    %c0_i32_0 = arith.constant 0 : i32
    %c0_i32_1 = arith.constant 0 : i32
    return %c0_i32, %c0_i32_0 : i32, i32
  }
  func.func @transform_3(%arg0: i32) -> (i32, i32, i32) {
    %c0_i32 = arith.constant 0 : i32
    %c0_i32_0 = arith.constant 0 : i32
    %c0_i32_1 = arith.constant 0 : i32
    %c0_i32_2 = arith.constant 0 : i32
    return %c0_i32, %c0_i32_0, %c0_i32_1 : i32, i32, i32
  }
  func.func @transform_4(%arg0: i32) -> (i32, i32) {
    %c0_i32 = arith.constant 0 : i32
    %c0_i32_0 = arith.constant 0 : i32
    %c0_i32_1 = arith.constant 0 : i32
    return %c0_i32, %c0_i32_0 : i32, i32
  }
  func.func @transform_5(%arg0: i32) -> (i32, i32) {
    %c0_i32 = arith.constant 0 : i32
    %c0_i32_0 = arith.constant 0 : i32
    %c0_i32_1 = arith.constant 0 : i32
    return %c0_i32, %c0_i32_0 : i32, i32
  }
  func.func @transform_6(%arg0: i32) -> (i32, i32) {
    %c0_i32 = arith.constant 0 : i32
    %c0_i32_0 = arith.constant 0 : i32
    %c0_i32_1 = arith.constant 0 : i32
    return %c0_i32, %c0_i32_0 : i32, i32
  }
  func.func @transform_7(%arg0: i32) -> (i32, i32) {
    %c0_i32 = arith.constant 0 : i32
    %c0_i32_0 = arith.constant 0 : i32
    %c0_i32_1 = arith.constant 0 : i32
    return %c0_i32, %c0_i32_0 : i32, i32
  }
  func.func @transform_8(%arg0: i32) -> (i32, i32) {
    %c0_i32 = arith.constant 0 : i32
    %c0_i32_0 = arith.constant 0 : i32
    %c0_i32_1 = arith.constant 0 : i32
    return %c0_i32, %c0_i32_0 : i32, i32
  }
  func.func @transform_9(%arg0: i32) -> (i32, i32) {
    %c0_i32 = arith.constant 0 : i32
    %c0_i32_0 = arith.constant 0 : i32
    %c0_i32_1 = arith.constant 0 : i32
    return %c0_i32, %c0_i32_0 : i32, i32
  }
  func.func @transform_10(%arg0: i32) -> (i32, i32) {
    %c0_i32 = arith.constant 0 : i32
    %c0_i32_0 = arith.constant 0 : i32
    %c0_i32_1 = arith.constant 0 : i32
    return %c0_i32, %c0_i32_0 : i32, i32
  }
  func.func @transform_11(%arg0: i32) -> (i32, i32) {
    %c0_i32 = arith.constant 0 : i32
    %c0_i32_0 = arith.constant 0 : i32
    return %arg0, %c0_i32 : i32, i32
  }
}

</mosaic_0001>

<bundles_post_ra>
// kernel: tpu_custom_call.1
= control target key start
LH: loop header
LB: loop body
LE: loop exit
PB: predicated region body
PF: predicated region fallthrough
CT: control target
= control target key end

     0   :  { %s4245_s19 = smov 0   ;;  %s5354_s0 = inlined_call_operand.vmem [shape: f32[16,199], index: 0, kind: input, shape index: {}]   ;;  %s5355_s1 = inlined_call_operand.vmem [shape: bf16[100,32], index: 1, kind: input, shape index: {}]   ;;  %s5356_s2 = inlined_call_operand.vmem [shape: f32[1,32], index: 2, kind: input, shape index: {}]   ;;  %s5357_s3 = inlined_call_operand.vmem [shape: bf16[10,32,128], index: 3, kind: input, shape index: {}]   ;;  %s5358_s4 = inlined_call_operand.vmem [shape: f32[1,128], index: 4, kind: input, shape index: {}]   ;;  %s5359_s5 = inlined_call_operand.vmem [shape: f32[128,64], index: 5, kind: input, shape index: {}]   ;;  %s5360_s6 = inlined_call_operand.vmem [shape: f32[1,64], index: 6, kind: input, shape index: {}]   ;;  %s5361_s7 = inlined_call_operand.vmem [shape: f32[64,32], index: 7, kind: input, shape index: {}]   ;;  %s5362_s8 = inlined_call_operand.vmem [shape: f32[1,32], index: 8, kind: input, shape index: {}]   ;;  %s5363_s9 = inlined_call_operand.vmem [shape: f32[1,32], index: 9, kind: input, shape index: {}]   ;;  %s5364_s10 = inlined_call_operand.<no memory space> [shape: f32[1,1], index: 10, kind: input, shape index: {}]   ;;  %s5365_s11 = inlined_call_operand.vmem [shape: f32[16,1], index: 11, kind: output, shape index: {}]  }
   0x1   :  { %v16_v0 = vstv %s5364_s10 }
   0x2   :  { %17 = vst [vmem:[#allocation3] sm:$0x1] %v16_v0 }
   0x3 LB: > { %s3380_s20 = sadd.s32 4294967295, %s4078_s19   ;;  %p3384_p0 = scmp.ge.s32.totalorder %s4078_s19, 1  ;;  %s4078_s19 = sphi %s4245_s19, %s23_s19  }
   0x4   : > { %p339_p1 = scmp.lt.s32.totalorder %s4078_s19, 3 }
   0x6   : > { %p340_p2 = pnand %p3384_p0, %p339_p1 }
   0x7   : > { %p378_p3 = scmp.lt.s32.totalorder (!%p340_p2), %s3380_s20, 1  ;;  %v4044_v1 = vld [vmem:[%s5355_s1] sm:$0xff] (!%p340_p2)   ;;  %v4045_v2 = vld [vmem:[%s5355_s1 + $0x8] sm:$0xff] (!%p340_p2)   ;;  %vm389_vm0 = vcmask (!%p340_p2), 818176   ;;  %v4046_v3 = vld [vmem:[%s5355_s1 + $0x10] sm:$0xff] (!%p340_p2)   ;;  %s4080_s30 = smov (!%p340_p2), 98  }
   0x8   : > { %343 = sbr.rel (%p340_p2) target bundleno = 1541 (0x605), region = 64  ;;  %3634 = vmatprep.subr.bf16.mxu0 (!%p340_p2), %v4044_v1  ;;  %3918 = vmatprep.subr.bf16.mxu1 (!%p340_p2), %v4044_v1  ;;  %s4081_s12 = smov (!%p340_p2), 118   ;;  %v4047_v6 = vld [vmem:[%s5355_s1 + $0x18] sm:$0xff] (!%p340_p2)   ;;  %v4048_v7 = vld [vmem:[%s5355_s1 + $0x20] sm:$0xff] (!%p340_p2)   ;;  %v4049_v8 = vld [vmem:[%s5355_s1 + $0x28] sm:$0xff] (!%p340_p2)   ;;  %vm1770_vm1 = vcmask (!%p340_p2), 1041408  }
   0x9   : > { %3635 = vmatpush3.bf16.msra.mxu0 (!%p340_p2), %v4044_v1  ;;  %3925 = vmatpush3.bf16.msra.mxu1 (!%p340_p2), %v4044_v1  ;;  %s4082_s15 = smov (!%p340_p2), 108   ;;  %s4083_s18 = smov (!%p340_p2), 88   ;;  %v4050_v9 = vld [vmem:[%s5355_s1 + $0x30] ss:$0 sps:$4 sm:$0x33] (!%p340_p2)   ;;  %vm411_vm2 = vcmask (!%p340_p2), 801792  }
   0xa   : > { %3636 = vmatprep.subr.bf16.mxu0 (!%p340_p2), %v4045_v2  ;;  %3919 = vmatprep.subr.bf16.mxu1 (!%p340_p2), %v4045_v2  ;;  %s4085_s25 = smov (!%p340_p2), 68   ;;  %v1772_v10 = vsel (!%p340_p2), %vm1770_vm1, %v4050_v9, 0  ;;  %s4086_s26 = smov (!%p340_p2), 58   ;;  %vm423_vm3 = vcmask (!%p340_p2), 719872   ;;  %vm435_vm4 = vcmask (!%p340_p2), 637952   ;;  %vm447_vm5 = vcmask (!%p340_p2), 556032  }
   0xb   : > { %s4087_s28 = smov (!%p340_p2), 48   ;;  %s4088_s29 = smov (!%p340_p2), 38   ;;  %vm459_vm6 = vcmask (!%p340_p2), 474112   ;;  %vm471_vm7 = vcmask (!%p340_p2), 392192   ;;  %vm483_vm8 = vcmask (!%p340_p2), 310272   ;;  %vm513_vm9 = vcmask (!%p340_p2), 793600  }
   0xc   : > { %s4091_s13 = smov (!%p340_p2), 97   ;;  %s4092_s14 = smov (!%p340_p2), 87   ;;  %vm525_vm10 = vcmask (!%p340_p2), 711680   ;;  %vm537_vm11 = vcmask (!%p340_p2), 629760   ;;  %vm549_vm12 = vcmask (!%p340_p2), 547840   ;;  %vm561_vm13 = vcmask (!%p340_p2), 465920  }
   0xd   : > { %3637 = vmatpush3.bf16.msra.mxu0 (!%p340_p2), %v4045_v2  ;;  %3926 = vmatpush3.bf16.msra.mxu1 (!%p340_p2), %v4045_v2  ;;  %s4094_s16 = smov (!%p340_p2), 77   ;;  %s4095_s17 = smov (!%p340_p2), 67   ;;  %vm573_vm14 = vcmask (!%p340_p2), 384000   ;;  %vm585_vm15 = vcmask (!%p340_p2), 302080  }
   0xe   : > { %3638 = vmatprep.subr.bf16.mxu0 (!%p340_p2), %v4046_v3  ;;  %3920 = vmatprep.subr.bf16.mxu1 (!%p340_p2), %v4046_v3  ;;  %s4097_s21 = smov (!%p340_p2), 47   ;;  %s4098_s22 = smov (!%p340_p2), 37  }
   0xf   : > { %s5367_s20 = smov (!%p378_p3, %s3380_s20), 1  ;;  %s4099_s10 = smov 126  }
  0x10   : > { %s3520_s24 = sshll.u32 %s5367_s20, 4  ;;  %s4100_s23 = smov 96  }
  0x11   : > { %s4265_s27 = scalar_lea.vmem %s5354_s0, %s3520_s24  ;;  %3639 = vmatpush3.bf16.msra.mxu0 %v4046_v3  ;;  %3927 = vmatpush3.bf16.msra.mxu1 %v4046_v3  ;;  %s4084_s24 = smov 78  }
  0x12   : > { %v4271_v4 = vld [vmem:[%s4265_s27 + $0x8] sm:$0xff]  ;;  %v4274_v5 = vld [vmem:[%s4265_s27] sm:$0xff]  ;;  %3640 = vmatprep.subr.bf16.mxu0 %v4047_v6  ;;  %3921 = vmatprep.subr.bf16.mxu1 %v4047_v6 }
  0x13   : > { %409 = vrot.lane.b32.xlu1 %v4271_v4, %s4080_s30  ;;  %393 = vrot.lane.b32.xlu0 %v4274_v5, %s4081_s12  ;;  %390 = vst.msk [vmem:[#allocation2] sm:$0xff] %vm389_vm0, %v4274_v5  ;;  %s4090_s12 = smov 127  }
  0x15   : > { %3641 = vmatpush3.bf16.msra.mxu0 %v4047_v6  ;;  %3928 = vmatpush3.bf16.msra.mxu1 %v4047_v6 }
  0x16   : > { %3642 = vmatprep.subr.bf16.mxu0 %v4048_v7  ;;  %3922 = vmatprep.subr.bf16.mxu1 %v4048_v7 }
  0x17   : > { %399 = vrot.lane.b32.xlu1 %v4274_v5, %s4082_s15  ;;  %407 = vrot.lane.b32.xlu0 %v4274_v5, %s4080_s30  ;;  %s4089_s30 = smov 117   ;;  %s4093_s15 = smov 107  }
  0x19   : > { %3643 = vmatpush3.bf16.msra.mxu0 %v4048_v7  ;;  %3929 = vmatpush3.bf16.msra.mxu1 %v4048_v7 }
  0x1a   : > { %3644 = vmatprep.subr.bf16.mxu0 %v4049_v8  ;;  %3923 = vmatprep.subr.bf16.mxu1 %v4049_v8  ;;  %v1411_v16 = vld [vmem:[#allocation2] sm:$0xff] }
  0x1b   : > { %421 = vrot.lane.b32.xlu1 %v4271_v4, %s4083_s18  ;;  %419 = vrot.lane.b32.xlu0 %v4274_v5, %s4083_s18  ;;  %s4096_s18 = smov 57  }
  0x1d   : > { %3645 = vmatpush3.bf16.msra.mxu0 %v4049_v8  ;;  %3930 = vmatpush3.bf16.msra.mxu1 %v4049_v8 }
  0x1e   : > { %3932 = vmatprep.subr.msk.bf16.mxu0 %vm1770_vm1, %v4050_v9  ;;  %3933 = vmatprep.subr.msk.bf16.mxu1 %vm1770_vm1, %v4050_v9  ;;  %vm615_vm1 = vcmask 785408  }
  0x1f   : > { %433 = vrot.lane.b32.xlu1 %v4271_v4, %s4084_s24  ;;  %431 = vrot.lane.b32.xlu0 %v4274_v5, %s4084_s24  ;;  %s4101_s24 = smov 116  }
  0x21   : > { %3647 = vmatpush3.bf16.msra.mxu0 %v1772_v10  ;;  %3931 = vmatpush3.bf16.msra.mxu1 %v1772_v10 }
  0x23   : > { %445 = vrot.lane.b32.xlu1 %v4271_v4, %s4085_s25  ;;  %443 = vrot.lane.b32.xlu0 %v4274_v5, %s4085_s25  ;;  %s4102_s25 = smov 106  }
  0x27   : > { %457 = vrot.lane.b32.xlu1 %v4271_v4, %s4086_s26  ;;  %455 = vrot.lane.b32.xlu0 %v4274_v5, %s4086_s26  ;;  %s4103_s26 = smov 86  }
  0x2b   : > { %469 = vrot.lane.b32.xlu1 %v4271_v4, %s4087_s28  ;;  %467 = vrot.lane.b32.xlu0 %v4274_v5, %s4087_s28  ;;  %s4104_s28 = smov 76  }
  0x2f   : > { %481 = vrot.lane.b32.xlu1 %v4271_v4, %s4088_s29  ;;  %479 = vrot.lane.b32.xlu0 %v4274_v5, %s4088_s29  ;;  %s4105_s29 = smov 66  }
  0x33   : > { %495 = vrot.lane.b32.xlu1 %v4274_v5, %s4089_s30  ;;  %489 = vrot.lane.b32.xlu0 %v4274_v5, %s4090_s12  ;;  %s4106_s30 = smov 56   ;;  %s4107_s12 = smov 46  }
  0x37   : > { %511 = vrot.lane.b32.xlu1 %v4271_v4, %s4091_s13  ;;  %509 = vrot.lane.b32.xlu0 %v4274_v5, %s4091_s13  ;;  %s4108_s13 = smov 36  }
  0x3b   : > { %521 = vrot.lane.b32.xlu1 %v4274_v5, %s4092_s14  ;;  %501 = vrot.lane.b32.xlu0 %v4274_v5, %s4093_s15  ;;  %s4110_s15 = smov 125  }
  0x3f   : > { %533 = vrot.lane.b32.xlu1 %v4274_v5, %s4094_s16  ;;  %523 = vrot.lane.b32.xlu0 %v4271_v4, %s4092_s14  ;;  %s4109_s14 = smov 115  }
  0x43   : > { %545 = vrot.lane.b32.xlu1 %v4274_v5, %s4095_s17  ;;  %535 = vrot.lane.b32.xlu0 %v4271_v4, %s4094_s16  ;;  %s4111_s16 = smov 95  }
  0x47   : > { %557 = vrot.lane.b32.xlu1 %v4274_v5, %s4096_s18  ;;  %547 = vrot.lane.b32.xlu0 %v4271_v4, %s4095_s17  ;;  %s4112_s17 = smov 85  }
  0x4b   : > { %569 = vrot.lane.b32.xlu1 %v4274_v5, %s4097_s21  ;;  %559 = vrot.lane.b32.xlu0 %v4271_v4, %s4096_s18  ;;  %s4113_s18 = smov 105  }
  0x4f   : > { %581 = vrot.lane.b32.xlu1 %v4274_v5, %s4098_s22  ;;  %571 = vrot.lane.b32.xlu0 %v4271_v4, %s4097_s21  ;;  %s4114_s21 = smov 75  }
  0x53   : > { %591 = vrot.lane.b32.xlu1 %v4274_v5, %s4099_s10  ;;  %583 = vrot.lane.b32.xlu0 %v4271_v4, %s4098_s22  ;;  %s4115_s22 = smov 65   ;;  %s4116_s10 = smov 55  }
  0x57   : > { %611 = vrot.lane.b32.xlu1 %v4274_v5, %s4100_s23  ;;  %597 = vrot.lane.b32.xlu0 %v4274_v5, %s4101_s24  ;;  %s4118_s24 = smov 35  }
  0x5b   : > { %603 = vrot.lane.b32.xlu1 %v4274_v5, %s4102_s25  ;;  %613 = vrot.lane.b32.xlu0 %v4271_v4, %s4100_s23  ;;  %s4117_s23 = smov 45   ;;  %s4119_s25 = smov 124  }
  0x5f   : > { %625 = vrot.lane.b32.xlu1 %v4271_v4, %s4103_s26  ;;  %623 = vrot.lane.b32.xlu0 %v4274_v5, %s4103_s26  ;;  %s4120_s26 = smov 94  }
  0x63   : > { %637 = vrot.lane.b32.xlu1 %v4271_v4, %s4104_s28  ;;  %635 = vrot.lane.b32.xlu0 %v4274_v5, %s4104_s28  ;;  %s4121_s28 = smov 114  }
  0x67   : > { %649 = vrot.lane.b32.xlu1 %v4271_v4, %s4105_s29  ;;  %647 = vrot.lane.b32.xlu0 %v4274_v5, %s4105_s29  ;;  %s4122_s29 = smov 104  }
  0x6b   : > { %661 = vrot.lane.b32.xlu1 %v4271_v4, %s4106_s30  ;;  %659 = vrot.lane.b32.xlu0 %v4274_v5, %s4106_s30  ;;  %s4123_s30 = smov 84  }
  0x6f   : > { %673 = vrot.lane.b32.xlu1 %v4271_v4, %s4107_s12  ;;  %671 = vrot.lane.b32.xlu0 %v4274_v5, %s4107_s12  ;;  %s4124_s12 = smov 74  }
  0x73   : > { %685 = vrot.lane.b32.xlu1 %v4271_v4, %s4108_s13  ;;  %683 = vrot.lane.b32.xlu0 %v4274_v5, %s4108_s13  ;;  %s4125_s13 = smov 64  }
  0x77   : > { %699 = vrot.lane.b32.xlu1 %v4274_v5, %s4109_s14  ;;  %693 = vrot.lane.b32.xlu0 %v4274_v5, %s4110_s15  ;;  %s4126_s14 = smov 54   ;;  %s4127_s15 = smov 44  }
  0x7b   : > { %715 = vrot.lane.b32.xlu1 %v4271_v4, %s4111_s16  ;;  %713 = vrot.lane.b32.xlu0 %v4274_v5, %s4111_s16  ;;  %s4128_s16 = smov 34  }
  0x7f   : > { %725 = vrot.lane.b32.xlu1 %v4274_v5, %s4112_s17  ;;  %705 = vrot.lane.b32.xlu0 %v4274_v5, %s4113_s18  ;;  %s4130_s18 = smov 123  }
  0x83   : > { %737 = vrot.lane.b32.xlu1 %v4274_v5, %s4114_s21  ;;  %727 = vrot.lane.b32.xlu0 %v4271_v4, %s4112_s17  ;;  %s4129_s17 = smov 113  }
  0x85   : > { %v410_v11 = vpop.permute.xlu1 %409  ;;  %v394_v12 = vpop.permute.xlu0 %393 }
  0x86   : > { %396 = vst.msk [vmem:[#allocation2 + $0x8] sm:$0xff] %vm389_vm0, %v394_v12 }
  0x87   : > { %749 = vrot.lane.b32.xlu1 %v4274_v5, %s4115_s22  ;;  %739 = vrot.lane.b32.xlu0 %v4271_v4, %s4114_s21  ;;  %s4131_s21 = smov 93  }
  0x89   : > { %v400_v13 = vpop.permute.xlu1 %399  ;;  %v408_v14 = vpop.permute.xlu0 %407 }
  0x8a   : > { %402 = vst.msk [vmem:[#allocation2 + $0x10] sm:$0xff] %vm389_vm0, %v400_v13  ;;  %v412_v15 = vsel %vm411_vm2, %v408_v14, %v410_v11  ;;  %vm627_vm2 = vcmask 703488  }
  0x8b   : > { %414 = vst.msk [vmem:[#allocation2 + $0x18] sm:$0xff] %vm389_vm0, %v412_v15  ;;  %761 = vrot.lane.b32.xlu1 %v4274_v5, %s4116_s10  ;;  %751 = vrot.lane.b32.xlu0 %v4271_v4, %s4115_s22  ;;  %s4132_s22 = smov 83  }
  0x8d   : > { %v422_v17 = vpop.permute.xlu1 %421  ;;  %v420_v18 = vpop.permute.xlu0 %419  ;;  %v1412_v19 = vld [vmem:[#allocation2 + $0x8] sm:$0xff] }
  0x8e   : > { %v424_v20 = vsel %vm423_vm3, %v420_v18, %v422_v17  ;;  %v1511_v21 = vpack.c.bf16 %v1412_v19, %v1411_v16  ;;  %vm639_vm3 = vcmask 621568  }
  0x8f   : > { %426 = vst.msk [vmem:[#allocation2 + $0x20] sm:$0xff] %vm389_vm0, %v424_v20  ;;  %773 = vrot.lane.b32.xlu1 %v4274_v5, %s4117_s23  ;;  %763 = vrot.lane.b32.xlu0 %v4271_v4, %s4116_s10  ;;  %s4133_s10 = smov 103  }
  0x90   : > { %3648 = vmatprep.mubr.msk.bf16.mxu0 %vm389_vm0, %v1511_v21 }
  0x91   : > { %v434_v22 = vpop.permute.xlu1 %433  ;;  %v432_v23 = vpop.permute.xlu0 %431  ;;  %v1413_v24 = vld [vmem:[#allocation2 + $0x10] sm:$0xff] }
  0x92   : > { %v436_v25 = vsel %vm435_vm4, %v432_v23, %v434_v22  ;;  %v1414_v26 = vld [vmem:[#allocation2 + $0x18] sm:$0xff]  ;;  %vm651_vm4 = vcmask 539648  }
  0x93   : > { %438 = vst.msk [vmem:[#allocation2 + $0x28] sm:$0xff] %vm389_vm0, %v436_v25  ;;  %785 = vrot.lane.b32.xlu1 %v4274_v5, %s4118_s24  ;;  %775 = vrot.lane.b32.xlu0 %v4271_v4, %s4117_s23  ;;  %v1512_v27 = vpack.c.bf16 %v1414_v26, %v1413_v24  ;;  %s4134_s23 = smov 73  }
  0x95   : > { %v446_v28 = vpop.permute.xlu1 %445  ;;  %v444_v29 = vpop.permute.xlu0 %443  ;;  %3649 = vmatmul.mubr.msk.bf16.vlgmr.msra.gmra.mrb[0].mxu0 %vm389_vm0, %v1512_v27 }
  0x96   : > { %v448_v30 = vsel %vm447_vm5, %v444_v29, %v446_v28  ;;  %v1415_v34 = vld [vmem:[#allocation2 + $0x20] sm:$0xff]  ;;  %vm663_vm5 = vcmask 457728  }
  0x97   : > { %450 = vst.msk [vmem:[#allocation2 + $0x30] sm:$0xff] %vm389_vm0, %v448_v30  ;;  %795 = vrot.lane.b32.xlu1 %v4274_v5, %s4119_s25  ;;  %787 = vrot.lane.b32.xlu0 %v4271_v4, %s4118_s24  ;;  %s4135_s24 = smov 63   ;;  %s4136_s25 = smov 53  }
  0x99   : > { %v458_v31 = vpop.permute.xlu1 %457  ;;  %v456_v32 = vpop.permute.xlu0 %455 }
  0x9a   : > { %v460_v33 = vsel %vm459_vm6, %v456_v32, %v458_v31  ;;  %v1416_v35 = vld [vmem:[#allocation2 + $0x28] sm:$0xff]  ;;  %vm675_vm6 = vcmask 375808  }
  0x9b   : > { %462 = vst.msk [vmem:[#allocation2 + $0x38] sm:$0xff] %vm389_vm0, %v460_v33  ;;  %815 = vrot.lane.b32.xlu1 %v4274_v5, %s4120_s26  ;;  %801 = vrot.lane.b32.xlu0 %v4274_v5, %s4121_s28  ;;  %v1513_v36 = vpack.c.bf16 %v1416_v35, %v1415_v34  ;;  %s4138_s28 = smov 33  }
  0x9d   : > { %v470_v37 = vpop.permute.xlu1 %469  ;;  %v468_v38 = vpop.permute.xlu0 %467  ;;  %3652 = vmatprep.mubr.msk.bf16.mxu0 %vm389_vm0, %v1513_v36 }
  0x9e   : > { %v472_v39 = vsel %vm471_vm7, %v468_v38, %v470_v37  ;;  %v1417_v43 = vld [vmem:[#allocation2 + $0x30] sm:$0xff]  ;;  %vm687_vm7 = vcmask 293888  }
  0x9f   : > { %474 = vst.msk [vmem:[#allocation2 + $0x40] sm:$0xff] %vm389_vm0, %v472_v39  ;;  %807 = vrot.lane.b32.xlu1 %v4274_v5, %s4122_s29  ;;  %817 = vrot.lane.b32.xlu0 %v4271_v4, %s4120_s26  ;;  %s4137_s26 = smov 43   ;;  %s4139_s29 = smov 122  }
  0xa1   : > { %v482_v40 = vpop.permute.xlu1 %481  ;;  %v480_v41 = vpop.permute.xlu0 %479 }
  0xa2   : > { %v484_v42 = vsel %vm483_vm8, %v480_v41, %v482_v40  ;;  %v1418_v44 = vld [vmem:[#allocation2 + $0x38] sm:$0xff]  ;;  %vm717_vm8 = vcmask 777216  }
  0xa3   : > { %486 = vst.msk [vmem:[#allocation2 + $0x48] sm:$0xff] %vm389_vm0, %v484_v42  ;;  %829 = vrot.lane.b32.xlu1 %v4271_v4, %s4123_s30  ;;  %827 = vrot.lane.b32.xlu0 %v4274_v5, %s4123_s30  ;;  %v1514_v45 = vpack.c.bf16 %v1418_v44, %v1417_v43  ;;  %s4140_s30 = smov 92  }
  0xa5   : > { %v496_v46 = vpop.permute.xlu1 %495  ;;  %v490_v47 = vpop.permute.xlu0 %489  ;;  %3653 = vmatmul.mubr.msk.bf16.gmra.mrb[4].mxu0 %vm389_vm0, %v1514_v45 }
  0xa6   : > { %498 = vst.msk [vmem:[#allocation2 + $0x58] sm:$0xff] %vm389_vm0, %v496_v46  ;;  %492 = vst.msk [vmem:[#allocation2 + $0x50] sm:$0xff] %vm389_vm0, %v490_v47  ;;  %v1419_v51 = vld [vmem:[#allocation2 + $0x40] sm:$0xff] }
  0xa7   : > { %841 = vrot.lane.b32.xlu1 %v4271_v4, %s4124_s12  ;;  %839 = vrot.lane.b32.xlu0 %v4274_v5, %s4124_s12  ;;  %s4141_s12 = smov 112  }
  0xa9   : > { %v512_v48 = vpop.permute.xlu1 %511  ;;  %v510_v49 = vpop.permute.xlu0 %509 }
  0xaa   : > { %v514_v50 = vsel %vm513_vm9, %v510_v49, %v512_v48  ;;  %v1420_v52 = vld [vmem:[#allocation2 + $0x48] sm:$0xff]  ;;  %vm729_vm9 = vcmask 695296  }
  0xab   : > { %516 = vst.msk [vmem:[#allocation2 + $0x68] sm:$0xff] %vm389_vm0, %v514_v50  ;;  %853 = vrot.lane.b32.xlu1 %v4271_v4, %s4125_s13  ;;  %851 = vrot.lane.b32.xlu0 %v4274_v5, %s4125_s13  ;;  %v1515_v53 = vpack.c.bf16 %v1420_v52, %v1419_v51  ;;  %s4142_s13 = smov 102  }
  0xad   : > { %v522_v54 = vpop.permute.xlu1 %521  ;;  %v502_v55 = vpop.permute.xlu0 %501  ;;  %3656 = vmatprep.mubr.msk.bf16.mxu0 %vm389_vm0, %v1515_v53  ;;  %v1421_v56 = vld [vmem:[#allocation2 + $0x50] sm:$0xff]  ;;  %v1422_v57 = vld [vmem:[#allocation2 + $0x58] sm:$0xff] }
  0xae   : > { %504 = vst.msk [vmem:[#allocation2 + $0x60] sm:$0xff] %vm389_vm0, %v502_v55  ;;  %v1516_v58 = vpack.c.bf16 %v1422_v57, %v1421_v56 }
  0xaf   : > { %865 = vrot.lane.b32.xlu1 %v4271_v4, %s4126_s14  ;;  %863 = vrot.lane.b32.xlu0 %v4274_v5, %s4126_s14  ;;  %s4143_s14 = smov 82  }
  0xb0   : > { %3657 = vmatmul.mubr.msk.bf16.gmra.mrb[8].mxu0 %vm389_vm0, %v1516_v58 }
  0xb1   : > { %v534_v59 = vpop.permute.xlu1 %533  ;;  %v524_v60 = vpop.permute.xlu0 %523 }
  0xb2   : > { %v526_v61 = vsel %vm525_vm10, %v522_v54, %v524_v60  ;;  %v1424_v1 = vld [vmem:[#allocation2 + $0x68] sm:$0xff]  ;;  %vm741_vm10 = vcmask 613376  }
  0xb3   : > { %528 = vst.msk [vmem:[#allocation2 + $0x70] sm:$0xff] %vm389_vm0, %v526_v61  ;;  %877 = vrot.lane.b32.xlu1 %v4271_v4, %s4127_s15  ;;  %875 = vrot.lane.b32.xlu0 %v4274_v5, %s4127_s15  ;;  %s4144_s15 = smov 72  }
  0xb5   : > { %v546_v62 = vpop.permute.xlu1 %545  ;;  %v536_v63 = vpop.permute.xlu0 %535  ;;  %v1423_v0 = vld [vmem:[#allocation2 + $0x60] sm:$0xff] }
  0xb6   : > { %v538_v2 = vsel %vm537_vm11, %v534_v59, %v536_v63  ;;  %v1517_v3 = vpack.c.bf16 %v1424_v1, %v1423_v0  ;;  %vm753_vm11 = vcmask 531456  }
  0xb7   : > { %540 = vst.msk [vmem:[#allocation2 + $0x78] sm:$0xff] %vm389_vm0, %v538_v2  ;;  %889 = vrot.lane.b32.xlu1 %v4271_v4, %s4128_s16  ;;  %887 = vrot.lane.b32.xlu0 %v4274_v5, %s4128_s16  ;;  %s4145_s16 = smov 62  }
  0xb8   : > { %3660 = vmatprep.mubr.msk.bf16.mxu0 %vm389_vm0, %v1517_v3 }
  0xb9   : > { %v558_v6 = vpop.permute.xlu1 %557  ;;  %v548_v7 = vpop.permute.xlu0 %547 }
  0xba   : > { %v550_v8 = vsel %vm549_vm12, %v546_v62, %v548_v7  ;;  %v1425_v12 = vld [vmem:[#allocation2 + $0x70] sm:$0xff]  ;;  %vm765_vm12 = vcmask 449536  }
  0xbb   : > { %552 = vst.msk [vmem:[#allocation2 + $0x80] sm:$0xff] %vm389_vm0, %v550_v8  ;;  %903 = vrot.lane.b32.xlu1 %v4274_v5, %s4129_s17  ;;  %897 = vrot.lane.b32.xlu0 %v4274_v5, %s4130_s18  ;;  %v4449_v8 = vld [vmem:[%s4265_s27 + $0x8] sm:$0xff]  ;;  %s4146_s17 = smov 52   ;;  %s4148_s18 = smov 32  }
  0xbd   : > { %v570_v9 = vpop.permute.xlu1 %569  ;;  %v560_v10 = vpop.permute.xlu0 %559 }
  0xbe   : > { %v562_v11 = vsel %vm561_vm13, %v558_v6, %v560_v10  ;;  %v1426_v13 = vld [vmem:[#allocation2 + $0x78] sm:$0xff]  ;;  %vm777_vm13 = vcmask 367616  }
  0xbf   : > { %564 = vst.msk [vmem:[#allocation2 + $0x88] sm:$0xff] %vm389_vm0, %v562_v11  ;;  %919 = vrot.lane.b32.xlu1 %v4271_v4, %s4131_s21  ;;  %917 = vrot.lane.b32.xlu0 %v4274_v5, %s4131_s21  ;;  %v1518_v14 = vpack.c.bf16 %v1426_v13, %v1425_v12  ;;  %s4149_s21 = smov 111  }
  0xc1   : > { %v582_v15 = vpop.permute.xlu1 %581  ;;  %v572_v16 = vpop.permute.xlu0 %571  ;;  %3661 = vmatmul.mubr.msk.bf16.gmra.mrb[12].mxu0 %vm389_vm0, %v1518_v14 }
  0xc2   : > { %v574_v17 = vsel %vm573_vm14, %v570_v9, %v572_v16  ;;  %v1427_v21 = vld [vmem:[#allocation2 + $0x80] sm:$0xff]  ;;  %vm789_vm14 = vcmask 285696  }
  0xc3   : > { %576 = vst.msk [vmem:[#allocation2 + $0x90] sm:$0xff] %vm389_vm0, %v574_v17  ;;  %929 = vrot.lane.b32.xlu1 %v4274_v5, %s4132_s22  ;;  %909 = vrot.lane.b32.xlu0 %v4274_v5, %s4133_s10  ;;  %v4452_v9 = vld [vmem:[%s4265_s27] sm:$0xff]  ;;  %s4147_s27 = smov 42   ;;  %s4151_s10 = smov 91  }
  0xc5   : > { %v592_v18 = vpop.permute.xlu1 %591  ;;  %v584_v19 = vpop.permute.xlu0 %583 }
  0xc6   : > { %594 = vst.msk [vmem:[#allocation2 + $0xa0] sm:$0xff] %vm389_vm0, %v592_v18  ;;  %v586_v20 = vsel %vm585_vm15, %v582_v15, %v584_v19  ;;  %v1428_v22 = vld [vmem:[#allocation2 + $0x88] sm:$0xff]  ;;  %vm819_vm15 = vcmask 769024  }
  0xc7   : > { %588 = vst.msk [vmem:[#allocation2 + $0x98] sm:$0xff] %vm389_vm0, %v586_v20  ;;  %941 = vrot.lane.b32.xlu1 %v4274_v5, %s4134_s23  ;;  %931 = vrot.lane.b32.xlu0 %v4271_v4, %s4132_s22  ;;  %v1519_v23 = vpack.c.bf16 %v1428_v22, %v1427_v21  ;;  %s4150_s22 = smov 121  }
  0xc9   : > { %v612_v24 = vpop.permute.xlu1 %611  ;;  %v598_v25 = vpop.permute.xlu0 %597  ;;  %3664 = vmatprep.mubr.msk.bf16.mxu0 %vm389_vm0, %v1519_v23 }
  0xca   : > { %600 = vst.msk [vmem:[#allocation2 + $0xa8] sm:$0xff] %vm389_vm0, %v598_v25  ;;  %v1429_v29 = vld [vmem:[#allocation2 + $0x90] sm:$0xff] }
  0xcb   : > { %953 = vrot.lane.b32.xlu1 %v4274_v5, %s4135_s24  ;;  %943 = vrot.lane.b32.xlu0 %v4271_v4, %s4134_s23  ;;  %s4152_s23 = smov 81  }
  0xcd   : > { %v604_v26 = vpop.permute.xlu1 %603  ;;  %v614_v27 = vpop.permute.xlu0 %613  ;;  %v1431_v34 = vld [vmem:[#allocation2 + $0xa0] sm:$0xff] }
  0xce   : > { %606 = vst.msk [vmem:[#allocation2 + $0xb0] sm:$0xff] %vm389_vm0, %v604_v26  ;;  %v616_v28 = vsel %vm615_vm1, %v612_v24, %v614_v27  ;;  %v1430_v30 = vld [vmem:[#allocation2 + $0x98] sm:$0xff]  ;;  %vm831_vm1 = vcmask 687104  }
  0xcf   : > { %618 = vst.msk [vmem:[#allocation2 + $0xb8] sm:$0xff] %vm389_vm0, %v616_v28  ;;  %965 = vrot.lane.b32.xlu1 %v4274_v5, %s4136_s25  ;;  %955 = vrot.lane.b32.xlu0 %v4271_v4, %s4135_s24  ;;  %v1520_v31 = vpack.c.bf16 %v1430_v30, %v1429_v29  ;;  %s4153_s24 = smov 101  }
  0xd1   : > { %v626_v32 = vpop.permute.xlu1 %625  ;;  %v624_v33 = vpop.permute.xlu0 %623  ;;  %3665 = vmatmul.mubr.msk.bf16.gmra.mrb[16].mxu0 %vm389_vm0, %v1520_v31  ;;  %v1432_v35 = vld [vmem:[#allocation2 + $0xa8] sm:$0xff] }
  0xd2   : > { %v628_v36 = vsel %vm627_vm2, %v624_v33, %v626_v32  ;;  %v1521_v37 = vpack.c.bf16 %v1432_v35, %v1431_v34  ;;  %vm843_vm2 = vcmask 605184  }
  0xd3   : > { %630 = vst.msk [vmem:[#allocation2 + $0xc0] sm:$0xff] %vm389_vm0, %v628_v36  ;;  %977 = vrot.lane.b32.xlu1 %v4274_v5, %s4137_s26  ;;  %967 = vrot.lane.b32.xlu0 %v4271_v4, %s4136_s25  ;;  %s4154_s25 = smov 71  }
  0xd4   : > { %3668 = vmatprep.mubr.msk.bf16.mxu0 %vm389_vm0, %v1521_v37 }
  0xd5   : > { %v638_v38 = vpop.permute.xlu1 %637  ;;  %v636_v39 = vpop.permute.xlu0 %635  ;;  %v1433_v40 = vld [vmem:[#allocation2 + $0xb0] sm:$0xff] }
  0xd6   : > { %v640_v41 = vsel %vm639_vm3, %v636_v39, %v638_v38  ;;  %v1434_v42 = vld [vmem:[#allocation2 + $0xb8] sm:$0xff]  ;;  %vm855_vm3 = vcmask 523264  }
  0xd7   : > { %642 = vst.msk [vmem:[#allocation2 + $0xc8] sm:$0xff] %vm389_vm0, %v640_v41  ;;  %989 = vrot.lane.b32.xlu1 %v4274_v5, %s4138_s28  ;;  %979 = vrot.lane.b32.xlu0 %v4271_v4, %s4137_s26  ;;  %v1522_v43 = vpack.c.bf16 %v1434_v42, %v1433_v40  ;;  %s4155_s26 = smov 61  }
  0xd9   : > { %v650_v44 = vpop.permute.xlu1 %649  ;;  %v648_v45 = vpop.permute.xlu0 %647  ;;  %3669 = vmatmul.mubr.msk.bf16.gmra.mrb[20].mxu0 %vm389_vm0, %v1522_v43 }
  0xda   : > { %v652_v46 = vsel %vm651_vm4, %v648_v45, %v650_v44  ;;  %v1435_v50 = vld [vmem:[#allocation2 + $0xc0] sm:$0xff]  ;;  %vm867_vm4 = vcmask 441344  }
  0xdb   : > { %654 = vst.msk [vmem:[#allocation2 + $0xd0] sm:$0xff] %vm389_vm0, %v652_v46  ;;  %999 = vrot.lane.b32.xlu1 %v4274_v5, %s4139_s29  ;;  %991 = vrot.lane.b32.xlu0 %v4271_v4, %s4138_s28  ;;  %s4156_s28 = smov 51   ;;  %s4157_s29 = smov 41  }
  0xdd   : > { %v662_v47 = vpop.permute.xlu1 %661  ;;  %v660_v48 = vpop.permute.xlu0 %659 }
  0xde   : > { %v664_v49 = vsel %vm663_vm5, %v660_v48, %v662_v47  ;;  %v1436_v51 = vld [vmem:[#allocation2 + $0xc8] sm:$0xff]  ;;  %vm879_vm5 = vcmask 359424  }
  0xdf   : > { %666 = vst.msk [vmem:[#allocation2 + $0xd8] sm:$0xff] %vm389_vm0, %v664_v49  ;;  %1019 = vrot.lane.b32.xlu1 %v4274_v5, %s4140_s30  ;;  %1005 = vrot.lane.b32.xlu0 %v4274_v5, %s4141_s12  ;;  %v1523_v52 = vpack.c.bf16 %v1436_v51, %v1435_v50  ;;  %s4159_s12 = smov 80  }
  0xe1   : > { %v674_v53 = vpop.permute.xlu1 %673  ;;  %v672_v54 = vpop.permute.xlu0 %671  ;;  %3672 = vmatprep.mubr.msk.bf16.mxu0 %vm389_vm0, %v1523_v52 }
  0xe2   : > { %v676_v55 = vsel %vm675_vm6, %v672_v54, %v674_v53  ;;  %v1437_v59 = vld [vmem:[#allocation2 + $0xd0] sm:$0xff]  ;;  %vm891_vm6 = vcmask 277504  }
  0xe3   : > { %678 = vst.msk [vmem:[#allocation2 + $0xe0] sm:$0xff] %vm389_vm0, %v676_v55  ;;  %1011 = vrot.lane.b32.xlu1 %v4274_v5, %s4142_s13  ;;  %1021 = vrot.lane.b32.xlu0 %v4271_v4, %s4140_s30  ;;  %s4158_s30 = smov 31   ;;  %s4160_s13 = smov 70  }
  0xe5   : > { %v686_v56 = vpop.permute.xlu1 %685  ;;  %v684_v57 = vpop.permute.xlu0 %683 }
  0xe6   : > { %v688_v58 = vsel %vm687_vm7, %v684_v57, %v686_v56  ;;  %v1438_v60 = vld [vmem:[#allocation2 + $0xd8] sm:$0xff]  ;;  %vm921_vm7 = vcmask 760832  }
  0xe7   : > { %690 = vst.msk [vmem:[#allocation2 + $0xe8] sm:$0xff] %vm389_vm0, %v688_v58  ;;  %1033 = vrot.lane.b32.xlu1 %v4271_v4, %s4143_s14  ;;  %1031 = vrot.lane.b32.xlu0 %v4274_v5, %s4143_s14  ;;  %v1524_v61 = vpack.c.bf16 %v1438_v60, %v1437_v59  ;;  %s4161_s14 = smov 60  }
  0xe9   : > { %v700_v62 = vpop.permute.xlu1 %699  ;;  %v694_v63 = vpop.permute.xlu0 %693  ;;  %3673 = vmatmul.mubr.msk.bf16.gmra.mrb[24].mxu0 %vm389_vm0, %v1524_v61 }
  0xea   : > { %702 = vst.msk [vmem:[#allocation2 + $0xf8] sm:$0xff] %vm389_vm0, %v700_v62  ;;  %696 = vst.msk [vmem:[#allocation2 + $0xf0] sm:$0xff] %vm389_vm0, %v694_v63  ;;  %v1439_v3 = vld [vmem:[#allocation2 + $0xe0] sm:$0xff] }
  0xeb   : > { %1045 = vrot.lane.b32.xlu1 %v4271_v4, %s4144_s15  ;;  %1043 = vrot.lane.b32.xlu0 %v4274_v5, %s4144_s15  ;;  %s4162_s15 = smov 50  }
  0xed   : > { %v716_v0 = vpop.permute.xlu1 %715  ;;  %v714_v1 = vpop.permute.xlu0 %713 }
  0xee   : > { %v718_v2 = vsel %vm717_vm8, %v714_v1, %v716_v0  ;;  %v1440_v6 = vld [vmem:[#allocation2 + $0xe8] sm:$0xff]  ;;  %vm933_vm8 = vcmask 678912  }
  0xef   : > { %720 = vst.msk [vmem:[#allocation2 + $0x108] sm:$0xff] %vm389_vm0, %v718_v2  ;;  %1057 = vrot.lane.b32.xlu1 %v4271_v4, %s4145_s16  ;;  %1055 = vrot.lane.b32.xlu0 %v4274_v5, %s4145_s16  ;;  %v1525_v7 = vpack.c.bf16 %v1440_v6, %v1439_v3  ;;  %s4163_s16 = smov 120  }
  0xf1   : > { %v726_v10 = vpop.permute.xlu1 %725  ;;  %v706_v11 = vpop.permute.xlu0 %705  ;;  %3676 = vmatprep.mubr.msk.bf16.mxu0 %vm389_vm0, %v1525_v7  ;;  %v1441_v12 = vld [vmem:[#allocation2 + $0xf0] sm:$0xff]  ;;  %v1442_v13 = vld [vmem:[#allocation2 + $0xf8] sm:$0xff] }
  0xf2   : > { %708 = vst.msk [vmem:[#allocation2 + $0x100] sm:$0xff] %vm389_vm0, %v706_v11  ;;  %v1526_v14 = vpack.c.bf16 %v1442_v13, %v1441_v12 }
  0xf3   : > { %1069 = vrot.lane.b32.xlu1 %v4449_v8, %s4146_s17  ;;  %1067 = vrot.lane.b32.xlu0 %v4452_v9, %s4146_s17  ;;  %s4164_s17 = smov 90  }
  0xf4   : > { %3677 = vmatmul.mubr.msk.bf16.gmra.mrb[28].mxu0 %vm389_vm0, %v1526_v14 }
  0xf5   : > { %v738_v4 = vpop.permute.xlu1 %737  ;;  %v728_v5 = vpop.permute.xlu0 %727 }
  0xf6   : > { %v730_v15 = vsel %vm729_vm9, %v726_v10, %v728_v5  ;;  %v1444_v19 = vld [vmem:[#allocation2 + $0x108] sm:$0xff]  ;;  %vm945_vm9 = vcmask 596992  }
  0xf7   : > { %732 = vst.msk [vmem:[#allocation2 + $0x110] sm:$0xff] %vm389_vm0, %v730_v15  ;;  %1081 = vrot.lane.b32.xlu1 %v4449_v8, %s4147_s27  ;;  %1079 = vrot.lane.b32.xlu0 %v4452_v9, %s4147_s27  ;;  %s4165_s27 = smov 110  }
  0xf9   : > { %v750_v16 = vpop.permute.xlu1 %749  ;;  %v740_v17 = vpop.permute.xlu0 %739  ;;  %v1443_v18 = vld [vmem:[#allocation2 + $0x100] sm:$0xff] }
  0xfa   : > { %v742_v20 = vsel %vm741_vm10, %v738_v4, %v740_v17  ;;  %v1527_v21 = vpack.c.bf16 %v1444_v19, %v1443_v18  ;;  %vm957_vm10 = vcmask 515072  }
  0xfb   : > { %744 = vst.msk [vmem:[#allocation2 + $0x118] sm:$0xff] %vm389_vm0, %v742_v20  ;;  %1093 = vrot.lane.b32.xlu1 %v4449_v8, %s4148_s18  ;;  %1091 = vrot.lane.b32.xlu0 %v4452_v9, %s4148_s18  ;;  %s4166_s18 = smov 100  }
  0xfc   : > { %3680 = vmatprep.mubr.msk.bf16.mxu0 %vm389_vm0, %v1527_v21 }
  0xfd   : > { %v762_v22 = vpop.permute.xlu1 %761  ;;  %v752_v23 = vpop.permute.xlu0 %751 }
  0xfe   : > { %v754_v24 = vsel %vm753_vm11, %v750_v16, %v752_v23  ;;  %v1445_v28 = vld [vmem:[#allocation2 + $0x110] sm:$0xff]  ;;  %vm969_vm11 = vcmask 433152  }
  0xff   : > { %756 = vst.msk [vmem:[#allocation2 + $0x120] sm:$0xff] %vm389_vm0, %v754_v24  ;;  %1107 = vrot.lane.b32.xlu1 %v4452_v9, %s4149_s21  ;;  %1101 = vrot.lane.b32.xlu0 %v4452_v9, %s4150_s22  ;;  %s4167_s21 = smov 40   ;;  %s4168_s22 = smov 30  }
 0x101   : > { %v774_v25 = vpop.permute.xlu1 %773  ;;  %v764_v26 = vpop.permute.xlu0 %763 }
 0x102   : > { %v766_v27 = vsel %vm765_vm12, %v762_v22, %v764_v26  ;;  %v1446_v29 = vld [vmem:[#allocation2 + $0x118] sm:$0xff]  ;;  %vm981_vm12 = vcmask 351232  }
 0x103   : > { %768 = vst.msk [vmem:[#allocation2 + $0x128] sm:$0xff] %vm389_vm0, %v766_v27  ;;  %1123 = vrot.lane.b32.xlu1 %v4449_v8, %s4151_s10  ;;  %1121 = vrot.lane.b32.xlu0 %v4452_v9, %s4151_s10  ;;  %v1528_v30 = vpack.c.bf16 %v1446_v29, %v1445_v28  ;;  %s4169_s10 = smov 109  }
 0x105   : > { %v786_v31 = vpop.permute.xlu1 %785  ;;  %v776_v32 = vpop.permute.xlu0 %775  ;;  %3681 = vmatmul.mubr.msk.bf16.gmra.mrb[32].mxu0 %vm389_vm0, %v1528_v30 }
 0x106   : > { %v778_v33 = vsel %vm777_vm13, %v774_v25, %v776_v32  ;;  %v1447_v37 = vld [vmem:[#allocation2 + $0x120] sm:$0xff]  ;;  %vm993_vm13 = vcmask 269312  }
 0x107   : > { %780 = vst.msk [vmem:[#allocation2 + $0x130] sm:$0xff] %vm389_vm0, %v778_v33  ;;  %1133 = vrot.lane.b32.xlu1 %v4452_v9, %s4152_s23  ;;  %1113 = vrot.lane.b32.xlu0 %v4452_v9, %s4153_s24  ;;  %s4171_s24 = smov 99  }
 0x109   : > { %v796_v34 = vpop.permute.xlu1 %795  ;;  %v788_v35 = vpop.permute.xlu0 %787 }
 0x10a   : > { %798 = vst.msk [vmem:[#allocation2 + $0x140] sm:$0xff] %vm389_vm0, %v796_v34  ;;  %v790_v36 = vsel %vm789_vm14, %v786_v31, %v788_v35  ;;  %v1448_v38 = vld [vmem:[#allocation2 + $0x128] sm:$0xff]  ;;  %vm1023_vm14 = vcmask 752640  }
 0x10b   : > { %792 = vst.msk [vmem:[#allocation2 + $0x138] sm:$0xff] %vm389_vm0, %v790_v36  ;;  %1145 = vrot.lane.b32.xlu1 %v4452_v9, %s4154_s25  ;;  %1135 = vrot.lane.b32.xlu0 %v4449_v8, %s4152_s23  ;;  %v1529_v39 = vpack.c.bf16 %v1448_v38, %v1447_v37  ;;  %s4170_s23 = smov 119  }
 0x10d   : > { %v816_v40 = vpop.permute.xlu1 %815  ;;  %v802_v41 = vpop.permute.xlu0 %801  ;;  %3684 = vmatprep.mubr.msk.bf16.mxu0 %vm389_vm0, %v1529_v39 }
 0x10e   : > { %804 = vst.msk [vmem:[#allocation2 + $0x148] sm:$0xff] %vm389_vm0, %v802_v41  ;;  %v1449_v45 = vld [vmem:[#allocation2 + $0x130] sm:$0xff] }
 0x10f   : > { %1157 = vrot.lane.b32.xlu1 %v4452_v9, %s4155_s26  ;;  %1147 = vrot.lane.b32.xlu0 %v4449_v8, %s4154_s25  ;;  %s4172_s25 = smov 89  }
 0x111   : > { %v808_v42 = vpop.permute.xlu1 %807  ;;  %v818_v43 = vpop.permute.xlu0 %817  ;;  %v1451_v50 = vld [vmem:[#allocation2 + $0x140] sm:$0xff] }
 0x112   : > { %810 = vst.msk [vmem:[#allocation2 + $0x150] sm:$0xff] %vm389_vm0, %v808_v42  ;;  %v820_v44 = vsel %vm819_vm15, %v816_v40, %v818_v43  ;;  %v1450_v46 = vld [vmem:[#allocation2 + $0x138] sm:$0xff]  ;;  %vm1035_vm15 = vcmask 670720  }
 0x113   : > { %822 = vst.msk [vmem:[#allocation2 + $0x158] sm:$0xff] %vm389_vm0, %v820_v44  ;;  %1169 = vrot.lane.b32.xlu1 %v4452_v9, %s4156_s28  ;;  %1159 = vrot.lane.b32.xlu0 %v4449_v8, %s4155_s26  ;;  %v1530_v47 = vpack.c.bf16 %v1450_v46, %v1449_v45  ;;  %s4173_s26 = smov 79  }
 0x115   : > { %v830_v48 = vpop.permute.xlu1 %829  ;;  %v828_v49 = vpop.permute.xlu0 %827  ;;  %3685 = vmatmul.mubr.msk.bf16.gmra.mrb[36].mxu0 %vm389_vm0, %v1530_v47  ;;  %v1452_v51 = vld [vmem:[#allocation2 + $0x148] sm:$0xff] }
 0x116   : > { %v832_v52 = vsel %vm831_vm1, %v828_v49, %v830_v48  ;;  %v1531_v53 = vpack.c.bf16 %v1452_v51, %v1451_v50  ;;  %vm1047_vm1 = vcmask 588800  }
 0x117   : > { %834 = vst.msk [vmem:[#allocation2 + $0x160] sm:$0xff] %vm389_vm0, %v832_v52  ;;  %1181 = vrot.lane.b32.xlu1 %v4452_v9, %s4157_s29  ;;  %1171 = vrot.lane.b32.xlu0 %v4449_v8, %s4156_s28  ;;  %s4174_s28 = smov 69  }
 0x118   : > { %3688 = vmatprep.mubr.msk.bf16.mxu0 %vm389_vm0, %v1531_v53 }
 0x119   : > { %v842_v54 = vpop.permute.xlu1 %841  ;;  %v840_v55 = vpop.permute.xlu0 %839  ;;  %v1453_v56 = vld [vmem:[#allocation2 + $0x150] sm:$0xff] }
 0x11a   : > { %v844_v57 = vsel %vm843_vm2, %v840_v55, %v842_v54  ;;  %v1454_v58 = vld [vmem:[#allocation2 + $0x158] sm:$0xff]  ;;  %vm1059_vm2 = vcmask 506880  }
 0x11b   : > { %846 = vst.msk [vmem:[#allocation2 + $0x168] sm:$0xff] %vm389_vm0, %v844_v57  ;;  %1193 = vrot.lane.b32.xlu1 %v4452_v9, %s4158_s30  ;;  %1183 = vrot.lane.b32.xlu0 %v4449_v8, %s4157_s29  ;;  %v1532_v59 = vpack.c.bf16 %v1454_v58, %v1453_v56  ;;  %s4175_s29 = smov 59  }
 0x11d   : > { %v854_v60 = vpop.permute.xlu1 %853  ;;  %v852_v61 = vpop.permute.xlu0 %851  ;;  %3689 = vmatmul.mubr.msk.bf16.gmra.mrb[40].mxu0 %vm389_vm0, %v1532_v59 }
 0x11e   : > { %v856_v62 = vsel %vm855_vm3, %v852_v61, %v854_v60  ;;  %v1455_v2 = vld [vmem:[#allocation2 + $0x160] sm:$0xff] }
 0x11f   : > { %858 = vst.msk [vmem:[#allocation2 + $0x170] sm:$0xff] %vm389_vm0, %v856_v62  ;;  %1235 = vrot.lane.b32.xlu1 %v4452_v9, %s4159_s12  ;;  %1195 = vrot.lane.b32.xlu0 %v4449_v8, %s4158_s30  ;;  %s4176_s30 = smov 49  }
 0x121   : > { %v866_v63 = vpop.permute.xlu1 %865  ;;  %v864_v0 = vpop.permute.xlu0 %863 }
 0x122   : > { %v868_v1 = vsel %vm867_vm4, %v864_v0, %v866_v63  ;;  %v1456_v3 = vld [vmem:[#allocation2 + $0x168] sm:$0xff]  ;;  %vm1071_vm4 = vcmask 424960  }
 0x123   : > { %870 = vst.msk [vmem:[#allocation2 + $0x178] sm:$0xff] %vm389_vm0, %v868_v1  ;;  %1247 = vrot.lane.b32.xlu1 %v4452_v9, %s4160_s13  ;;  %1237 = vrot.lane.b32.xlu0 %v4449_v8, %s4159_s12  ;;  %v1533_v6 = vpack.c.bf16 %v1456_v3, %v1455_v2  ;;  %s4177_s12 = smov 39  }
 0x125   : > { %v878_v7 = vpop.permute.xlu1 %877  ;;  %v876_v10 = vpop.permute.xlu0 %875  ;;  %3692 = vmatprep.mubr.msk.bf16.mxu0 %vm389_vm0, %v1533_v6 }
 0x126   : > { %v880_v11 = vsel %vm879_vm5, %v876_v10, %v878_v7  ;;  %v1457_v4 = vld [vmem:[#allocation2 + $0x170] sm:$0xff]  ;;  %vm1083_vm5 = vcmask 343040  }
 0x127   : > { %882 = vst.msk [vmem:[#allocation2 + $0x180] sm:$0xff] %vm389_vm0, %v880_v11  ;;  %1259 = vrot.lane.b32.xlu1 %v4452_v9, %s4161_s14  ;;  %1249 = vrot.lane.b32.xlu0 %v4449_v8, %s4160_s13  ;;  %s4178_s13 = smov 29  }
 0x129   : > { %v890_v12 = vpop.permute.xlu1 %889  ;;  %v888_v13 = vpop.permute.xlu0 %887 }
 0x12a   : > { %v892_v14 = vsel %vm891_vm6, %v888_v13, %v890_v12  ;;  %v1458_v5 = vld [vmem:[#allocation2 + $0x178] sm:$0xff]  ;;  %vm1095_vm6 = vcmask 261120  }
 0x12b   : > { %894 = vst.msk [vmem:[#allocation2 + $0x188] sm:$0xff] %vm389_vm0, %v892_v14  ;;  %1271 = vrot.lane.b32.xlu1 %v4452_v9, %s4162_s15  ;;  %1261 = vrot.lane.b32.xlu0 %v4449_v8, %s4161_s14  ;;  %v1534_v15 = vpack.c.bf16 %v1458_v5, %v1457_v4 }
 0x12d   : > { %v904_v16 = vpop.permute.xlu1 %903  ;;  %v898_v17 = vpop.permute.xlu0 %897  ;;  %3693 = vmatmul.mubr.msk.bf16.gmra.mrb[44].mxu0 %vm389_vm0, %v1534_v15 }
 0x12e   : > { %906 = vst.msk [vmem:[#allocation2 + $0x198] sm:$0xff] %vm389_vm0, %v904_v16  ;;  %900 = vst.msk [vmem:[#allocation2 + $0x190] sm:$0xff] %vm389_vm0, %v898_v17  ;;  %v1459_v21 = vld [vmem:[#allocation2 + $0x180] sm:$0xff] }
 0x12f   : > { %1203 = vrot.lane.b32.xlu1 %v4452_v9, %s4163_s16  ;;  %1273 = vrot.lane.b32.xlu0 %v4449_v8, %s4162_s15 }
 0x131   : > { %v920_v18 = vpop.permute.xlu1 %919  ;;  %v918_v19 = vpop.permute.xlu0 %917 }
 0x132   : > { %v922_v20 = vsel %vm921_vm7, %v918_v19, %v920_v18  ;;  %v1460_v22 = vld [vmem:[#allocation2 + $0x188] sm:$0xff]  ;;  %vm1125_vm7 = vcmask 744448  }
 0x133   : > { %924 = vst.msk [vmem:[#allocation2 + $0x1a8] sm:$0xff] %vm389_vm0, %v922_v20  ;;  %1223 = vrot.lane.b32.xlu1 %v4452_v9, %s4164_s17  ;;  %1209 = vrot.lane.b32.xlu0 %v4452_v9, %s4165_s27  ;;  %v1535_v23 = vpack.c.bf16 %v1460_v22, %v1459_v21 }
 0x135   : > { %v930_v24 = vpop.permute.xlu1 %929  ;;  %v910_v25 = vpop.permute.xlu0 %909  ;;  %3696 = vmatprep.mubr.msk.bf16.mxu0 %vm389_vm0, %v1535_v23  ;;  %v1461_v26 = vld [vmem:[#allocation2 + $0x190] sm:$0xff]  ;;  %v1462_v27 = vld [vmem:[#allocation2 + $0x198] sm:$0xff] }
 0x136   : > { %912 = vst.msk [vmem:[#allocation2 + $0x1a0] sm:$0xff] %vm389_vm0, %v910_v25  ;;  %v1536_v28 = vpack.c.bf16 %v1462_v27, %v1461_v26 }
 0x137   : > { %1215 = vrot.lane.b32.xlu1 %v4452_v9, %s4166_s18  ;;  %1225 = vrot.lane.b32.xlu0 %v4449_v8, %s4164_s17 }
 0x138   : > { %3697 = vmatmul.mubr.msk.bf16.gmra.mrb[48].mxu0 %vm389_vm0, %v1536_v28 }
 0x139   : > { %v942_v29 = vpop.permute.xlu1 %941  ;;  %v932_v30 = vpop.permute.xlu0 %931 }
 0x13a   : > { %v934_v31 = vsel %vm933_vm8, %v930_v24, %v932_v30  ;;  %v1464_v35 = vld [vmem:[#allocation2 + $0x1a8] sm:$0xff]  ;;  %vm1137_vm8 = vcmask 662528  }
 0x13b   : > { %936 = vst.msk [vmem:[#allocation2 + $0x1b0] sm:$0xff] %vm389_vm0, %v934_v31  ;;  %1285 = vrot.lane.b32.xlu1 %v4449_v8, %s4167_s21  ;;  %1283 = vrot.lane.b32.xlu0 %v4452_v9, %s4167_s21 }
 0x13d   : > { %v954_v32 = vpop.permute.xlu1 %953  ;;  %v944_v33 = vpop.permute.xlu0 %943  ;;  %v1463_v34 = vld [vmem:[#allocation2 + $0x1a0] sm:$0xff] }
 0x13e   : > { %v946_v36 = vsel %vm945_vm9, %v942_v29, %v944_v33  ;;  %v1537_v37 = vpack.c.bf16 %v1464_v35, %v1463_v34  ;;  %vm1149_vm9 = vcmask 580608  }
 0x13f   : > { %948 = vst.msk [vmem:[#allocation2 + $0x1b8] sm:$0xff] %vm389_vm0, %v946_v36  ;;  %1297 = vrot.lane.b32.xlu1 %v4449_v8, %s4168_s22  ;;  %1295 = vrot.lane.b32.xlu0 %v4452_v9, %s4168_s22 }
 0x140   : > { %3700 = vmatprep.mubr.msk.bf16.mxu0 %vm389_vm0, %v1537_v37 }
 0x141   : > { %v966_v38 = vpop.permute.xlu1 %965  ;;  %v956_v39 = vpop.permute.xlu0 %955 }
 0x142   : > { %v958_v40 = vsel %vm957_vm10, %v954_v32, %v956_v39  ;;  %v1465_v44 = vld [vmem:[#allocation2 + $0x1b0] sm:$0xff]  ;;  %vm1161_vm10 = vcmask 498688  }
 0x143   : > { %960 = vst.msk [vmem:[#allocation2 + $0x1c0] sm:$0xff] %vm389_vm0, %v958_v40  ;;  %1311 = vrot.lane.b32.xlu1 %v4452_v9, %s4169_s10  ;;  %1305 = vrot.lane.b32.xlu0 %v4452_v9, %s4170_s23 }
 0x145   : > { %v978_v41 = vpop.permute.xlu1 %977  ;;  %v968_v42 = vpop.permute.xlu0 %967 }
 0x146   : > { %v970_v43 = vsel %vm969_vm11, %v966_v38, %v968_v42  ;;  %v1466_v45 = vld [vmem:[#allocation2 + $0x1b8] sm:$0xff]  ;;  %vm1173_vm11 = vcmask 416768  }
 0x147   : > { %972 = vst.msk [vmem:[#allocation2 + $0x1c8] sm:$0xff] %vm389_vm0, %v970_v43  ;;  %1321 = vrot.lane.b32.xlu1 %v4449_v8, %s4171_s24  ;;  %1319 = vrot.lane.b32.xlu0 %v4452_v9, %s4171_s24  ;;  %v1538_v46 = vpack.c.bf16 %v1466_v45, %v1465_v44  ;;  %s3387_s24 = sshll.u32 %s5367_s20, 3 }
 0x149   : > { %v990_v47 = vpop.permute.xlu1 %989  ;;  %v980_v48 = vpop.permute.xlu0 %979  ;;  %3701 = vmatmul.mubr.msk.bf16.gmra.mrb[52].mxu0 %vm389_vm0, %v1538_v46 }
 0x14a   : > { %v982_v49 = vsel %vm981_vm12, %v978_v41, %v980_v48  ;;  %v1467_v53 = vld [vmem:[#allocation2 + $0x1c0] sm:$0xff]  ;;  %vm1185_vm12 = vcmask 334848  }
 0x14b   : > { %984 = vst.msk [vmem:[#allocation2 + $0x1d0] sm:$0xff] %vm389_vm0, %v982_v49  ;;  %1333 = vrot.lane.b32.xlu1 %v4449_v8, %s4172_s25  ;;  %1331 = vrot.lane.b32.xlu0 %v4452_v9, %s4172_s25 }
 0x14d   : > { %v1000_v50 = vpop.permute.xlu1 %999  ;;  %v992_v51 = vpop.permute.xlu0 %991 }
 0x14e   : > { %1002 = vst.msk [vmem:[#allocation2 + $0x1e0] sm:$0xff] %vm389_vm0, %v1000_v50  ;;  %v994_v52 = vsel %vm993_vm13, %v990_v47, %v992_v51  ;;  %v1468_v54 = vld [vmem:[#allocation2 + $0x1c8] sm:$0xff]  ;;  %v4590_v51 = vld [vmem:[%s5356_s2] ss:$0 sm:$0xff]  ;;  %vm1197_vm13 = vcmask 252928  }
 0x14f   : > { %996 = vst.msk [vmem:[#allocation2 + $0x1d8] sm:$0xff] %vm389_vm0, %v994_v52  ;;  %1345 = vrot.lane.b32.xlu1 %v4449_v8, %s4173_s26  ;;  %1343 = vrot.lane.b32.xlu0 %v4452_v9, %s4173_s26  ;;  %v1539_v55 = vpack.c.bf16 %v1468_v54, %v1467_v53 }
 0x151   : > { %v1020_v56 = vpop.permute.xlu1 %1019  ;;  %v1006_v57 = vpop.permute.xlu0 %1005  ;;  %3704 = vmatprep.mubr.msk.bf16.mxu0 %vm389_vm0, %v1539_v55 }
 0x152   : > { %1008 = vst.msk [vmem:[#allocation2 + $0x1e8] sm:$0xff] %vm389_vm0, %v1006_v57  ;;  %v1469_v61 = vld [vmem:[#allocation2 + $0x1d0] sm:$0xff] }
 0x153   : > { %1357 = vrot.lane.b32.xlu1 %v4449_v8, %s4174_s28  ;;  %1355 = vrot.lane.b32.xlu0 %v4452_v9, %s4174_s28  ;;  %s386_s28 = scalar_lea.vmem %s5365_s11, %s3387_s24 }
 0x155   : > { %v1012_v58 = vpop.permute.xlu1 %1011  ;;  %v1022_v59 = vpop.permute.xlu0 %1021  ;;  %v1471_v2 = vld [vmem:[#allocation2 + $0x1e0] sm:$0xff] }
 0x156   : > { %1014 = vst.msk [vmem:[#allocation2 + $0x1f0] sm:$0xff] %vm389_vm0, %v1012_v58  ;;  %v1024_v60 = vsel %vm1023_vm14, %v1020_v56, %v1022_v59  ;;  %v1470_v62 = vld [vmem:[#allocation2 + $0x1d8] sm:$0xff]  ;;  %vm1239_vm14 = vcmask 654336  }
 0x157   : > { %1026 = vst.msk [vmem:[#allocation2 + $0x1f8] sm:$0xff] %vm389_vm0, %v1024_v60  ;;  %1369 = vrot.lane.b32.xlu1 %v4449_v8, %s4175_s29  ;;  %1367 = vrot.lane.b32.xlu0 %v4452_v9, %s4175_s29  ;;  %v1540_v63 = vpack.c.bf16 %v1470_v62, %v1469_v61 }
 0x159   : > { %v1034_v0 = vpop.permute.xlu1 %1033  ;;  %v1032_v1 = vpop.permute.xlu0 %1031  ;;  %3705 = vmatmul.mubr.msk.bf16.gmra.mrb[56].mxu0 %vm389_vm0, %v1540_v63  ;;  %v1472_v3 = vld [vmem:[#allocation2 + $0x1e8] sm:$0xff] }
 0x15a   : > { %v1036_v6 = vsel %vm1035_vm15, %v1032_v1, %v1034_v0  ;;  %v1541_v7 = vpack.c.bf16 %v1472_v3, %v1471_v2  ;;  %vm1251_vm15 = vcmask 572416  }
 0x15b   : > { %1038 = vst.msk [vmem:[#allocation2 + $0x200] sm:$0xff] %vm389_vm0, %v1036_v6  ;;  %1381 = vrot.lane.b32.xlu1 %v4449_v8, %s4176_s30  ;;  %1379 = vrot.lane.b32.xlu0 %v4452_v9, %s4176_s30 }
 0x15c   : > { %3708 = vmatprep.mubr.msk.bf16.mxu0 %vm389_vm0, %v1541_v7 }
 0x15d   : > { %v1046_v10 = vpop.permute.xlu1 %1045  ;;  %v1044_v11 = vpop.permute.xlu0 %1043  ;;  %v1473_v12 = vld [vmem:[#allocation2 + $0x1f0] sm:$0xff] }
 0x15e   : > { %v1048_v13 = vsel %vm1047_vm1, %v1044_v11, %v1046_v10  ;;  %v1474_v14 = vld [vmem:[#allocation2 + $0x1f8] sm:$0xff]  ;;  %vm1263_vm1 = vcmask 490496  }
 0x15f   : > { %1050 = vst.msk [vmem:[#allocation2 + $0x208] sm:$0xff] %vm389_vm0, %v1048_v13  ;;  %1393 = vrot.lane.b32.xlu1 %v4449_v8, %s4177_s12  ;;  %1391 = vrot.lane.b32.xlu0 %v4452_v9, %s4177_s12  ;;  %v1542_v4 = vpack.c.bf16 %v1474_v14, %v1473_v12 }
 0x161   : > { %v1058_v5 = vpop.permute.xlu1 %1057  ;;  %v1056_v15 = vpop.permute.xlu0 %1055  ;;  %3709 = vmatmul.mubr.msk.bf16.gmra.mrb[60].mxu0 %vm389_vm0, %v1542_v4 }
 0x162   : > { %v1060_v16 = vsel %vm1059_vm2, %v1056_v15, %v1058_v5  ;;  %v1475_v20 = vld [vmem:[#allocation2 + $0x200] sm:$0xff]  ;;  %vm1275_vm2 = vcmask 408576  }
 0x163   : > { %1062 = vst.msk [vmem:[#allocation2 + $0x210] sm:$0xff] %vm389_vm0, %v1060_v16  ;;  %1405 = vrot.lane.b32.xlu1 %v4449_v8, %s4178_s13  ;;  %1403 = vrot.lane.b32.xlu0 %v4452_v9, %s4178_s13 }
 0x165   : > { %v1070_v17 = vpop.permute.xlu1 %1069  ;;  %v1068_v18 = vpop.permute.xlu0 %1067 }
 0x166   : > { %v1072_v19 = vsel %vm1071_vm4, %v1068_v18, %v1070_v17  ;;  %v1476_v21 = vld [vmem:[#allocation2 + $0x208] sm:$0xff]  ;;  %vm1227_vm4 = vcmask 736256  }
 0x167   : > { %1074 = vst.msk [vmem:[#allocation2 + $0x218] sm:$0xff] %vm389_vm0, %v1072_v19  ;;  %v1543_v22 = vpack.c.bf16 %v1476_v21, %v1475_v20 }
 0x168   : > { %v4566_v23 = vpop.f32.mrb[0].mxu0 }
 0x169   : > { %v1082_v24 = vpop.permute.xlu1 %1081  ;;  %v1080_v25 = vpop.permute.xlu0 %1079  ;;  %3712 = vmatprep.mubr.msk.bf16.mxu0 %vm389_vm0, %v1543_v22 }
 0x16a   : > { %v1084_v26 = vsel %vm1083_vm5, %v1080_v25, %v1082_v24  ;;  %v1808_v8 = vpop.f32.mrb[1].mxu0  ;;  %v1477_v31 = vld [vmem:[#allocation2 + $0x210] sm:$0xff]  ;;  %vm1287_vm5 = vcmask 326656  }
 0x16b   : > { %1086 = vst.msk [vmem:[#allocation2 + $0x220] sm:$0xff] %vm389_vm0, %v1084_v26  ;;  %v4570_v9 = vpop.f32.mrb[2].mxu0  ;;  %v1809_v55 = vadd.f32 %v4590_v51, %v1808_v8 }
 0x16c   : > { %v1811_v27 = vpop.f32.mrb[3].mxu0 }
 0x16d   : > { %v1094_v28 = vpop.permute.xlu1 %1093  ;;  %v1092_v29 = vpop.permute.xlu0 %1091  ;;  %v1812_v62 = vadd.f32 %v4590_v51, %v1811_v27  ;;  %v2207_v0 = vmax.f32 %v1809_v55, 0.0 }
 0x16e   : > { %v1096_v30 = vsel %vm1095_vm6, %v1092_v29, %v1094_v28  ;;  %v1478_v32 = vld [vmem:[#allocation2 + $0x218] sm:$0xff] }
 0x16f   : > { %1098 = vst.msk [vmem:[#allocation2 + $0x228] sm:$0xff] %vm389_vm0, %v1096_v30  ;;  %v1544_v33 = vpack.c.bf16 %v1478_v32, %v1477_v31  ;;  %v2208_v12 = vmax.f32 %v1812_v62, 0.0  ;;  %v4605_v4 = vsel %vm1095_vm6, %v2207_v0, -inf }
 0x171   : > { %v1108_v34 = vpop.permute.xlu1 %1107  ;;  %v1102_v35 = vpop.permute.xlu0 %1101  ;;  %3713 = vmatmul.mubr.msk.bf16.gmra.mrb[64].mxu0 %vm389_vm0, %v1544_v33  ;;  %v4613_v22 = vsel %vm1095_vm6, %v2208_v12, -inf }
 0x172   : > { %1110 = vst.msk [vmem:[#allocation2 + $0x238] sm:$0xff] %vm389_vm0, %v1108_v34  ;;  %1104 = vst.msk [vmem:[#allocation2 + $0x230] sm:$0xff] %vm389_vm0, %v1102_v35  ;;  %v1479_v39 = vld [vmem:[#allocation2 + $0x220] sm:$0xff]  ;;  %v1817_v35 = vadd.f32 %v4566_v23, %v4590_v51 }
 0x175   : > { %v1124_v36 = vpop.permute.xlu1 %1123  ;;  %v1122_v37 = vpop.permute.xlu0 %1121 }
 0x176   : > { %v1126_v38 = vsel %vm1125_vm7, %v1122_v37, %v1124_v36  ;;  %v1480_v40 = vld [vmem:[#allocation2 + $0x228] sm:$0xff]  ;;  %v1820_v37 = vadd.f32 %v4570_v9, %v4590_v51  ;;  %vm1299_vm7 = vcmask 244736  }
 0x177   : > { %1128 = vst.msk [vmem:[#allocation2 + $0x248] sm:$0xff] %vm389_vm0, %v1126_v38  ;;  %v1545_v41 = vpack.c.bf16 %v1480_v40, %v1479_v39 }
 0x178   : > { %v4578_v42 = vpop.f32.mrb[4].mxu0 }
 0x179   : > { %v1134_v43 = vpop.permute.xlu1 %1133  ;;  %v1114_v44 = vpop.permute.xlu0 %1113  ;;  %3716 = vmatprep.mubr.msk.bf16.mxu0 %vm389_vm0, %v1545_v41  ;;  %v1481_v45 = vld [vmem:[#allocation2 + $0x230] sm:$0xff]  ;;  %v1482_v46 = vld [vmem:[#allocation2 + $0x238] sm:$0xff] }
 0x17a   : > { %1116 = vst.msk [vmem:[#allocation2 + $0x240] sm:$0xff] %vm389_vm0, %v1114_v44  ;;  %v1824_v47 = vpop.f32.mrb[5].mxu0  ;;  %v1546_v48 = vpack.c.bf16 %v1482_v46, %v1481_v45  ;;  %v2209_v46 = vmax.f32 %v1817_v35, 0.0 }
 0x17b   : > { %v4582_v49 = vpop.f32.mrb[6].mxu0  ;;  %v1825_v29 = vadd.f32 %v4590_v51, %v1824_v47 }
 0x17c   : > { %v4584_v50 = vpop.f32.mrb[7].mxu0  ;;  %3717 = vmatmul.mubr.msk.bf16.gmra.mrb[68].mxu0 %vm389_vm0, %v1546_v48 }
 0x17d   : > { %v1146_v52 = vpop.permute.xlu1 %1145  ;;  %v1136_v53 = vpop.permute.xlu0 %1135  ;;  %v1828_v38 = vadd.f32 %v4590_v51, %v4584_v50  ;;  %v2211_v40 = vmax.f32 %v1825_v29, 0.0 }
 0x17e   : > { %v1138_v54 = vsel %vm1137_vm8, %v1134_v43, %v1136_v53  ;;  %v1484_v59 = vld [vmem:[#allocation2 + $0x248] sm:$0xff]  ;;  %vm1323_vm8 = vcmask 809984  }
 0x17f   : > { %1140 = vst.msk [vmem:[#allocation2 + $0x250] sm:$0xff] %vm389_vm0, %v1138_v54  ;;  %v2212_v50 = vmax.f32 %v1828_v38, 0.0  ;;  %v4637_v55 = vsel %vm1095_vm6, %v2211_v40, -inf }
 0x181   : > { %v1158_v56 = vpop.permute.xlu1 %1157  ;;  %v1148_v57 = vpop.permute.xlu0 %1147  ;;  %v1483_v58 = vld [vmem:[#allocation2 + $0x240] sm:$0xff] }
 0x182   : > { %v1150_v60 = vsel %vm1149_vm9, %v1146_v52, %v1148_v57  ;;  %v1547_v61 = vpack.c.bf16 %v1484_v59, %v1483_v58  ;;  %v2210_v52 = vmax.f32 %v1820_v37, 0.0  ;;  %vm1335_vm9 = vcmask 728064  }
 0x183   : > { %1152 = vst.msk [vmem:[#allocation2 + $0x258] sm:$0xff] %vm389_vm0, %v1150_v60  ;;  %v3658_v63 = vpop.f32.mrb[8].mxu0 }
 0x184   : > { %v1849_v1 = vadd.f32 %v3658_v63, %v4590_v51  ;;  %v4597_v2 = vpop.f32.mrb[9].mxu0  ;;  %3720 = vmatprep.mubr.msk.bf16.mxu0 %vm389_vm0, %v1547_v61 }
 0x185   : > { %v1170_v3 = vpop.permute.xlu1 %1169  ;;  %v1160_v6 = vpop.permute.xlu0 %1159 }
 0x186   : > { %v2217_v7 = vmax.f32 %v1849_v1, 0.0  ;;  %v1162_v10 = vsel %vm1161_vm10, %v1158_v56, %v1160_v6  ;;  %v3659_v11 = vpop.f32.mrb[10].mxu0  ;;  %v1485_v20 = vld [vmem:[#allocation2 + $0x250] sm:$0xff]  ;;  %vm1347_vm10 = vcmask 646144  }
 0x187   : > { %1164 = vst.msk [vmem:[#allocation2 + $0x260] sm:$0xff] %vm389_vm0, %v1162_v10  ;;  %v1852_v13 = vadd.f32 %v3659_v11, %v4590_v51  ;;  %v4602_v14 = vpop.f32.mrb[11].mxu0  ;;  %v4653_v11 = vsel %vm1095_vm6, %v2212_v50, -inf }
 0x188   : > { %v4608_v5 = vsel %vm1095_vm6, %v2217_v7, -inf  ;;  %v1844_v35 = vadd.f32 %v4590_v51, %v4602_v14 }
 0x189   : > { %v2309_v15 = vmax.f32 %v4605_v4, %v4608_v5  ;;  %v2218_v16 = vmax.f32 %v1852_v13, 0.0  ;;  %v1182_v17 = vpop.permute.xlu1 %1181  ;;  %v1172_v18 = vpop.permute.xlu0 %1171 }
 0x18a   : > { %v1174_v19 = vsel %vm1173_vm11, %v1170_v3, %v1172_v18  ;;  %v1486_v21 = vld [vmem:[#allocation2 + $0x258] sm:$0xff]  ;;  %v4646_v3 = vsel %vm1095_vm6, %v2209_v46, -inf  ;;  %vm1359_vm11 = vcmask 564224  }
 0x18b   : > { %v4616_v24 = vsel %vm1095_vm6, %v2218_v16, -inf  ;;  %1176 = vst.msk [vmem:[#allocation2 + $0x268] sm:$0xff] %vm389_vm0, %v1174_v19  ;;  %v1548_v25 = vpack.c.bf16 %v1486_v21, %v1485_v20  ;;  %v4661_v16 = vsel %vm1095_vm6, %v2210_v52, -inf }
 0x18c   : > { %v2328_v26 = vmax.f32 %v4613_v22, %v4616_v24 }
 0x18d   : > { %v1194_v8 = vpop.permute.xlu1 %1193  ;;  %v1184_v27 = vpop.permute.xlu0 %1183  ;;  %3721 = vmatmul.mubr.msk.bf16.gmra.mrb[72].mxu0 %vm389_vm0, %v1548_v25 }
 0x18e   : > { %v1186_v28 = vsel %vm1185_vm12, %v1182_v17, %v1184_v27  ;;  %v1487_v33 = vld [vmem:[#allocation2 + $0x260] sm:$0xff]  ;;  %vm1371_vm12 = vcmask 482304  }
 0x18f   : > { %1188 = vst.msk [vmem:[#allocation2 + $0x270] sm:$0xff] %vm389_vm0, %v1186_v28 }
 0x191   : > { %v1236_v30 = vpop.permute.xlu1 %1235  ;;  %v1196_v31 = vpop.permute.xlu0 %1195 }
 0x192   : > { %v1198_v32 = vsel %vm1197_vm13, %v1194_v8, %v1196_v31  ;;  %v1488_v34 = vld [vmem:[#allocation2 + $0x268] sm:$0xff]  ;;  %v1841_v8 = vadd.f32 %v4590_v51, %v4597_v2  ;;  %vm1383_vm13 = vcmask 400384  }
 0x193   : > { %1200 = vst.msk [vmem:[#allocation2 + $0x278] sm:$0xff] %vm389_vm0, %v1198_v32  ;;  %v1549_v36 = vpack.c.bf16 %v1488_v34, %v1487_v33  ;;  %v1833_v32 = vadd.f32 %v4578_v42, %v4590_v51  ;;  %v1836_v34 = vadd.f32 %v4582_v49, %v4590_v51 }
 0x194   : > { %v3662_v39 = vpop.f32.mrb[12].mxu0 }
 0x195   : > { %v1865_v41 = vadd.f32 %v3662_v39, %v4590_v51  ;;  %v1248_v43 = vpop.permute.xlu1 %1247  ;;  %v1238_v44 = vpop.permute.xlu0 %1237  ;;  %3724 = vmatprep.mubr.msk.bf16.mxu0 %vm389_vm0, %v1549_v36  ;;  %v2215_v36 = vmax.f32 %v1841_v8, 0.0  ;;  %v2213_v40 = vmax.f32 %v1833_v32, 0.0  ;;  %v2214_v49 = vmax.f32 %v1836_v34, 0.0 }
 0x196   : > { %v1240_v45 = vsel %vm1239_vm14, %v1236_v30, %v1238_v44  ;;  %v1856_v23 = vpop.f32.mrb[13].mxu0  ;;  %v1489_v0 = vld [vmem:[#allocation2 + $0x270] sm:$0xff]  ;;  %vm1395_vm14 = vcmask 318464  }
 0x197   : > { %v2221_v47 = vmax.f32 %v1865_v41, 0.0  ;;  %1242 = vst.msk [vmem:[#allocation2 + $0x2a0] sm:$0xff] %vm389_vm0, %v1240_v45  ;;  %v1857_v48 = vadd.f32 %v4590_v51, %v1856_v23  ;;  %v3663_v9 = vpop.f32.mrb[14].mxu0  ;;  %v2216_v45 = vmax.f32 %v1844_v35, 0.0  ;;  %v4689_v46 = vsel %vm1095_vm6, %v2215_v36, -inf }
 0x198   : > { %v1868_v53 = vadd.f32 %v3663_v9, %v4590_v51  ;;  %v1859_v54 = vpop.f32.mrb[15].mxu0 }
 0x199   : > { %v4640_v56 = vsel %vm1095_vm6, %v2221_v47, -inf  ;;  %v2219_v57 = vmax.f32 %v1857_v48, 0.0  ;;  %v1860_v58 = vadd.f32 %v4590_v51, %v1859_v54  ;;  %v1260_v59 = vpop.permute.xlu1 %1259  ;;  %v1250_v60 = vpop.permute.xlu0 %1249 }
 0x19a   : > { %v2385_v61 = vmax.f32 %v4637_v55, %v4640_v56  ;;  %v2222_v62 = vmax.f32 %v1868_v53, 0.0  ;;  %v1252_v63 = vsel %vm1251_vm15, %v1248_v43, %v1250_v60  ;;  %v1490_v1 = vld [vmem:[#allocation2 + $0x278] sm:$0xff]  ;;  %v4699_v60 = vsel %vm1095_vm6, %v2213_v40, -inf }
 0x19b   : > { %v4649_v6 = vsel %vm1095_vm6, %v2219_v57, -inf  ;;  %v2220_v7 = vmax.f32 %v1860_v58, 0.0  ;;  %1254 = vst.msk [vmem:[#allocation2 + $0x2a8] sm:$0xff] %vm389_vm0, %v1252_v63  ;;  %v1550_v10 = vpack.c.bf16 %v1490_v1, %v1489_v0  ;;  %v4706_v1 = vsel %vm1095_vm6, %v2216_v45, -inf }
 0x19c   : > { %v2347_v12 = vmax.f32 %v4646_v3, %v4649_v6  ;;  %v4658_v13 = vsel %vm1095_vm6, %v2222_v62, -inf  ;;  %vm1407_vm15 = vcmask 236544  }
 0x19d   : > { %v2404_v17 = vmax.f32 %v4653_v11, %v4658_v13  ;;  %v4666_v18 = vsel %vm1095_vm6, %v2220_v7, -inf  ;;  %v1272_v19 = vpop.permute.xlu1 %1271  ;;  %v1262_v20 = vpop.permute.xlu0 %1261  ;;  %3725 = vmatmul.mubr.msk.bf16.gmra.mrb[76].mxu0 %vm389_vm0, %v1550_v10 }
 0x19e   : > { %v2366_v21 = vmax.f32 %v4661_v16, %v4666_v18  ;;  %v1264_v25 = vsel %vm1263_vm1, %v1260_v59, %v1262_v20  ;;  %v1495_v30 = vld [vmem:[#allocation2 + $0x2a0] sm:$0xff]  ;;  %v4714_v20 = vsel %vm1095_vm6, %v2214_v49, -inf }
 0x19f   : > { %1266 = vst.msk [vmem:[#allocation2 + $0x2b0] sm:$0xff] %vm389_vm0, %v1264_v25 }
 0x1a1   : > { %v1204_v27 = vpop.permute.xlu1 %1203  ;;  %v1274_v28 = vpop.permute.xlu0 %1273 }
 0x1a2   : > { %1206 = vst.msk [vmem:[#allocation2 + $0x280] sm:$0xff] %vm389_vm0, %v1204_v27  ;;  %v1276_v29 = vsel %vm1275_vm2, %v1272_v19, %v1274_v28  ;;  %v1496_v31 = vld [vmem:[#allocation2 + $0x2a8] sm:$0xff] }
 0x1a3   : > { %1278 = vst.msk [vmem:[#allocation2 + $0x2b8] sm:$0xff] %vm389_vm0, %v1276_v29  ;;  %v1553_v33 = vpack.c.bf16 %v1496_v31, %v1495_v30 }
 0x1a4   : > { %v3666_v2 = vpop.f32.mrb[16].mxu0 }
 0x1a5   : > { %v1881_v37 = vadd.f32 %v3666_v2, %v4590_v51  ;;  %v1224_v38 = vpop.permute.xlu1 %1223  ;;  %3732 = vmatprep.mubr.msk.bf16.mxu1 %vm389_vm0, %v1553_v33  ;;  %v1210_v39 = vpop.permute.xlu0 %1209 }
 0x1a6   : > { %1212 = vst.msk [vmem:[#allocation2 + $0x288] sm:$0xff] %vm389_vm0, %v1210_v39  ;;  %v1872_v42 = vpop.f32.mrb[17].mxu0  ;;  %v1497_v58 = vld [vmem:[#allocation2 + $0x2b0] sm:$0xff] }
 0x1a7   : > { %v2225_v41 = vmax.f32 %v1881_v37, 0.0  ;;  %v1873_v43 = vadd.f32 %v4590_v51, %v1872_v42  ;;  %v3667_v44 = vpop.f32.mrb[18].mxu0 }
 0x1a8   : > { %v1884_v14 = vadd.f32 %v3667_v44, %v4590_v51  ;;  %v1875_v23 = vpop.f32.mrb[19].mxu0 }
 0x1a9   : > { %v4692_v47 = vsel %vm1095_vm6, %v2225_v41, -inf  ;;  %v2223_v48 = vmax.f32 %v1873_v43, 0.0  ;;  %v1876_v9 = vadd.f32 %v4590_v51, %v1875_v23  ;;  %v1216_v52 = vpop.permute.xlu1 %1215  ;;  %v1226_v50 = vpop.permute.xlu0 %1225  ;;  %v1491_v30 = vld [vmem:[#allocation2 + $0x280] sm:$0xff] }
 0x1aa   : > { %v2461_v53 = vmax.f32 %v4689_v46, %v4692_v47  ;;  %v2226_v54 = vmax.f32 %v1884_v14, 0.0  ;;  %1218 = vst.msk [vmem:[#allocation2 + $0x290] sm:$0xff] %vm389_vm0, %v1216_v52  ;;  %v1228_v57 = vsel %vm1227_vm4, %v1224_v38, %v1226_v50  ;;  %v1498_v59 = vld [vmem:[#allocation2 + $0x2b8] sm:$0xff] }
 0x1ab   : > { %v4702_v62 = vsel %vm1095_vm6, %v2223_v48, -inf  ;;  %v2224_v63 = vmax.f32 %v1876_v9, 0.0  ;;  %1230 = vst.msk [vmem:[#allocation2 + $0x298] sm:$0xff] %vm389_vm0, %v1228_v57  ;;  %v1554_v0 = vpack.c.bf16 %v1498_v59, %v1497_v58 }
 0x1ac   : > { %v2423_v7 = vmax.f32 %v4699_v60, %v4702_v62  ;;  %v4711_v10 = vsel %vm1095_vm6, %v2226_v54, -inf  ;;  %v3670_v19 = vpop.f32.mrb[20].mxu0 }
 0x1ad   : > { %v2480_v25 = vmax.f32 %v4706_v1, %v4711_v10  ;;  %v4719_v8 = vsel %vm1095_vm6, %v2224_v63, -inf  ;;  %v1897_v27 = vadd.f32 %v3670_v19, %v4590_v51  ;;  %v1286_v28 = vpop.permute.xlu1 %1285  ;;  %3733 = vmatmul.mubr.msk.bf16.vlgmr.msra.gmra.mrb[0].mxu1 %vm389_vm0, %v1554_v0  ;;  %v1284_v29 = vpop.permute.xlu0 %1283  ;;  %v1492_v31 = vld [vmem:[#allocation2 + $0x288] sm:$0xff] }
 0x1ae   : > { %v2442_v32 = vmax.f32 %v4714_v20, %v4719_v8  ;;  %v1288_v33 = vsel %vm1287_vm5, %v1284_v29, %v1286_v28  ;;  %v1888_v34 = vpop.f32.mrb[21].mxu0  ;;  %v1551_v35 = vpack.c.bf16 %v1492_v31, %v1491_v30 }
 0x1af   : > { %v2229_v2 = vmax.f32 %v1897_v27, 0.0  ;;  %1290 = vst.msk [vmem:[#allocation2 + $0x2c0] sm:$0xff] %vm389_vm0, %v1288_v33  ;;  %v1889_v36 = vadd.f32 %v4590_v51, %v1888_v34  ;;  %v3671_v37 = vpop.f32.mrb[22].mxu0 }
 0x1b0   : > { %v1900_v38 = vadd.f32 %v3671_v37, %v4590_v51  ;;  %v1891_v39 = vpop.f32.mrb[23].mxu0  ;;  %3728 = vmatprep.mubr.msk.bf16.mxu0 %vm389_vm0, %v1551_v35 }
 0x1b1   : > { %v2348_v42 = vsel %vm1095_vm6, %v2229_v2, -inf  ;;  %v2227_v40 = vmax.f32 %v1889_v36, 0.0  ;;  %v1892_v41 = vadd.f32 %v4590_v51, %v1891_v39  ;;  %v1298_v43 = vpop.permute.xlu1 %1297  ;;  %v1296_v44 = vpop.permute.xlu0 %1295  ;;  %v1493_v49 = vld [vmem:[#allocation2 + $0x290] sm:$0xff] }
 0x1b2   : > { %v4735_v45 = vmax.f32 %v2347_v12, %v2348_v42  ;;  %v2230_v14 = vmax.f32 %v1900_v38, 0.0  ;;  %v1300_v23 = vsel %vm1299_vm7, %v1296_v44, %v1298_v43  ;;  %v1494_v48 = vld [vmem:[#allocation2 + $0x298] sm:$0xff] }
 0x1b3   : > { %v2310_v9 = vsel %vm1095_vm6, %v2227_v40, -inf  ;;  %v2228_v52 = vmax.f32 %v1892_v41, 0.0  ;;  %1302 = vst.msk [vmem:[#allocation2 + $0x2c8] sm:$0xff] %vm389_vm0, %v1300_v23  ;;  %v1552_v50 = vpack.c.bf16 %v1494_v48, %v1493_v49 }
 0x1b4   : > { %v4742_v54 = vmax.f32 %v2309_v15, %v2310_v9  ;;  %v2367_v57 = vsel %vm1095_vm6, %v2230_v14, -inf }
 0x1b5   : > { %v4748_v3 = vmax.f32 %v2366_v21, %v2367_v57  ;;  %v2329_v6 = vsel %vm1095_vm6, %v2228_v52, -inf  ;;  %v1312_v12 = vpop.permute.xlu1 %1311  ;;  %v1306_v58 = vpop.permute.xlu0 %1305  ;;  %3729 = vmatmul.mubr.msk.bf16.gmra.mrb[80].mxu0 %vm389_vm0, %v1552_v50 }
 0x1b6   : > { %v4755_v59 = vmax.f32 %v2328_v26, %v2329_v6  ;;  %1314 = vst.msk [vmem:[#allocation2 + $0x2d8] sm:$0xff] %vm389_vm0, %v1312_v12  ;;  %1308 = vst.msk [vmem:[#allocation2 + $0x2d0] sm:$0xff] %vm389_vm0, %v1306_v58  ;;  %v1499_v16 = vld [vmem:[#allocation2 + $0x2c0] sm:$0xff] }
 0x1b9   : > { %v1322_v4 = vpop.permute.xlu1 %1321  ;;  %v1320_v5 = vpop.permute.xlu0 %1319 }
 0x1ba   : > { %v1324_v15 = vsel %vm1323_vm8, %v1320_v5, %v1322_v4  ;;  %v1500_v18 = vld [vmem:[#allocation2 + $0x2c8] sm:$0xff] }
 0x1bb   : > { %1326 = vst.msk [vmem:[#allocation2 + $0x2e0] sm:$0xff] %vm389_vm0, %v1324_v15  ;;  %v1555_v21 = vpack.c.bf16 %v1500_v18, %v1499_v16 }
 0x1bc   : > { %v3674_v63 = vpop.f32.mrb[24].mxu0 }
 0x1bd   : > { %v1913_v0 = vadd.f32 %v3674_v63, %v4590_v51  ;;  %v1334_v22 = vpop.permute.xlu1 %1333  ;;  %3736 = vmatprep.mubr.msk.bf16.mxu1 %vm389_vm0, %v1555_v21  ;;  %v1332_v24 = vpop.permute.xlu0 %1331  ;;  %v1501_v26 = vld [vmem:[#allocation2 + $0x2d0] sm:$0xff]  ;;  %v1502_v19 = vld [vmem:[#allocation2 + $0x2d8] sm:$0xff] }
 0x1be   : > { %v1336_v27 = vsel %vm1335_vm9, %v1332_v24, %v1334_v22  ;;  %v1904_v28 = vpop.f32.mrb[25].mxu0  ;;  %v1556_v29 = vpack.c.bf16 %v1502_v19, %v1501_v26 }
 0x1bf   : > { %v2233_v30 = vmax.f32 %v1913_v0, 0.0  ;;  %1338 = vst.msk [vmem:[#allocation2 + $0x2e8] sm:$0xff] %vm389_vm0, %v1336_v27  ;;  %v1905_v31 = vadd.f32 %v4590_v51, %v1904_v28  ;;  %v3675_v33 = vpop.f32.mrb[26].mxu0 }
 0x1c0   : > { %v1916_v34 = vadd.f32 %v3675_v33, %v4590_v51  ;;  %v1907_v35 = vpop.f32.mrb[27].mxu0  ;;  %3737 = vmatmul.mubr.msk.bf16.gmra.mrb[4].mxu1 %vm389_vm0, %v1556_v29 }
 0x1c1   : > { %v2424_v2 = vsel %vm1095_vm6, %v2233_v30, -inf  ;;  %v2231_v36 = vmax.f32 %v1905_v31, 0.0  ;;  %v1908_v37 = vadd.f32 %v4590_v51, %v1907_v35  ;;  %v1346_v38 = vpop.permute.xlu1 %1345  ;;  %v1344_v39 = vpop.permute.xlu0 %1343 }
 0x1c2   : > { %v4771_v42 = vmax.f32 %v2423_v7, %v2424_v2  ;;  %v2234_v40 = vmax.f32 %v1916_v34, 0.0  ;;  %v1348_v41 = vsel %vm1347_vm10, %v1344_v39, %v1346_v38  ;;  %v1503_v55 = vld [vmem:[#allocation2 + $0x2e0] sm:$0xff] }
 0x1c3   : > { %v2386_v43 = vsel %vm1095_vm6, %v2231_v36, -inf  ;;  %v2232_v44 = vmax.f32 %v1908_v37, 0.0  ;;  %1350 = vst.msk [vmem:[#allocation2 + $0x2f0] sm:$0xff] %vm389_vm0, %v1348_v41 }
 0x1c4   : > { %v4778_v49 = vmax.f32 %v2385_v61, %v2386_v43  ;;  %v2443_v14 = vsel %vm1095_vm6, %v2234_v40, -inf }
 0x1c5   : > { %v4784_v60 = vmax.f32 %v2442_v32, %v2443_v14  ;;  %v2405_v62 = vsel %vm1095_vm6, %v2232_v44, -inf  ;;  %v1358_v7 = vpop.permute.xlu1 %1357  ;;  %v1356_v23 = vpop.permute.xlu0 %1355 }
 0x1c6   : > { %v4790_v48 = vmax.f32 %v2404_v17, %v2405_v62  ;;  %v1360_v9 = vsel %vm1359_vm11, %v1356_v23, %v1358_v7  ;;  %v1504_v56 = vld [vmem:[#allocation2 + $0x2e8] sm:$0xff] }
 0x1c7   : > { %1362 = vst.msk [vmem:[#allocation2 + $0x2f8] sm:$0xff] %vm389_vm0, %v1360_v9  ;;  %v3678_v61 = vpop.f32.mrb[28].mxu0  ;;  %v1557_v52 = vpack.c.bf16 %v1504_v56, %v1503_v55 }
 0x1c8   : > { %v1929_v20 = vadd.f32 %v3678_v61, %v4590_v51  ;;  %v1920_v8 = vpop.f32.mrb[29].mxu0 }
 0x1c9   : > { %v1921_v32 = vadd.f32 %v4590_v51, %v1920_v8  ;;  %v1370_v50 = vpop.permute.xlu1 %1369  ;;  %3740 = vmatprep.mubr.msk.bf16.mxu1 %vm389_vm0, %v1557_v52  ;;  %v1368_v57 = vpop.permute.xlu0 %1367 }
 0x1ca   : > { %v2237_v11 = vmax.f32 %v1929_v20, 0.0  ;;  %v1372_v13 = vsel %vm1371_vm12, %v1368_v57, %v1370_v50  ;;  %v3679_v17 = vpop.f32.mrb[30].mxu0  ;;  %v1505_v26 = vld [vmem:[#allocation2 + $0x2f0] sm:$0xff] }
 0x1cb   : > { %v2235_v6 = vmax.f32 %v1921_v32, 0.0  ;;  %1374 = vst.msk [vmem:[#allocation2 + $0x300] sm:$0xff] %vm389_vm0, %v1372_v13  ;;  %v1932_v12 = vadd.f32 %v3679_v17, %v4590_v51  ;;  %v1923_v58 = vpop.f32.mrb[31].mxu0 }
 0x1cc   : > { %v4799_v4 = vsel %vm1095_vm6, %v2237_v11, -inf  ;;  %v1924_v5 = vadd.f32 %v4590_v51, %v1923_v58 }
 0x1cd   : > { %v2313_v15 = vmax.f32 %v4742_v54, %v4799_v4  ;;  %v2462_v16 = vsel %vm1095_vm6, %v2235_v6, -inf  ;;  %v2238_v18 = vmax.f32 %v1932_v12, 0.0  ;;  %v1382_v21 = vpop.permute.xlu1 %1381  ;;  %v1380_v63 = vpop.permute.xlu0 %1379 }
 0x1ce   : > { %v4808_v0 = vmax.f32 %v2461_v53, %v2462_v16  ;;  %v2236_v22 = vmax.f32 %v1924_v5, 0.0  ;;  %v1384_v24 = vsel %vm1383_vm13, %v1380_v63, %v1382_v21  ;;  %v1506_v19 = vld [vmem:[#allocation2 + $0x2f8] sm:$0xff] }
 0x1cf   : > { %v4811_v27 = vsel %vm1095_vm6, %v2238_v18, -inf  ;;  %1386 = vst.msk [vmem:[#allocation2 + $0x308] sm:$0xff] %vm389_vm0, %v1384_v24  ;;  %v1558_v28 = vpack.c.bf16 %v1506_v19, %v1505_v26 }
 0x1d0   : > { %v2332_v29 = vmax.f32 %v4755_v59, %v4811_v27  ;;  %v2481_v30 = vsel %vm1095_vm6, %v2236_v22, -inf }
 0x1d1   : > { %v4820_v46 = vmax.f32 %v2480_v25, %v2481_v30  ;;  %v1394_v47 = vpop.permute.xlu1 %1393  ;;  %3741 = vmatmul.mubr.msk.bf16.gmra.mrb[8].mxu1 %vm389_vm0, %v1558_v28  ;;  %v1392_v53 = vpop.permute.xlu0 %1391 }
 0x1d2   : > { %v1396_v31 = vsel %vm1395_vm14, %v1392_v53, %v1394_v47  ;;  %v1507_v33 = vld [vmem:[#allocation2 + $0x300] sm:$0xff] }
 0x1d3   : > { %1398 = vst.msk [vmem:[#allocation2 + $0x310] sm:$0xff] %vm389_vm0, %v1396_v31 }
 0x1d5   : > { %v1406_v34 = vpop.permute.xlu1 %1405  ;;  %v1404_v35 = vpop.permute.xlu0 %1403 }
 0x1d6   : > { %v1408_v2 = vsel %vm1407_vm15, %v1404_v35, %v1406_v34  ;;  %v1508_v36 = vld [vmem:[#allocation2 + $0x308] sm:$0xff] }
 0x1d7   : > { %1410 = vst.msk [vmem:[#allocation2 + $0x318] sm:$0xff] %vm389_vm0, %v1408_v2  ;;  %v1559_v37 = vpack.c.bf16 %v1508_v36, %v1507_v33 }
 0x1d8   : > { %v3682_v38 = vpop.f32.mrb[32].mxu0 }
 0x1d9   : > { %v1945_v1 = vadd.f32 %v3682_v38, %v4590_v51  ;;  %v1936_v10 = vpop.f32.mrb[33].mxu0  ;;  %3744 = vmatprep.mubr.msk.bf16.mxu1 %vm389_vm0, %v1559_v37 }
 0x1da   : > { %v1937_v25 = vadd.f32 %v4590_v51, %v1936_v10  ;;  %v3683_v39 = vpop.f32.mrb[34].mxu0  ;;  %v1509_v62 = vld [vmem:[#allocation2 + $0x310] sm:$0xff] }
 0x1db   : > { %v2241_v40 = vmax.f32 %v1945_v1, 0.0  ;;  %v1948_v41 = vadd.f32 %v3683_v39, %v4590_v51  ;;  %v1939_v43 = vpop.f32.mrb[35].mxu0 }
 0x1dc   : > { %v2239_v44 = vmax.f32 %v1937_v25, 0.0  ;;  %v1940_v14 = vadd.f32 %v4590_v51, %v1939_v43 }
 0x1dd   : > { %v4831_v7 = vsel %vm1095_vm6, %v2241_v40, -inf  ;;  %v2242_v23 = vmax.f32 %v1948_v41, 0.0 }
 0x1de   : > { %v2389_v9 = vmax.f32 %v4778_v49, %v4831_v7  ;;  %v2350_v55 = vsel %vm1095_vm6, %v2239_v44, -inf  ;;  %v2240_v56 = vmax.f32 %v1940_v14, 0.0  ;;  %v1510_v61 = vld [vmem:[#allocation2 + $0x318] sm:$0xff] }
 0x1df   : > { %v2351_v52 = vmax.f32 %v4735_v45, %v2350_v55  ;;  %v4838_v20 = vsel %vm1095_vm6, %v2242_v23, -inf  ;;  %v1560_v8 = vpack.c.bf16 %v1510_v61, %v1509_v62  ;;  %v4051_v62 = vld [vmem:[%s5357_s3 + $0x10] sm:$0xff]   ;;  %v4179_v23 = vmov 0.0  }
 0x1e0   : > { %v2408_v32 = vmax.f32 %v4790_v48, %v4838_v20  ;;  %v2369_v50 = vsel %vm1095_vm6, %v2240_v56, -inf  ;;  %3748 = vmatprep.subr.bf16.mxu1 %v4179_v23 }
 0x1e1   : > { %v2370_v57 = vmax.f32 %v4748_v3, %v2369_v50  ;;  %3745 = vmatmul.mubr.msk.bf16.gmra.mrb[12].mxu1 %vm389_vm0, %v1560_v8  ;;  %vm4180_vm0 = vmmov 0  }
 0x1e2   : > { %3749 = vmatpush3.bf16.msra.mxu1 %v4051_v62  ;;  %3752 = vmatprep.mubr.msk.bf16.mxu1 %vm4180_vm0, %v4179_v23 }
 0x1e3   : > { %3750 = vmatprep.subr.bf16.mxu1 %v4179_v23 }
 0x1e8   : > { %v3686_v11 = vpop.f32.mrb[36].mxu0 }
 0x1e9   : > { %v1961_v13 = vadd.f32 %v3686_v11, %v4590_v51  ;;  %v1952_v17 = vpop.f32.mrb[37].mxu0 }
 0x1ea   : > { %v1953_v6 = vadd.f32 %v4590_v51, %v1952_v17  ;;  %v3687_v45 = vpop.f32.mrb[38].mxu0 }
 0x1eb   : > { %v2245_v12 = vmax.f32 %v1961_v13, 0.0  ;;  %v1964_v58 = vadd.f32 %v3687_v45, %v4590_v51  ;;  %v1955_v5 = vpop.f32.mrb[39].mxu0 }
 0x1ec   : > { %v2243_v16 = vmax.f32 %v1953_v6, 0.0  ;;  %v1956_v18 = vadd.f32 %v4590_v51, %v1955_v5 }
 0x1ed   : > { %v4850_v21 = vsel %vm1095_vm6, %v2245_v12, -inf  ;;  %v2246_v3 = vmax.f32 %v1964_v58, 0.0 }
 0x1ee   : > { %v2465_v63 = vmax.f32 %v4808_v0, %v4850_v21  ;;  %v2426_v22 = vsel %vm1095_vm6, %v2243_v16, -inf  ;;  %v2244_v24 = vmax.f32 %v1956_v18, 0.0 }
 0x1ef   : > { %v2427_v26 = vmax.f32 %v4771_v42, %v2426_v22  ;;  %v4857_v19 = vsel %vm1095_vm6, %v2246_v3, -inf }
 0x1f0   : > { %v2484_v28 = vmax.f32 %v4820_v46, %v4857_v19  ;;  %v2445_v30 = vsel %vm1095_vm6, %v2244_v24, -inf  ;;  %v3690_v47 = vpop.f32.mrb[40].mxu0 }
 0x1f1   : > { %v2446_v53 = vmax.f32 %v4784_v60, %v2445_v30  ;;  %v1977_v31 = vadd.f32 %v3690_v47, %v4590_v51  ;;  %v1968_v33 = vpop.f32.mrb[41].mxu0 }
 0x1f2   : > { %v1969_v34 = vadd.f32 %v4590_v51, %v1968_v33  ;;  %v3691_v35 = vpop.f32.mrb[42].mxu0 }
 0x1f3   : > { %v2249_v2 = vmax.f32 %v1977_v31, 0.0  ;;  %v1980_v42 = vadd.f32 %v3691_v35, %v4590_v51  ;;  %v1971_v36 = vpop.f32.mrb[43].mxu0 }
 0x1f4   : > { %v2247_v37 = vmax.f32 %v1969_v34, 0.0  ;;  %v1972_v38 = vadd.f32 %v4590_v51, %v1971_v36 }
 0x1f5   : > { %v2352_v1 = vsel %vm1095_vm6, %v2249_v2, -inf  ;;  %v2250_v10 = vmax.f32 %v1980_v42, 0.0 }
 0x1f6   : > { %v4868_v25 = vmax.f32 %v2351_v52, %v2352_v1  ;;  %v2314_v60 = vsel %vm1095_vm6, %v2247_v37, -inf  ;;  %v2248_v39 = vmax.f32 %v1972_v38, 0.0 }
 0x1f7   : > { %v4874_v40 = vmax.f32 %v2313_v15, %v2314_v60  ;;  %v2371_v41 = vsel %vm1095_vm6, %v2250_v10, -inf }
 0x1f8   : > { %v4877_v43 = vmax.f32 %v2370_v57, %v2371_v41  ;;  %v2333_v44 = vsel %vm1095_vm6, %v2248_v39, -inf }
 0x1f9   : > { %v4883_v14 = vmax.f32 %v2332_v29, %v2333_v44 }
 0x200   : > { %v3694_v54 = vpop.f32.mrb[44].mxu0 }
 0x201   : > { %v1993_v4 = vadd.f32 %v3694_v54, %v4590_v51  ;;  %v1984_v15 = vpop.f32.mrb[45].mxu0 }
 0x202   : > { %v1985_v55 = vadd.f32 %v4590_v51, %v1984_v15  ;;  %v3695_v56 = vpop.f32.mrb[46].mxu0 }
 0x203   : > { %v2253_v59 = vmax.f32 %v1993_v4, 0.0  ;;  %v1996_v27 = vadd.f32 %v3695_v56, %v4590_v51  ;;  %v1987_v29 = vpop.f32.mrb[47].mxu0 }
 0x204   : > { %v2251_v61 = vmax.f32 %v1985_v55, 0.0  ;;  %v1988_v52 = vadd.f32 %v4590_v51, %v1987_v29 }
 0x205   : > { %v2428_v8 = vsel %vm1095_vm6, %v2253_v59, -inf  ;;  %v2254_v50 = vmax.f32 %v1996_v27, 0.0 }
 0x206   : > { %v4895_v57 = vmax.f32 %v2427_v26, %v2428_v8  ;;  %v2390_v11 = vsel %vm1095_vm6, %v2251_v61, -inf  ;;  %v2252_v13 = vmax.f32 %v1988_v52, 0.0 }
 0x207   : > { %v4901_v17 = vmax.f32 %v2389_v9, %v2390_v11  ;;  %v2447_v6 = vsel %vm1095_vm6, %v2254_v50, -inf }
 0x208   : > { %v4904_v45 = vmax.f32 %v2446_v53, %v2447_v6  ;;  %v2409_v12 = vsel %vm1095_vm6, %v2252_v13, -inf  ;;  %v4052_v53 = vld [vmem:[%s5357_s3 + $0x18] sm:$0xff]  }
 0x209   : > { %v4910_v58 = vmax.f32 %v2408_v32, %v2409_v12  ;;  %3751 = vmatpush3.bf16.msra.mxu1 %v4052_v53 }
 0x20a   : > { %3756 = vmatprep.subr.bf16.mxu1 %v4179_v23 }
 0x20b   : > { %v3698_v5 = vpop.f32.mrb[48].mxu0 }
 0x20c   : > { %v2009_v16 = vadd.f32 %v3698_v5, %v4590_v51  ;;  %v2000_v18 = vpop.f32.mrb[49].mxu0 }
 0x20d   : > { %v2001_v3 = vadd.f32 %v4590_v51, %v2000_v18  ;;  %v3699_v49 = vpop.f32.mrb[50].mxu0 }
 0x20e   : > { %v2257_v7 = vmax.f32 %v2009_v16, 0.0  ;;  %v2012_v9 = vadd.f32 %v3699_v49, %v4590_v51  ;;  %v2003_v22 = vpop.f32.mrb[51].mxu0 }
 0x20f   : > { %v2255_v24 = vmax.f32 %v2001_v3, 0.0  ;;  %v2004_v26 = vadd.f32 %v4590_v51, %v2003_v22 }
 0x210   : > { %v4917_v30 = vsel %vm1095_vm6, %v2257_v7, -inf  ;;  %v2258_v48 = vmax.f32 %v2012_v9, 0.0 }
 0x211   : > { %v2317_v20 = vmax.f32 %v4874_v40, %v4917_v30  ;;  %v2466_v32 = vsel %vm1095_vm6, %v2255_v24, -inf  ;;  %v2256_v47 = vmax.f32 %v2004_v26, 0.0 }
 0x212   : > { %v4928_v31 = vmax.f32 %v2465_v63, %v2466_v32  ;;  %v4931_v33 = vsel %vm1095_vm6, %v2258_v48, -inf }
 0x213   : > { %v2336_v34 = vmax.f32 %v4883_v14, %v4931_v33  ;;  %v2485_v35 = vsel %vm1095_vm6, %v2256_v47, -inf }
 0x214   : > { %v4939_v2 = vmax.f32 %v2484_v28, %v2485_v35 }
 0x21c   : > { %v3702_v42 = vpop.f32.mrb[52].mxu0 }
 0x21d   : > { %v2025_v0 = vadd.f32 %v3702_v42, %v4590_v51  ;;  %v2016_v21 = vpop.f32.mrb[53].mxu0 }
 0x21e   : > { %v2017_v63 = vadd.f32 %v4590_v51, %v2016_v21  ;;  %v3703_v36 = vpop.f32.mrb[54].mxu0 }
 0x21f   : > { %v2261_v37 = vmax.f32 %v2025_v0, 0.0  ;;  %v2028_v38 = vadd.f32 %v3703_v36, %v4590_v51  ;;  %v2019_v1 = vpop.f32.mrb[55].mxu0 }
 0x220   : > { %v2259_v46 = vmax.f32 %v2017_v63, 0.0  ;;  %v2020_v19 = vadd.f32 %v4590_v51, %v2019_v1 }
 0x221   : > { %v4949_v28 = vsel %vm1095_vm6, %v2261_v37, -inf  ;;  %v2262_v10 = vmax.f32 %v2028_v38, 0.0 }
 0x222   : > { %v2393_v60 = vmax.f32 %v4901_v17, %v4949_v28  ;;  %v2354_v39 = vsel %vm1095_vm6, %v2259_v46, -inf  ;;  %v2260_v41 = vmax.f32 %v2020_v19, 0.0 }
 0x223   : > { %v2355_v44 = vmax.f32 %v4868_v25, %v2354_v39  ;;  %v4956_v62 = vsel %vm1095_vm6, %v2262_v10, -inf }
 0x224   : > { %v2412_v54 = vmax.f32 %v4910_v58, %v4956_v62  ;;  %v2373_v4 = vsel %vm1095_vm6, %v2260_v41, -inf }
 0x225   : > { %v2374_v15 = vmax.f32 %v4877_v43, %v2373_v4 }
 0x22c   : > { %v3706_v55 = vpop.f32.mrb[56].mxu0 }
 0x22d   : > { %v2041_v56 = vadd.f32 %v3706_v55, %v4590_v51  ;;  %v2032_v59 = vpop.f32.mrb[57].mxu0 }
 0x22e   : > { %v2033_v27 = vadd.f32 %v4590_v51, %v2032_v59  ;;  %v3707_v29 = vpop.f32.mrb[58].mxu0 }
 0x22f   : > { %v2265_v61 = vmax.f32 %v2041_v56, 0.0  ;;  %v2044_v25 = vadd.f32 %v3707_v29, %v4590_v51  ;;  %v2035_v52 = vpop.f32.mrb[59].mxu0 }
 0x230   : > { %v2263_v8 = vmax.f32 %v2033_v27, 0.0  ;;  %v2036_v50 = vadd.f32 %v4590_v51, %v2035_v52 }
 0x231   : > { %v4967_v11 = vsel %vm1095_vm6, %v2265_v61, -inf  ;;  %v2266_v13 = vmax.f32 %v2044_v25, 0.0 }
 0x232   : > { %v2469_v43 = vmax.f32 %v4928_v31, %v4967_v11  ;;  %v2430_v6 = vsel %vm1095_vm6, %v2263_v8, -inf  ;;  %v2264_v12 = vmax.f32 %v2036_v50, 0.0 }
 0x233   : > { %v2431_v58 = vmax.f32 %v4895_v57, %v2430_v6  ;;  %v4974_v5 = vsel %vm1095_vm6, %v2266_v13, -inf }
 0x234   : > { %v2488_v16 = vmax.f32 %v4939_v2, %v4974_v5  ;;  %v2449_v18 = vsel %vm1095_vm6, %v2264_v12, -inf  ;;  %v3710_v3 = vpop.f32.mrb[60].mxu0 }
 0x235   : > { %v2450_v49 = vmax.f32 %v4904_v45, %v2449_v18  ;;  %v2057_v7 = vadd.f32 %v3710_v3, %v4590_v51  ;;  %v2048_v9 = vpop.f32.mrb[61].mxu0 }
 0x236   : > { %v2049_v22 = vadd.f32 %v4590_v51, %v2048_v9  ;;  %v3711_v24 = vpop.f32.mrb[62].mxu0  ;;  %v5047_v9 = vld [vmem:[%s5356_s2] ss:$0 sm:$0xff] }
 0x237   : > { %v2269_v26 = vmax.f32 %v2057_v7, 0.0  ;;  %v2060_v57 = vadd.f32 %v3711_v24, %v4590_v51  ;;  %v2051_v48 = vpop.f32.mrb[63].mxu0 }
 0x238   : > { %v2267_v32 = vmax.f32 %v2049_v22, 0.0  ;;  %v2052_v47 = vadd.f32 %v4590_v51, %v2051_v48 }
 0x239   : > { %v2356_v53 = vsel %vm1095_vm6, %v2269_v26, -inf  ;;  %v2270_v35 = vmax.f32 %v2060_v57, 0.0 }
 0x23a   : > { %v4985_v2 = vmax.f32 %v2355_v44, %v2356_v53  ;;  %v2318_v45 = vsel %vm1095_vm6, %v2267_v32, -inf  ;;  %v2268_v42 = vmax.f32 %v2052_v47, 0.0 }
 0x23b   : > { %v4991_v0 = vmax.f32 %v2317_v20, %v2318_v45  ;;  %v2375_v21 = vsel %vm1095_vm6, %v2270_v35, -inf }
 0x23c   : > { %v4994_v63 = vmax.f32 %v2374_v15, %v2375_v21  ;;  %v2337_v36 = vsel %vm1095_vm6, %v2268_v42, -inf }
 0x23d   : > { %v5000_v37 = vmax.f32 %v2336_v34, %v2337_v36 }
 0x244   : > { %v3714_v38 = vpop.f32.mrb[64].mxu0 }
 0x245   : > { %v2073_v1 = vadd.f32 %v3714_v38, %v4590_v51  ;;  %v2064_v46 = vpop.f32.mrb[65].mxu0 }
 0x246   : > { %v2065_v19 = vadd.f32 %v4590_v51, %v2064_v46  ;;  %v3715_v40 = vpop.f32.mrb[66].mxu0 }
 0x247   : > { %v2273_v30 = vmax.f32 %v2073_v1, 0.0  ;;  %v2076_v20 = vadd.f32 %v3715_v40, %v4590_v51  ;;  %v2067_v10 = vpop.f32.mrb[67].mxu0 }
 0x248   : > { %v2271_v39 = vmax.f32 %v2065_v19, 0.0  ;;  %v2068_v41 = vadd.f32 %v4590_v51, %v2067_v10 }
 0x249   : > { %v2432_v44 = vsel %vm1095_vm6, %v2273_v30, -inf  ;;  %v2274_v62 = vmax.f32 %v2076_v20, 0.0 }
 0x24a   : > { %v5007_v14 = vmax.f32 %v2431_v58, %v2432_v44  ;;  %v2394_v33 = vsel %vm1095_vm6, %v2271_v39, -inf  ;;  %v2272_v34 = vmax.f32 %v2068_v41, 0.0 }
 0x24b   : > { %v5013_v4 = vmax.f32 %v2393_v60, %v2394_v33  ;;  %v2451_v15 = vsel %vm1095_vm6, %v2274_v62, -inf }
 0x24c   : > { %v5016_v55 = vmax.f32 %v2450_v49, %v2451_v15  ;;  %v2413_v56 = vsel %vm1095_vm6, %v2272_v34, -inf }
 0x24d   : > { %v5019_v59 = vmax.f32 %v2412_v54, %v2413_v56 }
 0x24f   : > { %v3718_v27 = vpop.f32.mrb[68].mxu0 }
 0x250   : > { %v2089_v29 = vadd.f32 %v3718_v27, %v4590_v51  ;;  %v2080_v61 = vpop.f32.mrb[69].mxu0 }
 0x251   : > { %v2081_v25 = vadd.f32 %v4590_v51, %v2080_v61  ;;  %v3719_v52 = vpop.f32.mrb[70].mxu0 }
 0x252   : > { %v2277_v8 = vmax.f32 %v2089_v29, 0.0  ;;  %v2092_v17 = vadd.f32 %v3719_v52, %v4590_v51  ;;  %v2083_v28 = vpop.f32.mrb[71].mxu0 }
 0x253   : > { %v2275_v60 = vmax.f32 %v2081_v25, 0.0  ;;  %v2084_v50 = vadd.f32 %v4590_v51, %v2083_v28 }
 0x254   : > { %v5026_v13 = vsel %vm1095_vm6, %v2277_v8, -inf  ;;  %v2278_v6 = vmax.f32 %v2092_v17, 0.0 }
 0x255   : > { %v2321_v54 = vmax.f32 %v4991_v0, %v5026_v13  ;;  %v2470_v12 = vsel %vm1095_vm6, %v2275_v60, -inf  ;;  %v2276_v58 = vmax.f32 %v2084_v50, 0.0 }
 0x256   : > { %v5034_v5 = vmax.f32 %v2469_v43, %v2470_v12  ;;  %v5037_v18 = vsel %vm1095_vm6, %v2278_v6, -inf }
 0x257   : > { %v2340_v51 = vmax.f32 %v5000_v37, %v5037_v18  ;;  %v2489_v3 = vsel %vm1095_vm6, %v2276_v58, -inf }
 0x258   : > { %v5042_v49 = vmax.f32 %v2488_v16, %v2489_v3 }
 0x260   : > { %v3722_v7 = vpop.f32.mrb[72].mxu0 }
 0x261   : > { %v2105_v31 = vadd.f32 %v5047_v9, %v3722_v7  ;;  %v2096_v11 = vpop.f32.mrb[73].mxu0 }
 0x262   : > { %v2097_v43 = vadd.f32 %v5047_v9, %v2096_v11  ;;  %v3723_v22 = vpop.f32.mrb[74].mxu0 }
 0x263   : > { %v2281_v24 = vmax.f32 %v2105_v31, 0.0  ;;  %v2108_v26 = vadd.f32 %v5047_v9, %v3723_v22  ;;  %v2099_v57 = vpop.f32.mrb[75].mxu0 }
 0x264   : > { %v2279_v48 = vmax.f32 %v2097_v43, 0.0  ;;  %v2100_v16 = vadd.f32 %v5047_v9, %v2099_v57 }
 0x265   : > { %v2396_v32 = vsel %vm1095_vm6, %v2281_v24, -inf  ;;  %v2282_v47 = vmax.f32 %v2108_v26, 0.0 }
 0x266   : > { %v2397_v53 = vmax.f32 %v5013_v4, %v2396_v32  ;;  %v2358_v35 = vsel %vm1095_vm6, %v2279_v48, -inf  ;;  %v2280_v45 = vmax.f32 %v2100_v16, 0.0 }
 0x267   : > { %v2359_v42 = vmax.f32 %v4985_v2, %v2358_v35  ;;  %v2415_v21 = vsel %vm1095_vm6, %v2282_v47, -inf }
 0x268   : > { %v2416_v36 = vmax.f32 %v5019_v59, %v2415_v21  ;;  %v2377_v38 = vsel %vm1095_vm6, %v2280_v45, -inf }
 0x269   : > { %v2378_v1 = vmax.f32 %v4994_v63, %v2377_v38 }
 0x270   : > { %v3726_v46 = vpop.f32.mrb[76].mxu0 }
 0x271   : > { %v2121_v19 = vadd.f32 %v5047_v9, %v3726_v46  ;;  %v2112_v40 = vpop.f32.mrb[77].mxu0 }
 0x272   : > { %v2113_v30 = vadd.f32 %v5047_v9, %v2112_v40  ;;  %v3727_v20 = vpop.f32.mrb[78].mxu0 }
 0x273   : > { %v2285_v10 = vmax.f32 %v2121_v19, 0.0  ;;  %v2124_v39 = vadd.f32 %v5047_v9, %v3727_v20  ;;  %v2115_v41 = vpop.f32.mrb[79].mxu0 }
 0x274   : > { %v2283_v2 = vmax.f32 %v2113_v30, 0.0  ;;  %v2116_v44 = vadd.f32 %v5047_v9, %v2115_v41 }
 0x275   : > { %v5066_v62 = vsel %vm1095_vm6, %v2285_v10, -inf  ;;  %v2286_v33 = vmax.f32 %v2124_v39, 0.0 }
 0x276   : > { %v2473_v63 = vmax.f32 %v5034_v5, %v5066_v62  ;;  %v2434_v34 = vsel %vm1095_vm6, %v2283_v2, -inf  ;;  %v2284_v4 = vmax.f32 %v2116_v44, 0.0  ;;  %v4054_v5 = vld [vmem:[%s5357_s3 + $0x8] sm:$0xff]  }
 0x277   : > { %v2435_v15 = vmax.f32 %v5007_v14, %v2434_v34  ;;  %v5073_v56 = vsel %vm1095_vm6, %v2286_v33, -inf }
 0x278   : > { %v2492_v59 = vmax.f32 %v5042_v49, %v5073_v56  ;;  %v2453_v27 = vsel %vm1095_vm6, %v2284_v4, -inf }
 0x279   : > { %v2454_v29 = vmax.f32 %v5016_v55, %v2453_v27 }
 0x280   : > { %v3734_v61 = vpop.f32.mrb[0].mxu1 }
 0x281   : > { %v2153_v25 = vadd.f32 %v5047_v9, %v3734_v61  ;;  %v2144_v52 = vpop.f32.mrb[1].mxu1 }
 0x282   : > { %v2145_v8 = vadd.f32 %v5047_v9, %v2144_v52  ;;  %v3735_v17 = vpop.f32.mrb[2].mxu1  ;;  %v4053_v52 = vld [vmem:[%s5357_s3] sm:$0xff]  }
 0x283   : > { %v2293_v28 = vmax.f32 %v2153_v25, 0.0  ;;  %v2156_v14 = vadd.f32 %v5047_v9, %v3735_v17  ;;  %v2147_v60 = vpop.f32.mrb[3].mxu1 }
 0x284   : > { %v2291_v50 = vmax.f32 %v2145_v8, 0.0  ;;  %v2148_v6 = vadd.f32 %v5047_v9, %v2147_v60 }
 0x285   : > { %v2436_v12 = vsel %vm1095_vm6, %v2293_v28, -inf  ;;  %v2294_v58 = vmax.f32 %v2156_v14, 0.0 }
 0x286   : > { %v5084_v3 = vmax.f32 %v2435_v15, %v2436_v12  ;;  %v2398_v55 = vsel %vm1095_vm6, %v2291_v50, -inf  ;;  %v2292_v49 = vmax.f32 %v2148_v6, 0.0 }
 0x287   : > { %v5087_v7 = vmax.f32 %v2397_v53, %v2398_v55  ;;  %v2455_v31 = vsel %vm1095_vm6, %v2294_v58, -inf }
 0x288   : > { %v5090_v11 = vmax.f32 %v2454_v29, %v2455_v31  ;;  %v2417_v43 = vsel %vm1095_vm6, %v2292_v49, -inf  ;;  %v3730_v22 = vpop.f32.mrb[80].mxu0  ;;  %v4056_v49 = vld [vmem:[%s5357_s3 + $0x28] sm:$0xff]  }
 0x289   : > { %v5093_v24 = vmax.f32 %v2416_v36, %v2417_v43  ;;  %v2137_v26 = vadd.f32 %v5047_v9, %v3730_v22  ;;  %v2128_v57 = vpop.f32.mrb[81].mxu0 }
 0x28a   : > { %v2129_v48 = vadd.f32 %v5047_v9, %v2128_v57  ;;  %v3731_v16 = vpop.f32.mrb[82].mxu0 }
 0x28b   : > { %v2289_v32 = vmax.f32 %v2137_v26, 0.0  ;;  %v2140_v47 = vadd.f32 %v5047_v9, %v3731_v16  ;;  %v2131_v53 = vpop.f32.mrb[83].mxu0 }
 0x28c   : > { %v2287_v35 = vmax.f32 %v2129_v48, 0.0  ;;  %v2132_v45 = vadd.f32 %v5047_v9, %v2131_v53  ;;  %v4057_v53 = vld [vmem:[%s5357_s3 + $0x30] sm:$0xff]  }
 0x28d   : > { %v2360_v21 = vsel %vm1095_vm6, %v2289_v32, -inf  ;;  %v2290_v38 = vmax.f32 %v2140_v47, 0.0 }
 0x28e   : > { %v2361_v46 = vmax.f32 %v2359_v42, %v2360_v21  ;;  %v2322_v36 = vsel %vm1095_vm6, %v2287_v35, -inf  ;;  %v2288_v19 = vmax.f32 %v2132_v45, 0.0  ;;  %v4059_v21 = vld [vmem:[%s5357_s3 + $0x40] sm:$0xff]  }
 0x28f   : > { %v2323_v40 = vmax.f32 %v2321_v54, %v2322_v36  ;;  %v2379_v30 = vsel %vm1095_vm6, %v2290_v38, -inf }
 0x290   : > { %v2380_v20 = vmax.f32 %v2378_v1, %v2379_v30  ;;  %v2341_v10 = vsel %vm1095_vm6, %v2288_v19, -inf }
 0x291   : > { %v2342_v39 = vmax.f32 %v2340_v51, %v2341_v10 }
 0x293   : > { %v3738_v41 = vpop.f32.mrb[4].mxu1 }
 0x294   : > { %v2169_v2 = vadd.f32 %v5047_v9, %v3738_v41  ;;  %v2160_v42 = vpop.f32.mrb[5].mxu1 }
 0x295   : > { %v2161_v44 = vadd.f32 %v5047_v9, %v2160_v42  ;;  %v3739_v33 = vpop.f32.mrb[6].mxu1 }
 0x296   : > { %v2297_v34 = vmax.f32 %v2169_v2, 0.0  ;;  %v2172_v0 = vadd.f32 %v5047_v9, %v3739_v33  ;;  %v2163_v13 = vpop.f32.mrb[7].mxu1  ;;  %v4060_v2 = vld [vmem:[%s5357_s3 + $0x48] sm:$0xff]  }
 0x297   : > { %v2295_v54 = vmax.f32 %v2161_v44, 0.0  ;;  %v2164_v1 = vadd.f32 %v5047_v9, %v2163_v13 }
 0x298   : > { %v2324_v4 = vsel %vm1095_vm6, %v2297_v34, -inf  ;;  %v2298_v15 = vmax.f32 %v2172_v0, 0.0 }
 0x299   : > { %v2325_v56 = vmax.f32 %v2323_v40, %v2324_v4  ;;  %v2474_v37 = vsel %vm1095_vm6, %v2295_v54, -inf  ;;  %v2296_v18 = vmax.f32 %v2164_v1, 0.0  ;;  %v4061_v4 = vld [vmem:[%s5357_s3 + $0x50] sm:$0xff]  }
 0x29a   : > { %v5118_v51 = vmax.f32 %v2473_v63, %v2474_v37  ;;  %v2343_v27 = vsel %vm1095_vm6, %v2298_v15, -inf  ;;  %v4055_v63 = vld [vmem:[%s5357_s3 + $0x20] sm:$0xff]  }
 0x29b   : > { %v2344_v29 = vmax.f32 %v2342_v39, %v2343_v27  ;;  %v2493_v61 = vsel %vm1095_vm6, %v2296_v18, -inf  ;;  %v4063_v37 = vld [vmem:[%s5357_s3 + $0x60] sm:$0xff]   ;;  %v4064_v18 = vld [vmem:[%s5357_s3 + $0x68] sm:$0xff]  }
 0x29c   : > { %v5122_v25 = vmax.f32 %v2492_v59, %v2493_v61  ;;  %v2497_v59 = vpack.c.bf16 %v2325_v56, %v2325_v56  ;;  %v4067_v61 = vld [vmem:[%s5357_s3 + $0x80] sm:$0xff]  }
 0x29d   : > { %v2502_v8 = vpack.c.bf16 %v2344_v29, %v2344_v29  ;;  %v4066_v29 = vld [vmem:[%s5357_s3 + $0x78] sm:$0xff]  }
 0x29f   : > { %3753 = vmatmul.mubr.msk.bf16.vlgmr.msra.gmra.mrb[16].mxu1 %vm1095_vm6, %v2502_v8  ;;  %v4069_v8 = vld [vmem:[%s5357_s3 + $0x90] sm:$0xff]  }
 0x2a0   : > { %3757 = vmatpush3.bf16.msra.mxu1 %v4053_v52  ;;  %3760 = vmatprep.mubr.msk.bf16.mxu1 %vm4180_vm0, %v4179_v23  ;;  %v4068_v52 = vld [vmem:[%s5357_s3 + $0x88] sm:$0xff]  }
 0x2a1   : > { %3758 = vmatprep.subr.bf16.mxu1 %v4179_v23 }
 0x2a4   : > { %3759 = vmatpush3.bf16.msra.mxu1 %v4054_v5  ;;  %v3742_v62 = vpop.f32.mrb[8].mxu1 }
 0x2a5   : > { %v2185_v17 = vadd.f32 %v5047_v9, %v3742_v62  ;;  %v2176_v28 = vpop.f32.mrb[9].mxu1  ;;  %3764 = vmatprep.subr.bf16.mxu1 %v4179_v23  ;;  %v4070_v62 = vld [vmem:[%s5357_s3 + $0x98] sm:$0xff]  }
 0x2a6   : > { %v2177_v14 = vadd.f32 %v5047_v9, %v2176_v28  ;;  %v3743_v60 = vpop.f32.mrb[10].mxu1  ;;  %v3124_v28 = vld [vmem:[%s5359_s5 + $0x8] sm:$0xff] }
 0x2a7   : > { %v2301_v50 = vmax.f32 %v2185_v17, 0.0  ;;  %v2188_v6 = vadd.f32 %v5047_v9, %v3743_v60  ;;  %v2179_v12 = vpop.f32.mrb[11].mxu1  ;;  %3761 = vmatmul.mubr.msk.bf16.vlgmr.msra.gmra.mrb[20].mxu1 %vm1095_vm6, %v2497_v59  ;;  %v4181_v59 = vmov 0.0|0.0   ;;  %v3123_v17 = vld [vmem:[%s5359_s5] sm:$0xff]  ;;  %v3125_v60 = vld [vmem:[%s5359_s5 + $0x10] sm:$0xff] }
 0x2a8   : > { %v2299_v58 = vmax.f32 %v2177_v14, 0.0  ;;  %v2180_v55 = vadd.f32 %v5047_v9, %v2179_v12  ;;  %3765 = vmatpush3.bf16.msra.mxu1 %v4055_v63  ;;  %3768 = vmatprep.mubr.msk.bf16.mxu1 %vm4180_vm0, %v4179_v23  ;;  %v3883_v14 = vpack.c.bf16 %v3124_v28, %v3123_v17  ;;  %v3127_v12 = vld [vmem:[%s5359_s5 + $0x20] sm:$0xff] }
 0x2a9   : > { %v2400_v31 = vsel %vm1095_vm6, %v2301_v50, -inf  ;;  %v2302_v43 = vmax.f32 %v2188_v6, 0.0  ;;  %3766 = vmatprep.subr.bf16.mxu1 %v4179_v23  ;;  %v3126_v50 = vld [vmem:[%s5359_s5 + $0x18] sm:$0xff] }
 0x2aa   : > { %v2401_v22 = vmax.f32 %v5087_v7, %v2400_v31  ;;  %v2362_v26 = vsel %vm1095_vm6, %v2299_v58, -inf  ;;  %v2300_v57 = vmax.f32 %v2180_v55, 0.0  ;;  %v4058_v7 = vld [vmem:[%s5357_s3 + $0x38] sm:$0xff]   ;;  %v3886_v6 = vpack.c.bf16 %v3126_v50, %v3125_v60  ;;  %v3128_v58 = vld [vmem:[%s5359_s5 + $0x28] sm:$0xff] }
 0x2ab   : > { %v2363_v48 = vmax.f32 %v2361_v46, %v2362_v26  ;;  %v2419_v16 = vsel %vm1095_vm6, %v2302_v43, -inf  ;;  %v3889_v55 = vpack.c.bf16 %v3128_v58, %v3127_v12  ;;  %v3130_v31 = vld [vmem:[%s5359_s5 + $0x38] sm:$0xff]  ;;  %v3132_v26 = vld [vmem:[%s5359_s5 + $0x48] sm:$0xff]  ;;  %v3512_v58 = vld [vmem:[%s5358_s4] ss:$0 sm:$0xff] }
 0x2ac   : > { %v2420_v32 = vmax.f32 %v5093_v24, %v2419_v16  ;;  %v2381_v47 = vsel %vm1095_vm6, %v2300_v57, -inf  ;;  %3767 = vmatpush3.bf16.msra.mxu1 %v4056_v49  ;;  %v2742_v15 = vpack.c.bf16 %v2401_v22, %v2401_v22  ;;  %v3129_v49 = vld [vmem:[%s5359_s5 + $0x30] sm:$0xff]  ;;  %v3131_v22 = vld [vmem:[%s5359_s5 + $0x40] sm:$0xff]  ;;  %v3134_v16 = vld [vmem:[%s5359_s5 + $0x58] sm:$0xff] }
 0x2ad   : > { %v2618_v35 = vpack.c.bf16 %v2363_v48, %v2363_v48  ;;  %v2382_v45 = vmax.f32 %v2380_v20, %v2381_v47  ;;  %3772 = vmatprep.subr.bf16.mxu1 %v4179_v23  ;;  %v3892_v43 = vpack.c.bf16 %v3130_v31, %v3129_v49  ;;  %v3895_v57 = vpack.c.bf16 %v3132_v26, %v3131_v22  ;;  %v3133_v48 = vld [vmem:[%s5359_s5 + $0x50] sm:$0xff]  ;;  %v3135_v47 = vld [vmem:[%s5359_s5 + $0x60] sm:$0xff] }
 0x2ae   : > { %v3217_v31 = vld [vmem:[%s5361_s7] sm:$0xff] }
 0x2af   : > { %3769 = vmatmul.mubr.msk.bf16.vlgmr.msra.gmra.mrb[24].mxu1 %vm1095_vm6, %v2618_v35  ;;  %v2680_v38 = vpack.c.bf16 %v2382_v45, %v2382_v45  ;;  %v3137_v45 = vld [vmem:[%s5359_s5 + $0x70] sm:$0xff] }
 0x2b0   : > { %3773 = vmatpush3.bf16.msra.mxu1 %v4057_v53  ;;  %3776 = vmatprep.mubr.msk.bf16.mxu1 %vm4180_vm0, %v4179_v23  ;;  %v3136_v53 = vld [vmem:[%s5359_s5 + $0x68] sm:$0xff] }
 0x2b1   : > { %3774 = vmatprep.subr.bf16.mxu1 %v4179_v23  ;;  %v3901_v35 = vpack.c.bf16 %v3136_v53, %v3135_v47  ;;  %v3220_v47 = vld [vmem:[%s5361_s7 + $0x18] sm:$0xff] }
 0x2b4   : > { %3775 = vmatpush3.bf16.msra.mxu1 %v4058_v7  ;;  %v3746_v24 = vpop.f32.mrb[12].mxu1  ;;  %v3138_v7 = vld [vmem:[%s5359_s5 + $0x78] sm:$0xff] }
 0x2b5   : > { %v2201_v46 = vadd.f32 %v5047_v9, %v3746_v24  ;;  %v2192_v36 = vpop.f32.mrb[13].mxu1  ;;  %3780 = vmatprep.subr.bf16.mxu1 %v4179_v23  ;;  %v3904_v24 = vpack.c.bf16 %v3138_v7, %v3137_v45  ;;  %v3222_v45 = vld [vmem:[%s5361_s7 + $0x28] sm:$0xff] }
 0x2b6   : > { %v2193_v19 = vadd.f32 %v5047_v9, %v2192_v36  ;;  %v3747_v40 = vpop.f32.mrb[14].mxu1 }
 0x2b7   : > { %v2305_v30 = vmax.f32 %v2201_v46, 0.0  ;;  %v2204_v20 = vadd.f32 %v5047_v9, %v3747_v40  ;;  %v2195_v10 = vpop.f32.mrb[15].mxu1  ;;  %3777 = vmatmul.mubr.msk.bf16.vlgmr.msra.gmra.mrb[28].mxu1 %vm1095_vm6, %v2680_v38 }
 0x2b8   : > { %v2303_v39 = vmax.f32 %v2193_v19, 0.0  ;;  %v2196_v41 = vadd.f32 %v5047_v9, %v2195_v10  ;;  %3781 = vmatpush3.bf16.msra.mxu1 %v4059_v21  ;;  %3784 = vmatprep.mubr.msk.bf16.mxu1 %vm4180_vm0, %v4179_v23 }
 0x2b9   : > { %v2476_v42 = vsel %vm1095_vm6, %v2305_v30, -inf  ;;  %v2306_v44 = vmax.f32 %v2204_v20, 0.0  ;;  %3782 = vmatprep.subr.bf16.mxu1 %v4179_v23 }
 0x2ba   : > { %v2477_v33 = vmax.f32 %v5118_v51, %v2476_v42  ;;  %v2438_v34 = vsel %vm1095_vm6, %v2303_v39, -inf  ;;  %v2304_v0 = vmax.f32 %v2196_v41, 0.0  ;;  %v4065_v51 = vld [vmem:[%s5357_s3 + $0x70] sm:$0xff]  }
 0x2bb   : > { %v2439_v9 = vmax.f32 %v5084_v3, %v2438_v34  ;;  %v2495_v13 = vsel %vm1095_vm6, %v2306_v44, -inf  ;;  %v4062_v3 = vld [vmem:[%s5357_s3 + $0x58] sm:$0xff]  }
 0x2bc   : > { %v2496_v54 = vmax.f32 %v5122_v25, %v2495_v13  ;;  %v2457_v1 = vsel %vm1095_vm6, %v2304_v0, -inf  ;;  %3783 = vmatpush3.bf16.msra.mxu1 %v4060_v2  ;;  %v2990_v5 = vpack.c.bf16 %v2477_v33, %v2477_v33 }
 0x2bd   : > { %v2458_v56 = vmax.f32 %v5090_v11, %v2457_v1  ;;  %3788 = vmatprep.subr.bf16.mxu1 %v4179_v23  ;;  %v2804_v11 = vpack.c.bf16 %v2420_v32, %v2420_v32  ;;  %v2866_v27 = vpack.c.bf16 %v2439_v9, %v2439_v9  ;;  %v3898_v32 = vpack.c.bf16 %v3134_v16, %v3133_v48 }
 0x2be   : > { %v3052_v63 = vpack.c.bf16 %v2496_v54, %v2496_v54 }
 0x2bf   : > { %3785 = vmatmul.mubr.msk.bf16.vlgmr.msra.gmra.mrb[32].mxu1 %vm1095_vm6, %v2742_v15  ;;  %v2928_v25 = vpack.c.bf16 %v2458_v56, %v2458_v56 }
 0x2c0   : > { %3789 = vmatpush3.bf16.msra.mxu1 %v4061_v4  ;;  %3792 = vmatprep.mubr.msk.bf16.mxu1 %vm4180_vm0, %v4179_v23 }
 0x2c1   : > { %3790 = vmatprep.subr.bf16.mxu1 %v4179_v23 }
 0x2c4   : > { %3791 = vmatpush3.bf16.msra.mxu1 %v4062_v3 }
 0x2c5   : > { %3796 = vmatprep.subr.bf16.mxu1 %v4179_v23 }
 0x2c7   : > { %3793 = vmatmul.mubr.msk.bf16.vlgmr.msra.gmra.mrb[36].mxu1 %vm1095_vm6, %v2804_v11 }
 0x2c8   : > { %3797 = vmatpush3.bf16.msra.mxu1 %v4063_v37  ;;  %3800 = vmatprep.mubr.msk.bf16.mxu1 %vm4180_vm0, %v4179_v23 }
 0x2c9   : > { %3798 = vmatprep.subr.bf16.mxu1 %v4179_v23 }
 0x2cc   : > { %3799 = vmatpush3.bf16.msra.mxu1 %v4064_v18 }
 0x2cd   : > { %3804 = vmatprep.subr.bf16.mxu1 %v4179_v23 }
 0x2cf   : > { %3801 = vmatmul.mubr.msk.bf16.vlgmr.msra.gmra.mrb[40].mxu1 %vm1095_vm6, %v2866_v27 }
 0x2d0   : > { %3805 = vmatpush3.bf16.msra.mxu1 %v4065_v51  ;;  %3808 = vmatprep.mubr.msk.bf16.mxu1 %vm4180_vm0, %v4179_v23 }
 0x2d1   : > { %3806 = vmatprep.subr.bf16.mxu1 %v4179_v23 }
 0x2d4   : > { %3807 = vmatpush3.bf16.msra.mxu1 %v4066_v29 }
 0x2d5   : > { %3812 = vmatprep.subr.bf16.mxu1 %v4179_v23 }
 0x2d7   : > { %3809 = vmatmul.mubr.msk.bf16.vlgmr.msra.gmra.mrb[44].mxu1 %vm1095_vm6, %v2928_v25 }
 0x2d8   : > { %3813 = vmatpush3.bf16.msra.mxu1 %v4067_v61  ;;  %3816 = vmatprep.mubr.msk.bf16.mxu1 %vm4180_vm0, %v4179_v23 }
 0x2d9   : > { %3814 = vmatprep.subr.bf16.mxu1 %v4179_v23 }
 0x2dc   : > { %3815 = vmatpush3.bf16.msra.mxu1 %v4068_v52 }
 0x2dd   : > { %3820 = vmatprep.subr.bf16.mxu1 %v4179_v23 }
 0x2df   : > { %3817 = vmatmul.mubr.msk.bf16.vlgmr.msra.gmra.mrb[48].mxu1 %vm1095_vm6, %v2990_v5 }
 0x2e0   : > { %3821 = vmatpush3.bf16.msra.mxu1 %v4069_v8  ;;  %3824 = vmatprep.mubr.msk.bf16.mxu1 %vm4180_vm0, %v4179_v23 }
 0x2e1   : > { %3822 = vmatprep.subr.bf16.mxu1 %v4179_v23 }
 0x2e4   : > { %3823 = vmatpush3.bf16.msra.mxu1 %v4070_v62 }
 0x2e5   : > { %3882 = vmatprep.subr.bf16.mxu1 %v4181_v59 }
 0x2e7   : > { %3825 = vmatmul.mubr.msk.bf16.vlgmr.msra.gmra.mrb[52].mxu1 %vm1095_vm6, %v3052_v63 }
 0x2e8   : > { %3860 = vmatprep.mubr.msk.f32.mxu1 %vm4180_vm0, %v4179_v23  ;;  %3884 = vmatpush3.bf16.msra.mxu1 %v3883_v14 }
 0x2e9   : > { %3885 = vmatprep.subr.bf16.mxu1 %v4181_v59 }
 0x2ec   : > { %3887 = vmatpush3.bf16.msra.mxu1 %v3886_v6 }
 0x2ed   : > { %3888 = vmatprep.subr.bf16.mxu1 %v4181_v59 }
 0x2f0   : > { %3890 = vmatpush3.bf16.msra.mxu1 %v3889_v55 }
 0x2f1   : > { %3891 = vmatprep.subr.bf16.mxu1 %v4181_v59 }
 0x2f4   : > { %3893 = vmatpush3.bf16.msra.mxu1 %v3892_v43  ;;  %v3218_v43 = vld [vmem:[%s5361_s7 + $0x8] sm:$0xff] }
 0x2f5   : > { %3894 = vmatprep.subr.bf16.mxu1 %v4181_v59  ;;  %v3907_v48 = vpack.c.bf16 %v3218_v43, %v3217_v31 }
 0x2f8   : > { %3896 = vmatpush3.bf16.msra.mxu1 %v3895_v57 }
 0x2f9   : > { %3897 = vmatprep.subr.bf16.mxu1 %v4181_v59 }
 0x2fc   : > { %3899 = vmatpush3.bf16.msra.mxu1 %v3898_v32  ;;  %v3219_v32 = vld [vmem:[%s5361_s7 + $0x10] sm:$0xff] }
 0x2fd   : > { %3900 = vmatprep.subr.bf16.mxu1 %v4181_v59  ;;  %v3910_v53 = vpack.c.bf16 %v3220_v47, %v3219_v32 }
 0x300   : > { %3902 = vmatpush3.bf16.msra.mxu1 %v3901_v35  ;;  %v3221_v35 = vld [vmem:[%s5361_s7 + $0x20] sm:$0xff] }
 0x301   : > { %3903 = vmatprep.subr.bf16.mxu1 %v4181_v59  ;;  %v3913_v7 = vpack.c.bf16 %v3222_v45, %v3221_v35 }
 0x304   : > { %3905 = vmatpush3.bf16.msra.mxu1 %v3904_v24  ;;  %v3224_v24 = vld [vmem:[%s5361_s7 + $0x38] sm:$0xff] }
 0x305   : > { %3906 = vmatprep.subr.bf16.mxu1 %v4181_v59 }
 0x372   : > { %v2557_v21 = vpop.f32.mrb[16].mxu1 }
 0x373   : > { %v3754_v38 = vpop.f32.mrb[17].mxu1 }
 0x374   : > { %v2560_v46 = vpop.f32.mrb[18].mxu1  ;;  %v3513_v38 = vld [vmem:[%s5360_s6] ss:$0 sm:$0xff] }
 0x375   : > { %v3755_v36 = vpop.f32.mrb[19].mxu1 }
 0x37a   : > { %v2612_v19 = vpop.f32.mrb[20].mxu1 }
 0x37b   : > { %v2613_v40 = vadd.f32 %v2612_v19, %v2557_v21  ;;  %v3762_v30 = vpop.f32.mrb[21].mxu1 }
 0x37c   : > { %v2615_v20 = vpop.f32.mrb[22].mxu1 }
 0x37d   : > { %v3763_v10 = vpop.f32.mrb[23].mxu1 }
 0x382   : > { %v2673_v39 = vpop.f32.mrb[24].mxu1 }
 0x383   : > { %v2679_v41 = vadd.f32 %v2673_v39, %v2613_v40  ;;  %v3770_v2 = vpop.f32.mrb[25].mxu1  ;;  %v3516_v39 = vld [vmem:[%s5363_s9] ss:$0 sm:$0xff] }
 0x384   : > { %v2676_v42 = vpop.f32.mrb[26].mxu1 }
 0x385   : > { %v3771_v44 = vpop.f32.mrb[27].mxu1 }
 0x386   : > { %v3517_v44 = vld [vmem:[#allocation3] ss:$0 sm:$0xff] }
 0x38a   : > { %v2735_v33 = vpop.f32.mrb[28].mxu1 }
 0x38b   : > { %v2741_v34 = vadd.f32 %v2735_v33, %v2679_v41  ;;  %v3778_v0 = vpop.f32.mrb[29].mxu1 }
 0x38c   : > { %v2738_v9 = vpop.f32.mrb[30].mxu1 }
 0x38d   : > { %v3779_v13 = vpop.f32.mrb[31].mxu1 }
 0x392   : > { %v2797_v54 = vpop.f32.mrb[32].mxu1 }
 0x393   : > { %v2803_v1 = vadd.f32 %v2797_v54, %v2741_v34  ;;  %v3786_v4 = vpop.f32.mrb[33].mxu1 }
 0x394   : > { %v2800_v15 = vpop.f32.mrb[34].mxu1 }
 0x395   : > { %v3787_v56 = vpop.f32.mrb[35].mxu1 }
 0x39a   : > { %v2859_v3 = vpop.f32.mrb[36].mxu1 }
 0x39b   : > { %v2865_v37 = vadd.f32 %v2859_v3, %v2803_v1  ;;  %v3794_v11 = vpop.f32.mrb[37].mxu1 }
 0x39c   : > { %v2862_v18 = vpop.f32.mrb[38].mxu1 }
 0x39d   : > { %v3795_v51 = vpop.f32.mrb[39].mxu1 }
 0x3a2   : > { %v2921_v27 = vpop.f32.mrb[40].mxu1 }
 0x3a3   : > { %v2927_v29 = vadd.f32 %v2921_v27, %v2865_v37  ;;  %v3802_v61 = vpop.f32.mrb[41].mxu1 }
 0x3a4   : > { %v2924_v25 = vpop.f32.mrb[42].mxu1 }
 0x3a5   : > { %v3803_v52 = vpop.f32.mrb[43].mxu1 }
 0x3aa   : > { %v2983_v8 = vpop.f32.mrb[44].mxu1 }
 0x3ab   : > { %v2989_v5 = vadd.f32 %v2983_v8, %v2927_v29  ;;  %v3810_v62 = vpop.f32.mrb[45].mxu1 }
 0x3ac   : > { %v2986_v63 = vpop.f32.mrb[46].mxu1 }
 0x3ad   : > { %v3811_v17 = vpop.f32.mrb[47].mxu1 }
 0x3b2   : > { %v3045_v28 = vpop.f32.mrb[48].mxu1 }
 0x3b3   : > { %v3051_v14 = vadd.f32 %v3045_v28, %v2989_v5  ;;  %v3818_v60 = vpop.f32.mrb[49].mxu1 }
 0x3b4   : > { %v3048_v50 = vpop.f32.mrb[50].mxu1 }
 0x3b5   : > { %v3819_v6 = vpop.f32.mrb[51].mxu1 }
 0x3ba   : > { %v3107_v12 = vpop.f32.mrb[52].mxu1 }
 0x3bb   : > { %v3113_v55 = vadd.f32 %v3107_v12, %v3051_v14  ;;  %v3826_v49 = vpop.f32.mrb[53].mxu1 }
 0x3bc   : > { %v3110_v22 = vpop.f32.mrb[54].mxu1 }
 0x3bd   : > { %v3121_v26 = vadd.f32 %v3512_v58, %v3113_v55  ;;  %v3827_v57 = vpop.f32.mrb[55].mxu1 }
 0x3bf   : > { %v3122_v16 = vmax.f32 %v3121_v26, 0.0 }
 0x3c1   : > { %3861 = vmatmul.mubr.f32.vlgmr.msra.gmra.mrb[56].mxu1 %v3122_v16 }
 0x3c2   : > { %3908 = vmatpush3.bf16.msra.mxu1 %v3907_v48  ;;  %3879 = vmatprep.mubr.msk.f32.mxu1 %vm4180_vm0, %v4179_v23  ;;  %v3223_v23 = vld [vmem:[%s5361_s7 + $0x30] sm:$0xff] }
 0x3c3   : > { %3909 = vmatprep.subr.bf16.mxu1 %v4181_v59  ;;  %v3916_v21 = vpack.c.bf16 %v3224_v24, %v3223_v23 }
 0x3c6   : > { %3911 = vmatpush3.bf16.msra.mxu1 %v3910_v53 }
 0x3c7   : > { %3912 = vmatprep.subr.bf16.mxu1 %v4181_v59 }
 0x3ca   : > { %3914 = vmatpush3.bf16.msra.mxu1 %v3913_v7 }
 0x3cb   : > { %3915 = vmatprep.subr.bf16.mxu1 %v4181_v59  ;;  %v3514_v59 = vld [vmem:[%s5362_s8] ss:$0 sm:$0xff] }
 0x3ce   : > { %3917 = vmatpush3.bf16.msra.mxu1 %v3916_v21 }
 0x494   : > { %v3212_v46 = vpop.f32.mrb[56].mxu1 }
 0x495   : > { %v3213_v36 = vadd.f32 %v3513_v38, %v3212_v46  ;;  %v3862_v19 = vpop.f32.mrb[57].mxu1 }
 0x497   : > { %v3216_v40 = vmax.f32 %v3213_v36, 0.0 }
 0x499   : > { %3880 = vmatmul.mubr.msk.f32.vlgmr.msra.gmra.mrb[58].mxu1 %vm855_vm3, %v3216_v40  ;;  %vm3325_vm3 = vcmask 7168  }
 0x56c   : > { %v3301_v30 = vpop.f32.mrb[58].mxu1 }
 0x56d   : > { %v3302_v20 = vadd.f32 %v3514_v59, %v3301_v30  ;;  %v3881_v10 = vpop.f32.mrb[59].mxu1 }
 0x56f   : > { %v3305_v41 = vmax.f32 %v3302_v20, 0.0 }
 0x571   : > { %v3313_v2 = vmul.f32 %v3516_v39, %v3305_v41 }
 0x573   : > { %v3314_v42 = vsel %vm1095_vm6, %v3313_v2, 0.0 }
 0x574   : > { %3315 = vadd.xlane.f32.xlu0 %v3314_v42 }
 0x601   : > { %v3316_v33 = vpop.xlane.xlu0 %3315 }
 0x602   : > { %v3324_v34 = vadd.f32 %v3517_v44, %v3316_v33 }
 0x604   : > { %3326 = vst.msk [vmem:[%s386_s28] sm:$0xff] %vm3325_vm3, %v3324_v34 }
 0x605 PF: > { %s23_s19 = sadd.s32 1, %s4078_s19  }
 0x606   : > { %p20_p4 = scmp.ge.s32.totalorder %s23_s19, 4  }
 0x608   :  { %22 = sbr.rel (!%p20_p4) target bundleno = 3 (0x3), region = 103 }

</bundles_post_ra>
